<compile_context>
chip_gen: v7x
topology: tpu7x:2x2x1
jax: 0.10.0
libtpu: 0.0.40
codegen_flags: <defaults>
</compile_context>

<pallas_src>
import jax
import jax.numpy as jnp
from jax.experimental import pallas as pl
from jax.experimental.pallas import tpu as pltpu


_COMPILER_PARAMS = pltpu.CompilerParams(
    dimension_semantics=("parallel",),
    vmem_limit_bytes=32 * 1024 * 1024,
)


# ----------------------------------------------------------------------------
# Pallas kernels
# ----------------------------------------------------------------------------

def _fused_pipeline_kernel(x_ref, w_ref, b_ref, den_ref, stats_ref):
    # x_ref:  (t, T, C) raw waveforms (f32), HBM layout preserved.
    # w_ref:  (T, T+R) bf16 = [P | Wf^T]  (denoiser recon matrix | featurizer basis)
    # b_ref:  (1, T+R) f32 fused bias = [mean_d - mean_d @ P | -(mean_f @ Wf^T)]
    # den_ref:   (t, T, C) denoised waveforms (f32).
    # stats_ref: (t*C, R+2) per-(spike, channel) row of [tpca proj | max_t | min_t].
    t, T, C = x_ref.shape
    # (T, C) -> (C, T) swap on-chip (XLU) so HBM keeps the module's layout.
    rows = jnp.transpose(x_ref[...], (0, 2, 1)).reshape(t * C, T)
    # One lane-dense MXU matmul (bf16 operands, f32 accumulation):
    #   cols [0, T)   -> denoised reconstruction rows
    #   cols [T, T+R) -> temporal-PCA projections of the *raw* rows
    y = jnp.dot(rows.astype(jnp.bfloat16), w_ref[...],
                preferred_element_type=jnp.float32) + b_ref[...]
    den_rows = y[:, :T]
    rmax = jnp.max(den_rows, axis=1, keepdims=True)
    rmin = jnp.min(den_rows, axis=1, keepdims=True)
    # Single narrow side-output stream per grid step.
    stats_ref[...] = jnp.concatenate([y[:, T:], rmax, rmin], axis=1)
    den_ref[...] = jnp.transpose(den_rows.reshape(t, C, T), (0, 2, 1))


def _project_kernel(x_ref, w_ref, b_ref, out_ref):
    # Standalone TPCA featurizer: out rows = x_rows @ Wf^T + bias.
    t, T, C = x_ref.shape
    rows = jnp.transpose(x_ref[...], (0, 2, 1)).reshape(t * C, T)
    out_ref[...] = jnp.dot(rows.astype(jnp.bfloat16), w_ref[...],
                           preferred_element_type=jnp.float32) + b_ref[...]


def _denoise_kernel(x_ref, p_ref, b_ref, den_ref):
    # Standalone TPCA denoiser: den rows = x_rows @ P + bias, stored back (t,T,C).
    t, T, C = x_ref.shape
    rows = jnp.transpose(x_ref[...], (0, 2, 1)).reshape(t * C, T)
    den_rows = jnp.dot(rows.astype(jnp.bfloat16), p_ref[...],
                       preferred_element_type=jnp.float32) + b_ref[...]
    den_ref[...] = jnp.transpose(den_rows.reshape(t, C, T), (0, 2, 1))


def _amplitude_kernel(x_ref, out_ref):
    # Per-(spike, channel) max/min over time (sublane reductions, no transpose).
    x = x_ref[...]
    out_ref[...] = jnp.concatenate(
        [jnp.max(x, axis=1, keepdims=True), jnp.min(x, axis=1, keepdims=True)],
        axis=1)


# ----------------------------------------------------------------------------
# Tiling helpers
# ----------------------------------------------------------------------------

def _spike_tiling(n_spikes, tile):
    """Pick a spike tile <= `tile` that (a) keeps >= 2 grid steps when N >= 2
    (so the parallel grid axis can shard across v7x's two TensorCores) and
    (b) prefers an exact divisor of N so no XLA pad-copy of the waveform
    tensor is needed."""
    tile = max(1, int(tile))
    t0 = max(1, min(tile, -(-n_spikes // 2)))   # ceil(N/2), capped at tile
    t = t0
    for cand in range(t0, max(1, t0 // 2) - 1, -1):
        if n_spikes % cand == 0:
            t = cand
            break
    n_pad = -(-n_spikes // t) * t
    return t, n_pad


def _pad_spikes(x, n_pad):
    n = x.shape[0]
    if n_pad == n:
        return x
    # TODO(synk): this pad copies the waveform tensor once; it is only hit when
    # no nearby tile divides n_spikes (e.g. prime batch sizes).
    return jnp.pad(x, ((0, n_pad - n),) + ((0, 0),) * (x.ndim - 1))


# ----------------------------------------------------------------------------
# Pallas wrappers
# ----------------------------------------------------------------------------

def fused_project_denoise_stats(waveforms, w_cat, bias_cat, *, tile=32):
    """One HBM pass over (N, T, C): TPCA projections of the raw waveforms,
    denoised waveforms, and per-(spike, channel) max/min over time."""
    x = jnp.asarray(waveforms, jnp.float32)
    N, T, C = x.shape
    U = w_cat.shape[1]
    R = U - T
    t, n_pad = _spike_tiling(N, tile)
    x = _pad_spikes(x, n_pad)

    den, stats = pl.pallas_call(
        _fused_pipeline_kernel,
        out_shape=(
            jax.ShapeDtypeStruct((n_pad, T, C), jnp.float32),
            jax.ShapeDtypeStruct((n_pad * C, R + 2), jnp.float32),
        ),
        grid_spec=pltpu.PrefetchScalarGridSpec(
            num_scalar_prefetch=0,
            grid=(n_pad // t,),
            in_specs=[
                pl.BlockSpec((t, T, C), lambda i: (i, 0, 0)),
                pl.BlockSpec((T, U), lambda i: (0, 0)),
                pl.BlockSpec((1, U), lambda i: (0, 0)),
            ],
            out_specs=(
                pl.BlockSpec((t, T, C), lambda i: (i, 0, 0)),
                pl.BlockSpec((t * C, R + 2), lambda i: (i, 0)),
            ),
        ),
        compiler_params=_COMPILER_PARAMS,
    )(x, w_cat, bias_cat)

    if n_pad != N:
        den = den[:N]
    stats = stats[:N * C].reshape(N, C, R + 2)      # tiny array from here on
    proj = jnp.transpose(stats[:, :, :R], (0, 2, 1))  # (N, R, C)
    rowmax = stats[:, :, R]
    rowmin = stats[:, :, R + 1]
    return den, proj, rowmax, rowmin


def project_spikes(waveforms, w_bf16, bias, *, tile=32):
    """(N, T, C) -> TPCA projections (N, R, C)."""
    x = jnp.asarray(waveforms, jnp.float32)
    N, T, C = x.shape
    R = w_bf16.shape[1]
    t, n_pad = _spike_tiling(N, tile)
    x = _pad_spikes(x, n_pad)
    out = pl.pallas_call(
        _project_kernel,
        out_shape=jax.ShapeDtypeStruct((n_pad * C, R), jnp.float32),
        grid_spec=pltpu.PrefetchScalarGridSpec(
            num_scalar_prefetch=0,
            grid=(n_pad // t,),
            in_specs=[
                pl.BlockSpec((t, T, C), lambda i: (i, 0, 0)),
                pl.BlockSpec((T, R), lambda i: (0, 0)),
                pl.BlockSpec((1, R), lambda i: (0, 0)),
            ],
            out_specs=pl.BlockSpec((t * C, R), lambda i: (i, 0)),
        ),
        compiler_params=_COMPILER_PARAMS,
    )(x, w_bf16, bias)
    out = out[:N * C].reshape(N, C, R)
    return jnp.transpose(out, (0, 2, 1))


def denoise_spikes(waveforms, p_bf16, bias, *, tile=32):
    """(N, T, C) -> denoised (N, T, C)."""
    x = jnp.asarray(waveforms, jnp.float32)
    N, T, C = x.shape
    t, n_pad = _spike_tiling(N, tile)
    x = _pad_spikes(x, n_pad)
    den = pl.pallas_call(
        _denoise_kernel,
        out_shape=jax.ShapeDtypeStruct((n_pad, T, C), jnp.float32),
        grid_spec=pltpu.PrefetchScalarGridSpec(
            num_scalar_prefetch=0,
            grid=(n_pad // t,),
            in_specs=[
                pl.BlockSpec((t, T, C), lambda i: (i, 0, 0)),
                pl.BlockSpec((T, T), lambda i: (0, 0)),
                pl.BlockSpec((1, T), lambda i: (0, 0)),
            ],
            out_specs=pl.BlockSpec((t, T, C), lambda i: (i, 0, 0)),
        ),
        compiler_params=_COMPILER_PARAMS,
    )(x, p_bf16, bias)
    if n_pad != N:
        den = den[:N]
    return den


def amplitude_minmax(waveforms, *, tile=32):
    """(N, T, C) -> per-channel max and min over time, each (N, C)."""
    x = jnp.asarray(waveforms, jnp.float32)
    N, T, C = x.shape
    t, n_pad = _spike_tiling(N, tile)
    x = _pad_spikes(x, n_pad)
    out = pl.pallas_call(
        _amplitude_kernel,
        out_shape=jax.ShapeDtypeStruct((n_pad, 2, C), jnp.float32),
        grid_spec=pltpu.PrefetchScalarGridSpec(
            num_scalar_prefetch=0,
            grid=(n_pad // t,),
            in_specs=[pl.BlockSpec((t, T, C), lambda i: (i, 0, 0))],
            out_specs=pl.BlockSpec((t, 2, C), lambda i: (i, 0, 0)),
        ),
        compiler_params=_COMPILER_PARAMS,
    )(x)
    return out[:N, 0, :], out[:N, 1, :]


# ----------------------------------------------------------------------------
# Transformer classes + WaveformPipeline (same control flow as the PyTorch
# module, plus a fused fast path for the canonical transformer sequence)
# ----------------------------------------------------------------------------

def check_unique_feature_names(transformers):
    fnames = []
    for f in transformers:
        if f.is_featurizer:
            if f.is_multi:
                fnames.extend(f.name)
            else:
                fnames.append(f.name)
    if not len(fnames) == len(set(fnames)):
        raise ValueError("Featurizer name collision in a WaveformPipeline")


class TemporalPCAFeaturizer:
    is_featurizer = True
    is_denoiser = False
    is_multi = False

    def __init__(self, name, mean, components, *, spike_tile=32):
        self.name = name
        self.spike_tile = spike_tile
        self.mean = jnp.asarray(mean, jnp.float32)               # (T,)
        self.components = jnp.asarray(components, jnp.float32)   # (R, T)
        # proj = (x - mean) @ W^T  ==  x @ W^T + (-(mean @ W^T))
        self.w_proj = self.components.T                           # (T, R) f32
        self.proj_bias = (-(self.mean @ self.w_proj)).reshape(1, -1)
        self.w_proj_bf16 = self.w_proj.astype(jnp.bfloat16)

    def transform(self, waveforms, max_channels=None):
        proj = project_spikes(waveforms, self.w_proj_bf16, self.proj_bias,
                              tile=self.spike_tile)
        return {self.name: proj}


class TemporalPCADenoiser:
    is_featurizer = False
    is_denoiser = True
    is_multi = False

    def __init__(self, mean, components, *, spike_tile=32):
        self.spike_tile = spike_tile
        self.mean = jnp.asarray(mean, jnp.float32)               # (T,)
        self.components = jnp.asarray(components, jnp.float32)   # (R, T)
        # recon = (x - mean) @ W^T @ W + mean  ==  x @ P + (mean - mean @ P)
        self.p_mat = self.components.T @ self.components          # (T, T) f32
        self.den_bias = (self.mean - self.mean @ self.p_mat).reshape(1, -1)
        self.p_bf16 = self.p_mat.astype(jnp.bfloat16)

    def __call__(self, waveforms, max_channels=None):
        return denoise_spikes(waveforms, self.p_bf16, self.den_bias,
                              tile=self.spike_tile)


class AmplitudeFeatures:
    is_featurizer = True
    is_denoiser = False
    is_multi = True
    name = (
        "amplitudes",
        "ptp_amplitude_vectors",
        "peak_amplitude_vectors",
        "logpeaktotrough",
    )

    def __init__(self, *, spike_tile=32):
        self.spike_tile = spike_tile

    @staticmethod
    def features_from_rowstats(rowmax, rowmin):
        # rowmax/rowmin: (N, C) per-channel max/min over time.
        ptp = rowmax - rowmin
        peak = jnp.maximum(rowmax, -rowmin)
        amps = jnp.max(ptp, axis=1)
        mc = jnp.argmax(ptp, axis=1)
        cmax = jnp.take_along_axis(rowmax, mc[:, None], axis=1)[:, 0]
        cmin = jnp.take_along_axis(rowmin, mc[:, None], axis=1)[:, 0]
        eps = jnp.float32(1e-10)
        # TODO(synk): dartsort clamps both legs at eps, so degenerate spikes map
        # to log(eps) differences instead of NaN/inf; kept identical here.
        logptt = jnp.log(jnp.maximum(cmax, eps)) - jnp.log(jnp.maximum(-cmin, eps))
        return {
            "amplitudes": amps,
            "ptp_amplitude_vectors": ptp,
            "peak_amplitude_vectors": peak,
            "logpeaktotrough": logptt,
        }

    def transform(self, waveforms, max_channels=None):
        rmax, rmin = amplitude_minmax(waveforms, tile=self.spike_tile)
        return self.features_from_rowstats(rmax, rmin)


class WaveformPipeline:
    def __init__(self, transformers):
        check_unique_feature_names(transformers)
        self.transformers = list(transformers)
        self._wcat = None
        self._bias_cat = None
        if self._fusable():
            feat_t, den_t, _ = self.transformers
            assert feat_t.w_proj.shape[0] == den_t.p_mat.shape[0]
            # Fused RHS [P | Wf^T] and fused bias: one MXU pass produces both the
            # denoised rows and the projections of the raw rows.
            # TODO(synk): when featurizer/denoiser share the same basis, P could
            # be skipped by reusing the projection (coef @ W); not assumed here.
            self._wcat = jnp.concatenate(
                [den_t.p_mat, feat_t.w_proj], axis=1).astype(jnp.bfloat16)
            self._bias_cat = jnp.concatenate(
                [den_t.den_bias, feat_t.proj_bias], axis=1)

    def __call__(self, waveforms, max_channels):
        return self.forward(waveforms, max_channels)

    def _fusable(self):
        return (
            len(self.transformers) == 3
            and isinstance(self.transformers[0], TemporalPCAFeaturizer)
            and isinstance(self.transformers[1], TemporalPCADenoiser)
            and isinstance(self.transformers[2], AmplitudeFeatures)
        )

    def forward(self, waveforms, max_channels):
        assert waveforms.ndim == 3
        assert max_channels.shape[0] == waveforms.shape[0]
        features = {}
        if not waveforms.shape[0]:
            return (waveforms, features)
        # TODO(synk): max_channels is accepted but unused — these transformers
        # do not restrict to a channel subset (matches the instantiated config).
        if self._wcat is not None:
            feat_t, _, amp_t = self.transformers
            den, proj, rowmax, rowmin = fused_project_denoise_stats(
                waveforms, self._wcat, self._bias_cat, tile=feat_t.spike_tile)
            features[feat_t.name] = proj
            features.update(amp_t.features_from_rowstats(rowmax, rowmin))
            return (den, features)
        # Generic fallback: identical control flow to the PyTorch module.
        for transformer in self.transformers:
            if transformer.is_featurizer and transformer.is_denoiser:
                waveforms, new_features = transformer(
                    waveforms, max_channels=max_channels)
                features.update(new_features)
            elif transformer.is_featurizer:
                features.update(
                    transformer.transform(waveforms, max_channels=max_channels))
            elif transformer.is_denoiser:
                waveforms = transformer(waveforms, max_channels=max_channels)
        return (waveforms, features)

    def __iter__(self):
        return iter(self.transformers)


# ----------------------------------------------------------------------------
# Deterministic synthetic parameters + demo run
# ----------------------------------------------------------------------------

def make_tpca_params(key, rank, T):
    km, kc = jax.random.split(key)
    mean = 0.1 * jax.random.normal(km, (T,), jnp.float32)
    raw = jax.random.normal(kc, (T, rank), jnp.float32)
    q, _ = jnp.linalg.qr(raw)              # orthonormal temporal basis (T, R)
    components = q.T.astype(jnp.float32)   # (R, T)
    return mean, components


if __name__ == "__main__":
    key = jax.random.PRNGKey(0)
    # spikes, spike_length_samples, channels, tpca rank
    N, T, C, R = 40, 128, 16, 8

    k_wf, k_mc, k_p1, k_p2 = jax.random.split(key, 4)
    waveforms = jax.random.normal(k_wf, (N, T, C), jnp.float32)
    max_channels = jax.random.randint(k_mc, (N,), 0, C, dtype=jnp.int32)

    mean_f, comps_f = make_tpca_params(k_p1, R, T)
    mean_d, comps_d = make_tpca_params(k_p2, R, T)

    # --- Fused fast path (canonical transformer order) ----------------------
    pipeline = WaveformPipeline(
        [
            TemporalPCAFeaturizer("tpca_features", mean_f, comps_f),
            TemporalPCADenoiser(mean_d, comps_d),
            AmplitudeFeatures(),
        ]
    )
    wf_out, feats = pipeline(waveforms, max_channels)
    jax.block_until_ready(wf_out)
    for v in feats.values():
        jax.block_until_ready(v)

    # Shape checks
    assert wf_out.shape == (N, T, C)
    assert feats["tpca_features"].shape == (N, R, C)
    assert feats["ptp_amplitude_vectors"].shape == (N, C)
    assert feats["peak_amplitude_vectors"].shape == (N, C)
    assert feats["amplitudes"].shape == (N,)
    assert feats["logpeaktotrough"].shape == (N,)

    # Numerical sanity check against a pure-jnp reference of the same pipeline.
    hi = jax.lax.Precision.HIGHEST
    proj_ref = jnp.einsum("ntc,rt->nrc", waveforms - mean_f[None, :, None],
                          comps_f, precision=hi)
    coef = jnp.einsum("ntc,rt->nrc", waveforms - mean_d[None, :, None],
                      comps_d, precision=hi)
    den_ref = jnp.einsum("nrc,rt->ntc", coef, comps_d,
                         precision=hi) + mean_d[None, :, None]
    ptp_ref = den_ref.max(axis=1) - den_ref.min(axis=1)
    peak_ref = jnp.maximum(den_ref.max(axis=1), -den_ref.min(axis=1))

    TOL = dict(rtol=2e-2, atol=2e-2)
    assert jnp.allclose(feats["tpca_features"], proj_ref, **TOL)
    assert jnp.allclose(wf_out, den_ref, **TOL)
    assert jnp.allclose(feats["ptp_amplitude_vectors"], ptp_ref, **TOL)
    assert jnp.allclose(feats["peak_amplitude_vectors"], peak_ref, **TOL)
    assert jnp.allclose(feats["amplitudes"], ptp_ref.max(axis=1), **TOL)

    # --- Generic (non-fused) fallback path exercises the standalone kernels --
    pipeline2 = WaveformPipeline(
        [
            TemporalPCADenoiser(mean_d, comps_d),
            TemporalPCAFeaturizer("tpca_out", mean_f, comps_f),
            AmplitudeFeatures(),
        ]
    )
    wf2, feats2 = pipeline2(waveforms, max_channels)
    jax.block_until_ready(wf2)
    for v in feats2.values():
        jax.block_until_ready(v)

    proj2_ref = jnp.einsum("ntc,rt->nrc", den_ref - mean_f[None, :, None],
                           comps_f, precision=hi)
    TOL2 = dict(rtol=2e-2, atol=3e-2)
    assert wf2.shape == (N, T, C)
    assert jnp.allclose(wf2, den_ref, **TOL2)
    assert jnp.allclose(feats2["tpca_out"], proj2_ref, **TOL2)
    assert jnp.allclose(feats2["ptp_amplitude_vectors"], ptp_ref, **TOL2)
    assert jnp.allclose(feats2["amplitudes"], ptp_ref.max(axis=1), **TOL2)

    print("KERNEL_OK")
</pallas_src>

<mosaic_0001>
module attributes {stable_mosaic.version = 11 : i64} {
  func.func @_fused_pipeline_kernel(%arg0: i32, %arg1: memref<20x128x16xf32, #tpu.memory_space<vmem>>, %arg2: memref<128x136xbf16, #tpu.memory_space<vmem>>, %arg3: memref<1x136xf32, #tpu.memory_space<vmem>>, %arg4: memref<20x128x16xf32, #tpu.memory_space<vmem>>, %arg5: memref<320x10xf32, #tpu.memory_space<vmem>>) attributes {dimension_semantics = [#tpu.dimension_semantics<parallel>], iteration_bounds = array<i64: 2>, scalar_prefetch = 0 : i64, scratch_operands = 0 : i64, tpu.core_type = #tpu.core_type<tc>, window_params = [{transform_indices = @transform_0, window_bounds = array<i64: 20, 128, 16>}, {pipeline_mode = #tpu.pipeline_mode<synchronous>, transform_indices = @transform_1, window_bounds = array<i64: 128, 136>}, {pipeline_mode = #tpu.pipeline_mode<synchronous>, transform_indices = @transform_2, window_bounds = array<i64: 1, 136>}, {transform_indices = @transform_3, window_bounds = array<i64: 20, 128, 16>}, {transform_indices = @transform_4, window_bounds = array<i64: 320, 10>}]} {
    %c0 = arith.constant 0 : index
    %c0_0 = arith.constant 0 : index
    %c0_1 = arith.constant 0 : index
    %0 = vector.load %arg1[%c0, %c0_0, %c0_1] : memref<20x128x16xf32, #tpu.memory_space<vmem>>, vector<20x128x16xf32>
    %1 = tpu.transpose %0, [0, 2, 1] : vector<20x128x16xf32> -> vector<20x16x128xf32>
    %2 = vector.shape_cast %1 : vector<20x16x128xf32> to vector<320x128xf32>
    %3 = arith.truncf %2 : vector<320x128xf32> to vector<320x128xbf16>
    %c0_2 = arith.constant 0 : index
    %c0_3 = arith.constant 0 : index
    %4 = vector.load %arg2[%c0_2, %c0_3] : memref<128x136xbf16, #tpu.memory_space<vmem>>, vector<128x136xbf16>
    %cst = arith.constant dense<0.000000e+00> : vector<320x136xf32>
    %5 = tpu.matmul %3, %4, %cst {dimension_numbers = #tpu.dot_dimension_numbers<[1], [0], [0], [1], [0, 0, 1, 1], [], []>} : vector<320x128xbf16>, vector<128x136xbf16>, vector<320x136xf32> -> vector<320x136xf32>
    %c0_4 = arith.constant 0 : index
    %c0_5 = arith.constant 0 : index
    %6 = vector.load %arg3[%c0_4, %c0_5] : memref<1x136xf32, #tpu.memory_space<vmem>>, vector<1x136xf32>
    %7 = vector.broadcast %6 : vector<1x136xf32> to vector<320x136xf32>
    %8 = arith.addf %5, %7 : vector<320x136xf32>
    %9 = vector.extract_strided_slice %8 {offsets = [0, 0], sizes = [320, 128], strides = [1, 1]} : vector<320x136xf32> to vector<320x128xf32>
    %cst_6 = arith.constant dense<0xFF800000> : vector<320xf32>
    %10 = vector.multi_reduction <maximumf>, %9, %cst_6 [1] : vector<320x128xf32> to vector<320xf32>
    %11 = vector.shape_cast %10 : vector<320xf32> to vector<320x1xf32>
    %cst_7 = arith.constant dense<0x7F800000> : vector<320xf32>
    %12 = vector.multi_reduction <minimumf>, %9, %cst_7 [1] : vector<320x128xf32> to vector<320xf32>
    %13 = vector.shape_cast %12 : vector<320xf32> to vector<320x1xf32>
    %14 = vector.extract_strided_slice %8 {offsets = [0, 128], sizes = [320, 8], strides = [1, 1]} : vector<320x136xf32> to vector<320x8xf32>
    %15 = tpu.concatenate %14, %11, %13 in 1 : vector<320x8xf32>, vector<320x1xf32>, vector<320x1xf32> -> vector<320x10xf32>
    %c0_8 = arith.constant 0 : index
    %c0_9 = arith.constant 0 : index
    %16 = vector.load %arg5[%c0_8, %c0_9] : memref<320x10xf32, #tpu.memory_space<vmem>>, vector<320x10xf32>
    tpu.vector_store %arg5[%c0_8, %c0_9], %15 {strides = array<i32>} : memref<320x10xf32, #tpu.memory_space<vmem>>, vector<320x10xf32>,
    %17 = vector.shape_cast %9 : vector<320x128xf32> to vector<20x16x128xf32>
    %18 = tpu.transpose %17, [0, 2, 1] : vector<20x16x128xf32> -> vector<20x128x16xf32>
    %c0_10 = arith.constant 0 : index
    %c0_11 = arith.constant 0 : index
    %c0_12 = arith.constant 0 : index
    %19 = vector.load %arg4[%c0_10, %c0_11, %c0_12] : memref<20x128x16xf32, #tpu.memory_space<vmem>>, vector<20x128x16xf32>
    tpu.vector_store %arg4[%c0_10, %c0_11, %c0_12], %18 {strides = array<i32>} : memref<20x128x16xf32, #tpu.memory_space<vmem>>, vector<20x128x16xf32>,
    return
  }
  func.func @transform_0(%arg0: i32) -> (i32, i32, i32) {
    %c0_i32 = arith.constant 0 : i32
    %c0_i32_0 = arith.constant 0 : i32
    %c0_i32_1 = arith.constant 0 : i32
    return %arg0, %c0_i32, %c0_i32_0 : i32, i32, i32
  }
  func.func @transform_1(%arg0: i32) -> (i32, i32) {
    %c0_i32 = arith.constant 0 : i32
    %c0_i32_0 = arith.constant 0 : i32
    %c0_i32_1 = arith.constant 0 : i32
    return %c0_i32, %c0_i32_0 : i32, i32
  }
  func.func @transform_2(%arg0: i32) -> (i32, i32) {
    %c0_i32 = arith.constant 0 : i32
    %c0_i32_0 = arith.constant 0 : i32
    %c0_i32_1 = arith.constant 0 : i32
    return %c0_i32, %c0_i32_0 : i32, i32
  }
  func.func @transform_3(%arg0: i32) -> (i32, i32, i32) {
    %c0_i32 = arith.constant 0 : i32
    %c0_i32_0 = arith.constant 0 : i32
    %c0_i32_1 = arith.constant 0 : i32
    return %arg0, %c0_i32, %c0_i32_0 : i32, i32, i32
  }
  func.func @transform_4(%arg0: i32) -> (i32, i32) {
    %c0_i32 = arith.constant 0 : i32
    %c0_i32_0 = arith.constant 0 : i32
    return %arg0, %c0_i32 : i32, i32
  }
}

</mosaic_0001>

<bundles_post_ra>
// kernel: tpu_custom_call.1
= control target key start
LH: loop header
LB: loop body
LE: loop exit
PB: predicated region body
PF: predicated region fallthrough
CT: control target
= control target key end

     0   :  { %s3412_s15 = smov 0   ;;  %s5242_s0 = inlined_call_operand.vmem [shape: f32[40,128,16], index: 0, kind: input, shape index: {}]   ;;  %s5243_s1 = inlined_call_operand.vmem [shape: bf16[128,136], index: 1, kind: input, shape index: {}]   ;;  %s5244_s2 = inlined_call_operand.vmem [shape: f32[1,136], index: 2, kind: input, shape index: {}]   ;;  %s5245_s3 = inlined_call_operand.vmem [shape: f32[40,128,16], index: 3, kind: output, shape index: {0}]   ;;  %s5246_s4 = inlined_call_operand.vmem [shape: f32[640,10], index: 4, kind: output, shape index: {1}]  }
   0x1 LB: > { %s2878_s16 = sadd.s32 4294967295, %s3384_s15   ;;  %p2882_p0 = scmp.ge.s32.totalorder %s3384_s15, 1  ;;  %s3384_s15 = sphi %s3412_s15, %s15_s15  }
   0x2   : > { %p167_p1 = scmp.lt.s32.totalorder %s3384_s15, 3 }
   0x4   : > { %p168_p2 = pnand %p2882_p0, %p167_p1 }
   0x6   : > { %171 = sbr.rel (%p168_p2) target bundleno = 1556 (0x614), region = 32 }
   0xd   : > { %s200_s17 = smul.u32 20, %s2878_s16  ;;  %vm1702_vm0 = vcmask 64512   ;;  %vm1743_vm1 = vcmask 72704   ;;  %vm1784_vm2 = vcmask 80896   ;;  %vm2465_vm3 = vcmask 130048  }
   0xf   : > { %p201_p3 = scmp.lt.s32.totalorder %s200_s17, 39 }
  0x11   : > { %s5359_s17 = smov (!%p201_p3, %s200_s17), 39 }
  0x12   : > { %s2906_s18 = sshll.u32 %s5359_s17, 7 }
  0x13   : > { %s3430_s21 = scalar_lea.vmem %s5242_s0, %s2906_s18  ;;  %s4567_s14 = scalar_lea.vmem %s5245_s3, %s2906_s18 }
  0x14   : > { %v253_v0 = vld [vmem:[%s3430_s21 + $0x100] sm:$0xff]  ;;  %v254_v5 = vld [vmem:[%s3430_s21 + $0x108] sm:$0xff]  ;;  %v255_v12 = vld [vmem:[%s3430_s21 + $0x110] sm:$0xff] }
  0x15   : > { %v269_v1 = vld [vmem:[%s3430_s21 + $0x180] sm:$0xff]  ;;  %v270_v6 = vld [vmem:[%s3430_s21 + $0x188] sm:$0xff]  ;;  %v271_v13 = vld [vmem:[%s3430_s21 + $0x190] sm:$0xff] }
  0x16   : > { %v221_v2 = vld [vmem:[%s3430_s21] sm:$0xff]  ;;  %v2976_v3 = vpack.i.bf16 %v269_v1, %v253_v0  ;;  %v222_v8 = vld [vmem:[%s3430_s21 + $0x8] sm:$0xff]  ;;  %v2978_v10 = vpack.i.bf16 %v270_v6, %v254_v5  ;;  %v223_v14 = vld [vmem:[%s3430_s21 + $0x10] sm:$0xff]  ;;  %v2980_v16 = vpack.i.bf16 %v271_v13, %v255_v12 }
  0x17   : > { %v237_v4 = vld [vmem:[%s3430_s21 + $0x80] sm:$0xff]  ;;  %v238_v9 = vld [vmem:[%s3430_s21 + $0x88] sm:$0xff]  ;;  %v239_v15 = vld [vmem:[%s3430_s21 + $0x90] sm:$0xff] }
  0x18   : > { %v2934_v7 = vpack.i.bf16 %v237_v4, %v221_v2  ;;  %2977 = vxpose.xlu1.b32.start [1/16] (narrow) %v2976_v3, 16  ;;  %v2936_v11 = vpack.i.bf16 %v238_v9, %v222_v8  ;;  %v2938_v17 = vpack.i.bf16 %v239_v15, %v223_v14  ;;  %v256_v18 = vld [vmem:[%s3430_s21 + $0x118] sm:$0xff]  ;;  %v257_v24 = vld [vmem:[%s3430_s21 + $0x120] sm:$0xff]  ;;  %v258_v30 = vld [vmem:[%s3430_s21 + $0x128] sm:$0xff] }
  0x19   : > { %v272_v19 = vld [vmem:[%s3430_s21 + $0x198] sm:$0xff]  ;;  %v273_v25 = vld [vmem:[%s3430_s21 + $0x1a0] sm:$0xff]  ;;  %v274_v31 = vld [vmem:[%s3430_s21 + $0x1a8] sm:$0xff] }
  0x1a   : > { %2935 = vxpose.xlu0.b32.start [1/16] (narrow) %v2934_v7, 16  ;;  %v224_v20 = vld [vmem:[%s3430_s21 + $0x18] sm:$0xff]  ;;  %v2982_v22 = vpack.i.bf16 %v272_v19, %v256_v18  ;;  %v225_v26 = vld [vmem:[%s3430_s21 + $0x20] sm:$0xff]  ;;  %v2984_v28 = vpack.i.bf16 %v273_v25, %v257_v24  ;;  %v226_v32 = vld [vmem:[%s3430_s21 + $0x28] sm:$0xff]  ;;  %v2986_v34 = vpack.i.bf16 %v274_v31, %v258_v30 }
  0x1b   : > { %v240_v21 = vld [vmem:[%s3430_s21 + $0x98] sm:$0xff]  ;;  %v241_v27 = vld [vmem:[%s3430_s21 + $0xa0] sm:$0xff]  ;;  %v242_v33 = vld [vmem:[%s3430_s21 + $0xa8] sm:$0xff] }
  0x1c   : > { %2979 = vxpose.xlu1.b32.cont [2/16] (narrow) %v2978_v10, 16  ;;  %v2940_v23 = vpack.i.bf16 %v240_v21, %v224_v20  ;;  %v2942_v29 = vpack.i.bf16 %v241_v27, %v225_v26  ;;  %v2944_v35 = vpack.i.bf16 %v242_v33, %v226_v32  ;;  %v259_v36 = vld [vmem:[%s3430_s21 + $0x130] sm:$0xff]  ;;  %v260_v42 = vld [vmem:[%s3430_s21 + $0x138] sm:$0xff]  ;;  %v261_v48 = vld [vmem:[%s3430_s21 + $0x140] sm:$0xff] }
  0x1d   : > { %v275_v37 = vld [vmem:[%s3430_s21 + $0x1b0] sm:$0xff]  ;;  %v276_v43 = vld [vmem:[%s3430_s21 + $0x1b8] sm:$0xff]  ;;  %v277_v49 = vld [vmem:[%s3430_s21 + $0x1c0] sm:$0xff] }
  0x1e   : > { %2937 = vxpose.xlu0.b32.cont [2/16] (narrow) %v2936_v11, 16  ;;  %v227_v38 = vld [vmem:[%s3430_s21 + $0x30] sm:$0xff]  ;;  %v2988_v40 = vpack.i.bf16 %v275_v37, %v259_v36  ;;  %v228_v44 = vld [vmem:[%s3430_s21 + $0x38] sm:$0xff]  ;;  %v2990_v46 = vpack.i.bf16 %v276_v43, %v260_v42  ;;  %v229_v50 = vld [vmem:[%s3430_s21 + $0x40] sm:$0xff]  ;;  %v2992_v52 = vpack.i.bf16 %v277_v49, %v261_v48  ;;  %v3386_v43 = vmov 0  }
  0x1f   : > { %v243_v39 = vld [vmem:[%s3430_s21 + $0xb0] sm:$0xff]  ;;  %v244_v45 = vld [vmem:[%s3430_s21 + $0xb8] sm:$0xff]  ;;  %v245_v51 = vld [vmem:[%s3430_s21 + $0xc0] sm:$0xff]  ;;  %1341 = vmatprep.mubr.bf16.mxu0 %v3386_v43  ;;  %1441 = vmatprep.mubr.bf16.mxu1 %v3386_v43 }
  0x20   : > { %2981 = vxpose.xlu1.b32.cont [3/16] (narrow) %v2980_v16, 16  ;;  %v2946_v41 = vpack.i.bf16 %v243_v39, %v227_v38  ;;  %v2948_v47 = vpack.i.bf16 %v244_v45, %v228_v44  ;;  %v2950_v53 = vpack.i.bf16 %v245_v51, %v229_v50  ;;  %v262_v54 = vld [vmem:[%s3430_s21 + $0x148] sm:$0xff]  ;;  %v263_v60 = vld [vmem:[%s3430_s21 + $0x150] sm:$0xff]  ;;  %v264_v2 = vld [vmem:[%s3430_s21 + $0x158] sm:$0xff] }
  0x21   : > { %v278_v55 = vld [vmem:[%s3430_s21 + $0x1c8] sm:$0xff]  ;;  %v279_v61 = vld [vmem:[%s3430_s21 + $0x1d0] sm:$0xff]  ;;  %v280_v3 = vld [vmem:[%s3430_s21 + $0x1d8] sm:$0xff] }
  0x22   : > { %2939 = vxpose.xlu0.b32.cont [3/16] (narrow) %v2938_v17, 16  ;;  %v230_v56 = vld [vmem:[%s3430_s21 + $0x48] sm:$0xff]  ;;  %v2994_v58 = vpack.i.bf16 %v278_v55, %v262_v54  ;;  %v231_v62 = vld [vmem:[%s3430_s21 + $0x50] sm:$0xff]  ;;  %v2996_v0 = vpack.i.bf16 %v279_v61, %v263_v60  ;;  %v232_v4 = vld [vmem:[%s3430_s21 + $0x58] sm:$0xff]  ;;  %v2998_v6 = vpack.i.bf16 %v280_v3, %v264_v2 }
  0x23   : > { %v246_v57 = vld [vmem:[%s3430_s21 + $0xc8] sm:$0xff]  ;;  %v247_v63 = vld [vmem:[%s3430_s21 + $0xd0] sm:$0xff]  ;;  %v248_v5 = vld [vmem:[%s3430_s21 + $0xd8] sm:$0xff] }
  0x24   : > { %2983 = vxpose.xlu1.b32.cont [4/16] (narrow) %v2982_v22, 16  ;;  %v2952_v59 = vpack.i.bf16 %v246_v57, %v230_v56  ;;  %v2954_v1 = vpack.i.bf16 %v247_v63, %v231_v62  ;;  %v2956_v7 = vpack.i.bf16 %v248_v5, %v232_v4  ;;  %v265_v8 = vld [vmem:[%s3430_s21 + $0x160] sm:$0xff]  ;;  %v266_v14 = vld [vmem:[%s3430_s21 + $0x168] sm:$0xff]  ;;  %v267_v20 = vld [vmem:[%s3430_s21 + $0x170] sm:$0xff] }
  0x25   : > { %v281_v9 = vld [vmem:[%s3430_s21 + $0x1e0] sm:$0xff]  ;;  %v282_v15 = vld [vmem:[%s3430_s21 + $0x1e8] sm:$0xff]  ;;  %v283_v21 = vld [vmem:[%s3430_s21 + $0x1f0] sm:$0xff] }
  0x26   : > { %2941 = vxpose.xlu0.b32.cont [4/16] (narrow) %v2940_v23, 16  ;;  %v233_v10 = vld [vmem:[%s3430_s21 + $0x60] sm:$0xff]  ;;  %v3000_v12 = vpack.i.bf16 %v281_v9, %v265_v8  ;;  %v234_v16 = vld [vmem:[%s3430_s21 + $0x68] sm:$0xff]  ;;  %v3002_v18 = vpack.i.bf16 %v282_v15, %v266_v14  ;;  %v235_v22 = vld [vmem:[%s3430_s21 + $0x70] sm:$0xff]  ;;  %v3004_v26 = vpack.i.bf16 %v283_v21, %v267_v20 }
  0x27   : > { %v249_v11 = vld [vmem:[%s3430_s21 + $0xe0] sm:$0xff]  ;;  %v250_v17 = vld [vmem:[%s3430_s21 + $0xe8] sm:$0xff]  ;;  %v251_v23 = vld [vmem:[%s3430_s21 + $0xf0] sm:$0xff] }
  0x28   : > { %2985 = vxpose.xlu1.b32.cont [5/16] (narrow) %v2984_v28, 16  ;;  %v2958_v13 = vpack.i.bf16 %v249_v11, %v233_v10  ;;  %v2960_v19 = vpack.i.bf16 %v250_v17, %v234_v16  ;;  %v3354_v24 = vld [vmem:[%s5243_s1 + $0x4] ss:$8 sps:$4 sm:$0xff]   ;;  %v3356_v25 = vld [vmem:[%s5243_s1] ss:$8 sps:$4 sm:$0xff]   ;;  %v2962_v28 = vpack.i.bf16 %v251_v23, %v235_v22  ;;  %v284_v30 = vld [vmem:[%s3430_s21 + $0x1f8] sm:$0xff] }
  0x29   : > { %1309 = vmatprep.subr.bf16.mxu0 %v3354_v24  ;;  %v3357_v27 = vld [vmem:[%s5243_s1 + $0x14] ss:$8 sps:$4 sm:$0xff]   ;;  %v3359_v31 = vld [vmem:[%s5243_s1 + $0x10] ss:$8 sps:$4 sm:$0xff]   ;;  %2908 = vmatprep.subr.bf16.mxu1 %v3354_v24  ;;  %v317_v37 = vld [vmem:[%s3430_s21 + $0x300] sm:$0xff] }
  0x2a   : > { %2943 = vxpose.xlu0.b32.cont [5/16] (narrow) %v2942_v29, 16  ;;  %v268_v29 = vld [vmem:[%s3430_s21 + $0x178] sm:$0xff]  ;;  %1310 = vmatpush1.bf16.msra.mxu0 %v3356_v25  ;;  %v333_v38 = vld [vmem:[%s3430_s21 + $0x380] sm:$0xff]  ;;  %v286_v49 = vld [vmem:[%s3430_s21 + $0x208] sm:$0xff] }
  0x2b   : > { %v236_v32 = vld [vmem:[%s3430_s21 + $0x78] sm:$0xff]  ;;  %1311 = vmatprep.subr.bf16.mxu0 %v3357_v27  ;;  %2916 = vmatpush1.bf16.msra.mxu1 %v3356_v25  ;;  %v3362_v39 = vld [vmem:[%s5243_s1 + $0x20] ss:$8 sps:$4 sm:$0xff]   ;;  %v3060_v44 = vpack.i.bf16 %v333_v38, %v317_v37  ;;  %v3366_v51 = vld [vmem:[%s5243_s1 + $0x44] ss:$8 sps:$4 sm:$0xff]  }
  0x2c   : > { %2987 = vxpose.xlu1.b32.cont [6/16] (narrow) %v2986_v34, 16  ;;  %v252_v33 = vld [vmem:[%s3430_s21 + $0xf8] sm:$0xff]  ;;  %v3360_v34 = vld [vmem:[%s5243_s1 + $0x24] ss:$8 sps:$4 sm:$0xff]   ;;  %2909 = vmatprep.subr.bf16.mxu1 %v3357_v27  ;;  %v319_v54 = vld [vmem:[%s3430_s21 + $0x310] sm:$0xff] }
  0x2d   : > { %v2964_v36 = vpack.i.bf16 %v252_v33, %v236_v32  ;;  %v3363_v42 = vld [vmem:[%s5243_s1 + $0x34] ss:$8 sps:$4 sm:$0xff]   ;;  %v3365_v48 = vld [vmem:[%s5243_s1 + $0x30] ss:$8 sps:$4 sm:$0xff]   ;;  %v302_v50 = vld [vmem:[%s3430_s21 + $0x288] sm:$0xff] }
  0x2e   : > { %2945 = vxpose.xlu0.b32.cont [6/16] (narrow) %v2944_v35, 16  ;;  %v3006_v35 = vpack.i.bf16 %v284_v30, %v268_v29  ;;  %1312 = vmatpush1.bf16.msra.mxu0 %v3359_v31  ;;  %v335_v55 = vld [vmem:[%s3430_s21 + $0x390] sm:$0xff]  ;;  %v3368_v56 = vld [vmem:[%s5243_s1 + $0x40] ss:$8 sps:$4 sm:$0xff]   ;;  %v320_v62 = vld [vmem:[%s3430_s21 + $0x318] sm:$0xff] }
  0x2f   : > { %1313 = vmatprep.subr.bf16.mxu0 %v3360_v34  ;;  %2917 = vmatpush1.bf16.msra.mxu1 %v3359_v31  ;;  %v287_v57 = vld [vmem:[%s3430_s21 + $0x210] sm:$0xff]  ;;  %v3064_v60 = vpack.i.bf16 %v335_v55, %v319_v54  ;;  %v336_v63 = vld [vmem:[%s3430_s21 + $0x398] sm:$0xff]  ;;  %v3372_v3 = vld [vmem:[%s5243_s1 + $0x64] ss:$8 sps:$4 sm:$0xff]  }
  0x30   : > { %2989 = vxpose.xlu1.b32.cont [7/16] (narrow) %v2988_v40, 16  ;;  %v285_v40 = vld [vmem:[%s3430_s21 + $0x200] sm:$0xff]  ;;  %2910 = vmatprep.subr.bf16.mxu1 %v3360_v34  ;;  %v304_v2 = vld [vmem:[%s3430_s21 + $0x298] sm:$0xff]  ;;  %v3066_v4 = vpack.i.bf16 %v336_v63, %v320_v62  ;;  %v322_v14 = vld [vmem:[%s3430_s21 + $0x328] sm:$0xff] }
  0x31   : > { %v3374_v8 = vld [vmem:[%s5243_s1 + $0x60] ss:$8 sps:$4 sm:$0xff]   ;;  %v3375_v11 = vld [vmem:[%s5243_s1 + $0x74] ss:$8 sps:$4 sm:$0xff]   ;;  %v3377_v16 = vld [vmem:[%s5243_s1 + $0x70] ss:$8 sps:$4 sm:$0xff]  }
  0x32   : > { %2947 = vxpose.xlu0.b32.cont [7/16] (narrow) %v2946_v41, 16  ;;  %v301_v41 = vld [vmem:[%s3430_s21 + $0x280] sm:$0xff]  ;;  %1314 = vmatpush1.bf16.msra.mxu0 %v3362_v39  ;;  %v338_v15 = vld [vmem:[%s3430_s21 + $0x3a8] sm:$0xff]  ;;  %v323_v21 = vld [vmem:[%s3430_s21 + $0x330] sm:$0xff] }
  0x33   : > { %v3018_v45 = vpack.i.bf16 %v301_v41, %v285_v40  ;;  %1315 = vmatprep.subr.bf16.mxu0 %v3363_v42  ;;  %2918 = vmatpush1.bf16.msra.mxu1 %v3362_v39  ;;  %v289_v9 = vld [vmem:[%s3430_s21 + $0x220] sm:$0xff]  ;;  %v290_v17 = vld [vmem:[%s3430_s21 + $0x228] sm:$0xff]  ;;  %v339_v22 = vld [vmem:[%s3430_s21 + $0x3b0] sm:$0xff] }
  0x34   : > { %2991 = vxpose.xlu1.b32.cont [8/16] (narrow) %v2990_v46, 16  ;;  %v318_v46 = vld [vmem:[%s3430_s21 + $0x308] sm:$0xff]  ;;  %2911 = vmatprep.subr.bf16.mxu1 %v3363_v42  ;;  %v305_v10 = vld [vmem:[%s3430_s21 + $0x2a0] sm:$0xff]  ;;  %v291_v23 = vld [vmem:[%s3430_s21 + $0x230] sm:$0xff]  ;;  %v3072_v25 = vpack.i.bf16 %v339_v22, %v323_v21 }
  0x35   : > { %v307_v24 = vld [vmem:[%s3430_s21 + $0x2b0] sm:$0xff]  ;;  %v324_v27 = vld [vmem:[%s3430_s21 + $0x338] sm:$0xff]  ;;  %v325_v33 = vld [vmem:[%s3430_s21 + $0x340] sm:$0xff] }
  0x36   : > { %2949 = vxpose.xlu0.b32.cont [8/16] (narrow) %v2948_v47, 16  ;;  %v334_v47 = vld [vmem:[%s3430_s21 + $0x388] sm:$0xff]  ;;  %1316 = vmatpush1.bf16.msra.mxu0 %v3365_v48  ;;  %v292_v29 = vld [vmem:[%s3430_s21 + $0x238] sm:$0xff]  ;;  %v341_v34 = vld [vmem:[%s3430_s21 + $0x3c0] sm:$0xff] }
  0x37   : > { %1317 = vmatprep.subr.bf16.mxu0 %v3366_v51  ;;  %2919 = vmatpush1.bf16.msra.mxu1 %v3365_v48  ;;  %v308_v30 = vld [vmem:[%s3430_s21 + $0x2b8] sm:$0xff]  ;;  %v3076_v37 = vpack.i.bf16 %v341_v34, %v325_v33  ;;  %v326_v39 = vld [vmem:[%s3430_s21 + $0x348] sm:$0xff]  ;;  %v295_v48 = vld [vmem:[%s3430_s21 + $0x250] sm:$0xff] }
  0x38   : > { %2993 = vxpose.xlu1.b32.cont [9/16] (narrow) %v2992_v52, 16  ;;  %v3062_v52 = vpack.i.bf16 %v334_v47, %v318_v46  ;;  %2912 = vmatprep.subr.bf16.mxu1 %v3366_v51  ;;  %v3032_v32 = vpack.i.bf16 %v308_v30, %v292_v29  ;;  %v342_v40 = vld [vmem:[%s3430_s21 + $0x3c8] sm:$0xff]  ;;  %v327_v46 = vld [vmem:[%s3430_s21 + $0x350] sm:$0xff]  ;;  %v296_v54 = vld [vmem:[%s3430_s21 + $0x258] sm:$0xff] }
  0x39   : > { %v294_v41 = vld [vmem:[%s3430_s21 + $0x248] sm:$0xff]  ;;  %v343_v47 = vld [vmem:[%s3430_s21 + $0x3d0] sm:$0xff]  ;;  %v312_v55 = vld [vmem:[%s3430_s21 + $0x2d8] sm:$0xff] }
  0x3a   : > { %2951 = vxpose.xlu0.b32.cont [9/16] (narrow) %v2950_v53, 16  ;;  %v3020_v53 = vpack.i.bf16 %v302_v50, %v286_v49  ;;  %1318 = vmatpush1.bf16.msra.mxu0 %v3368_v56  ;;  %v310_v42 = vld [vmem:[%s3430_s21 + $0x2c8] sm:$0xff]  ;;  %v311_v49 = vld [vmem:[%s3430_s21 + $0x2d0] sm:$0xff]  ;;  %v3080_v50 = vpack.i.bf16 %v343_v47, %v327_v46  ;;  %v365_v21 = vld [vmem:[%s3430_s21 + $0x480] sm:$0xff] }
  0x3b   : > { %2920 = vmatpush1.bf16.msra.mxu1 %v3368_v56  ;;  %v3038_v51 = vpack.i.bf16 %v311_v49, %v295_v48  ;;  %v351_v34 = vld [vmem:[%s3430_s21 + $0x410] sm:$0xff] }
  0x3c   : > { %2995 = vxpose.xlu1.b32.cont [10/16] (narrow) %v2994_v58, 16  ;;  %v303_v58 = vld [vmem:[%s3430_s21 + $0x290] sm:$0xff] }
  0x3d   : > { %v3022_v61 = vpack.i.bf16 %v303_v58, %v287_v57  ;;  %v3040_v57 = vpack.i.bf16 %v312_v55, %v296_v54  ;;  %v329_v58 = vld [vmem:[%s3430_s21 + $0x360] sm:$0xff] }
  0x3e   : > { %2953 = vxpose.xlu0.b32.cont [10/16] (narrow) %v2952_v59, 16  ;;  %v3369_v59 = vld [vmem:[%s5243_s1 + $0x54] ss:$8 sps:$4 sm:$0xff]  }
  0x3f   : > { %1319 = vmatprep.subr.bf16.mxu0 %v3369_v59  ;;  %2913 = vmatprep.subr.bf16.mxu1 %v3369_v59  ;;  %v345_v59 = vld [vmem:[%s3430_s21 + $0x3e0] sm:$0xff] }
  0x40   : > { %2997 = vxpose.xlu1.b32.cont [11/16] (narrow) %v2996_v0, 16  ;;  %v3371_v0 = vld [vmem:[%s5243_s1 + $0x50] ss:$8 sps:$4 sm:$0xff]   ;;  %v3084_v62 = vpack.i.bf16 %v345_v59, %v329_v58  ;;  %v386_v58 = vld [vmem:[%s3430_s21 + $0x528] sm:$0xff] }
  0x41   : > { %1320 = vmatpush1.bf16.msra.mxu0 %v3371_v0  ;;  %2921 = vmatpush1.bf16.msra.mxu1 %v3371_v0  ;;  %v330_v0 = vld [vmem:[%s3430_s21 + $0x368] sm:$0xff] }
  0x42   : > { %2955 = vxpose.xlu0.b32.cont [11/16] (narrow) %v2954_v1, 16  ;;  %v288_v1 = vld [vmem:[%s3430_s21 + $0x218] sm:$0xff]  ;;  %1321 = vmatprep.subr.bf16.mxu0 %v3372_v3  ;;  %v402_v59 = vld [vmem:[%s3430_s21 + $0x5a8] sm:$0xff] }
  0x43   : > { %v3024_v5 = vpack.i.bf16 %v304_v2, %v288_v1  ;;  %2914 = vmatprep.subr.bf16.mxu1 %v3372_v3  ;;  %v346_v1 = vld [vmem:[%s3430_s21 + $0x3e8] sm:$0xff] }
  0x44   : > { %2999 = vxpose.xlu1.b32.cont [12/16] (narrow) %v2998_v6, 16  ;;  %v321_v6 = vld [vmem:[%s3430_s21 + $0x320] sm:$0xff]  ;;  %v298_v2 = vld [vmem:[%s3430_s21 + $0x268] sm:$0xff] }
  0x45   : > { %1322 = vmatpush1.bf16.msra.mxu0 %v3374_v8  ;;  %2922 = vmatpush1.bf16.msra.mxu1 %v3374_v8  ;;  %v314_v3 = vld [vmem:[%s3430_s21 + $0x2e8] sm:$0xff]  ;;  %v299_v8 = vld [vmem:[%s3430_s21 + $0x270] sm:$0xff] }
  0x46   : > { %2957 = vxpose.xlu0.b32.cont [12/16] (narrow) %v2956_v7, 16  ;;  %v337_v7 = vld [vmem:[%s3430_s21 + $0x3a0] sm:$0xff]  ;;  %1323 = vmatprep.subr.bf16.mxu0 %v3375_v11 }
  0x47   : > { %2915 = vmatprep.subr.bf16.mxu1 %v3375_v11 }
  0x48   : > { %3001 = vxpose.xlu1.b32.cont [13/16] (narrow) %v3000_v12, 16  ;;  %v3068_v12 = vpack.i.bf16 %v337_v7, %v321_v6  ;;  %v331_v6 = vld [vmem:[%s3430_s21 + $0x370] sm:$0xff] }
  0x49   : > { %1324 = vmatpush1.bf16.msra.mxu0 %v3377_v16  ;;  %2923 = vmatpush1.bf16.msra.mxu1 %v3377_v16  ;;  %v347_v7 = vld [vmem:[%s3430_s21 + $0x3f0] sm:$0xff] }
  0x4a   : > { %2959 = vxpose.xlu0.b32.cont [13/16] (narrow) %v2958_v13, 16  ;;  %v3026_v13 = vpack.i.bf16 %v305_v10, %v289_v9  ;;  %v315_v9 = vld [vmem:[%s3430_s21 + $0x2f0] sm:$0xff]  ;;  %v3088_v10 = vpack.i.bf16 %v347_v7, %v331_v6 }
  0x4b   : > { %v3046_v11 = vpack.i.bf16 %v315_v9, %v299_v8  ;;  %v388_v9 = vld [vmem:[%s3430_s21 + $0x538] sm:$0xff] }
  0x4c   : > { %3003 = vxpose.xlu1.b32.cont [14/16] (narrow) %v3002_v18, 16  ;;  %v306_v18 = vld [vmem:[%s3430_s21 + $0x2a8] sm:$0xff] }
  0x4d   : > { %v3028_v20 = vpack.i.bf16 %v306_v18, %v290_v17  ;;  %v381_v18 = vld [vmem:[%s3430_s21 + $0x500] sm:$0xff] }
  0x4e   : > { %2961 = vxpose.xlu0.b32.cont [14/16] (narrow) %v2960_v19, 16  ;;  %v3070_v19 = vpack.i.bf16 %v338_v15, %v322_v14  ;;  %v300_v14 = vld [vmem:[%s3430_s21 + $0x278] sm:$0xff] }
  0x4f   : > { %v316_v15 = vld [vmem:[%s3430_s21 + $0x2f8] sm:$0xff] }
  0x50   : > { %3005 = vxpose.xlu1.b32.cont [15/16] (narrow) %v3004_v26, 16  ;;  %v3030_v26 = vpack.i.bf16 %v307_v24, %v291_v23  ;;  %v3048_v17 = vpack.i.bf16 %v316_v15, %v300_v14  ;;  %v382_v24 = vld [vmem:[%s3430_s21 + $0x508] sm:$0xff] }
  0x52   : > { %2963 = vxpose.xlu0.b32.cont [15/16] (narrow) %v2962_v28, 16  ;;  %v340_v28 = vld [vmem:[%s3430_s21 + $0x3b8] sm:$0xff] }
  0x53   : > { %v3074_v31 = vpack.i.bf16 %v340_v28, %v324_v27  ;;  %v366_v27 = vld [vmem:[%s3430_s21 + $0x488] sm:$0xff] }
  0x54   : > { %3007 = vxpose.xlu1.b32.end [16/16] (narrow) %v3006_v35, 16  ;;  %v293_v35 = vld [vmem:[%s3430_s21 + $0x240] sm:$0xff] }
  0x56   : > { %2965 = vxpose.xlu0.b32.end [16/16] (narrow) %v2964_v36, 16  ;;  %v309_v36 = vld [vmem:[%s3430_s21 + $0x2c0] sm:$0xff] }
  0x57   : > { %v3034_v38 = vpack.i.bf16 %v309_v36, %v293_v35  ;;  %v367_v35 = vld [vmem:[%s3430_s21 + $0x490] sm:$0xff] }
  0x58   : > { %3061 = vxpose.xlu1.b32.start [1/16] (narrow) %v3060_v44, 16  ;;  %v3078_v44 = vpack.i.bf16 %v342_v40, %v326_v39  ;;  %v3106_v39 = vpack.i.bf16 %v367_v35, %v351_v34  ;;  %v384_v40 = vld [vmem:[%s3430_s21 + $0x518] sm:$0xff] }
  0x5a   : > { %3019 = vxpose.xlu0.b32.start [1/16] (narrow) %v3018_v45, 16  ;;  %v3036_v45 = vpack.i.bf16 %v310_v42, %v294_v41  ;;  %v400_v41 = vld [vmem:[%s3430_s21 + $0x598] sm:$0xff] }
  0x5b   : > { %v3150_v47 = vpack.i.bf16 %v400_v41, %v384_v40  ;;  %v360_v41 = vld [vmem:[%s3430_s21 + $0x458] sm:$0xff] }
  0x5c   : > { %3063 = vxpose.xlu1.b32.cont [2/16] (narrow) %v3062_v52, 16  ;;  %v328_v52 = vld [vmem:[%s3430_s21 + $0x358] sm:$0xff] }
  0x5e   : > { %3021 = vxpose.xlu0.b32.cont [2/16] (narrow) %v3020_v53, 16  ;;  %v344_v53 = vld [vmem:[%s3430_s21 + $0x3d8] sm:$0xff] }
  0x5f   : > { %v3082_v56 = vpack.i.bf16 %v344_v53, %v328_v52  ;;  %v353_v52 = vld [vmem:[%s3430_s21 + $0x420] sm:$0xff] }
  0x60   : > { %3065 = vxpose.xlu1.b32.cont [3/16] (narrow) %v3064_v60, 16  ;;  %v297_v60 = vld [vmem:[%s3430_s21 + $0x260] sm:$0xff] }
  0x61   : > { %v369_v53 = vld [vmem:[%s3430_s21 + $0x4a0] sm:$0xff] }
  0x62   : > { %3023 = vxpose.xlu0.b32.cont [3/16] (narrow) %v3022_v61, 16  ;;  %v313_v61 = vld [vmem:[%s3430_s21 + $0x2e0] sm:$0xff] }
  0x63   : > { %v3042_v63 = vpack.i.bf16 %v313_v61, %v297_v60  ;;  %v354_v60 = vld [vmem:[%s3430_s21 + $0x428] sm:$0xff] }
  0x64   : > { %3067 = vxpose.xlu1.b32.cont [4/16] (narrow) %v3066_v4, 16  ;;  %v3086_v4 = vpack.i.bf16 %v346_v1, %v330_v0  ;;  %v370_v61 = vld [vmem:[%s3430_s21 + $0x4a8] sm:$0xff]  ;;  %v387_v1 = vld [vmem:[%s3430_s21 + $0x530] sm:$0xff] }
  0x65   : > { %v3112_v0 = vpack.i.bf16 %v370_v61, %v354_v60 }
  0x66   : > { %3025 = vxpose.xlu0.b32.cont [4/16] (narrow) %v3024_v5, 16  ;;  %v3044_v5 = vpack.i.bf16 %v314_v3, %v298_v2  ;;  %v403_v2 = vld [vmem:[%s3430_s21 + $0x5b0] sm:$0xff] }
  0x67   : > { %v355_v3 = vld [vmem:[%s3430_s21 + $0x430] sm:$0xff]  ;;  %v3156_v7 = vpack.i.bf16 %v403_v2, %v387_v1  ;;  %v380_v1 = vld [vmem:[%s3430_s21 + $0x4f8] sm:$0xff] }
  0x68   : > { %3069 = vxpose.xlu1.b32.cont [5/16] (narrow) %v3068_v12, 16  ;;  %v332_v12 = vld [vmem:[%s3430_s21 + $0x378] sm:$0xff] }
  0x6a   : > { %3027 = vxpose.xlu0.b32.cont [5/16] (narrow) %v3026_v13, 16  ;;  %v348_v13 = vld [vmem:[%s3430_s21 + $0x3f8] sm:$0xff] }
  0x6b   : > { %v3090_v16 = vpack.i.bf16 %v348_v13, %v332_v12  ;;  %v372_v12 = vld [vmem:[%s3430_s21 + $0x4b8] sm:$0xff] }
  0x6c   : > { %3071 = vxpose.xlu1.b32.cont [6/16] (narrow) %v3070_v19, 16  ;;  %v397_v19 = vld [vmem:[%s3430_s21 + $0x580] sm:$0xff] }
  0x6d   : > { %v3144_v22 = vpack.i.bf16 %v397_v19, %v381_v18  ;;  %v357_v18 = vld [vmem:[%s3430_s21 + $0x440] sm:$0xff] }
  0x6e   : > { %3029 = vxpose.xlu0.b32.cont [6/16] (narrow) %v3028_v20, 16  ;;  %v349_v20 = vld [vmem:[%s3430_s21 + $0x400] sm:$0xff] }
  0x6f   : > { %v3102_v23 = vpack.i.bf16 %v365_v21, %v349_v20  ;;  %v373_v19 = vld [vmem:[%s3430_s21 + $0x4c0] sm:$0xff] }
  0x70   : > { %3073 = vxpose.xlu1.b32.cont [7/16] (narrow) %v3072_v25, 16  ;;  %v398_v25 = vld [vmem:[%s3430_s21 + $0x588] sm:$0xff]  ;;  %v3118_v21 = vpack.i.bf16 %v373_v19, %v357_v18  ;;  %v463_v18 = vld [vmem:[%s3430_s21 + $0x790] sm:$0xff] }
  0x71   : > { %v3146_v28 = vpack.i.bf16 %v398_v25, %v382_v24  ;;  %v358_v24 = vld [vmem:[%s3430_s21 + $0x448] sm:$0xff] }
  0x72   : > { %3031 = vxpose.xlu0.b32.cont [7/16] (narrow) %v3030_v26, 16  ;;  %v350_v26 = vld [vmem:[%s3430_s21 + $0x408] sm:$0xff] }
  0x73   : > { %v3104_v30 = vpack.i.bf16 %v366_v27, %v350_v26  ;;  %v374_v25 = vld [vmem:[%s3430_s21 + $0x4c8] sm:$0xff] }
  0x74   : > { %3075 = vxpose.xlu1.b32.cont [8/16] (narrow) %v3074_v31, 16  ;;  %v383_v31 = vld [vmem:[%s3430_s21 + $0x510] sm:$0xff]  ;;  %v3120_v27 = vpack.i.bf16 %v374_v25, %v358_v24 }
  0x76   : > { %3033 = vxpose.xlu0.b32.cont [8/16] (narrow) %v3032_v32, 16  ;;  %v399_v32 = vld [vmem:[%s3430_s21 + $0x590] sm:$0xff] }
  0x77   : > { %v3148_v36 = vpack.i.bf16 %v399_v32, %v383_v31  ;;  %v359_v31 = vld [vmem:[%s3430_s21 + $0x450] sm:$0xff] }
  0x78   : > { %3077 = vxpose.xlu1.b32.cont [9/16] (narrow) %v3076_v37, 16  ;;  %v375_v32 = vld [vmem:[%s3430_s21 + $0x4d0] sm:$0xff] }
  0x7a   : > { %3035 = vxpose.xlu0.b32.cont [9/16] (narrow) %v3034_v38, 16 }
  0x7c   : > { %3079 = vxpose.xlu1.b32.cont [10/16] (narrow) %v3078_v44, 16  ;;  %v352_v44 = vld [vmem:[%s3430_s21 + $0x418] sm:$0xff] }
  0x7e   : > { %3037 = vxpose.xlu0.b32.cont [10/16] (narrow) %v3036_v45, 16  ;;  %v368_v45 = vld [vmem:[%s3430_s21 + $0x498] sm:$0xff] }
  0x7f   : > { %v3108_v49 = vpack.i.bf16 %v368_v45, %v352_v44  ;;  %v393_v44 = vld [vmem:[%s3430_s21 + $0x560] sm:$0xff] }
  0x80   : > { %3081 = vxpose.xlu1.b32.cont [11/16] (narrow) %v3080_v50, 16  ;;  %v385_v50 = vld [vmem:[%s3430_s21 + $0x520] sm:$0xff] }
  0x81   : > { %v409_v45 = vld [vmem:[%s3430_s21 + $0x5e0] sm:$0xff] }
  0x82   : > { %3039 = vxpose.xlu0.b32.cont [11/16] (narrow) %v3038_v51, 16  ;;  %v401_v51 = vld [vmem:[%s3430_s21 + $0x5a0] sm:$0xff] }
  0x84   : > { %3083 = vxpose.xlu1.b32.cont [12/16] (narrow) %v3082_v56, 16  ;;  %v3152_v56 = vpack.i.bf16 %v401_v51, %v385_v50  ;;  %v394_v50 = vld [vmem:[%s3430_s21 + $0x568] sm:$0xff] }
  0x85   : > { %v410_v51 = vld [vmem:[%s3430_s21 + $0x5e8] sm:$0xff] }
  0x86   : > { %3041 = vxpose.xlu0.b32.cont [12/16] (narrow) %v3040_v57, 16  ;;  %v3110_v57 = vpack.i.bf16 %v369_v53, %v353_v52  ;;  %v362_v52 = vld [vmem:[%s3430_s21 + $0x468] sm:$0xff] }
  0x87   : > { %v378_v53 = vld [vmem:[%s3430_s21 + $0x4e8] sm:$0xff] }
  0x88   : > { %3085 = vxpose.xlu1.b32.cont [13/16] (narrow) %v3084_v62, 16 }
  0x8a   : > { %3043 = vxpose.xlu0.b32.cont [13/16] (narrow) %v3042_v63, 16  ;;  %v3154_v63 = vpack.i.bf16 %v402_v59, %v386_v58  ;;  %v363_v58 = vld [vmem:[%s3430_s21 + $0x470] sm:$0xff] }
  0x8b   : > { %v379_v59 = vld [vmem:[%s3430_s21 + $0x4f0] sm:$0xff] }
  0x8c   : > { %3087 = vxpose.xlu1.b32.cont [14/16] (narrow) %v3086_v4, 16  ;;  %v371_v4 = vld [vmem:[%s3430_s21 + $0x4b0] sm:$0xff]  ;;  %v3130_v61 = vpack.i.bf16 %v379_v59, %v363_v58  ;;  %v452_v59 = vld [vmem:[%s3430_s21 + $0x738] sm:$0xff] }
  0x8d   : > { %v3114_v8 = vpack.i.bf16 %v371_v4, %v355_v3  ;;  %v445_v4 = vld [vmem:[%s3430_s21 + $0x700] sm:$0xff] }
  0x8e   : > { %3045 = vxpose.xlu0.b32.cont [14/16] (narrow) %v3044_v5, 16 }
  0x90   : > { %3089 = vxpose.xlu1.b32.cont [15/16] (narrow) %v3088_v10, 16  ;;  %v404_v10 = vld [vmem:[%s3430_s21 + $0x5b8] sm:$0xff] }
  0x91   : > { %v3158_v14 = vpack.i.bf16 %v404_v10, %v388_v9  ;;  %v446_v10 = vld [vmem:[%s3430_s21 + $0x708] sm:$0xff] }
  0x92   : > { %3047 = vxpose.xlu0.b32.cont [15/16] (narrow) %v3046_v11, 16  ;;  %v356_v11 = vld [vmem:[%s3430_s21 + $0x438] sm:$0xff] }
  0x93   : > { %v3116_v15 = vpack.i.bf16 %v372_v12, %v356_v11  ;;  %v462_v11 = vld [vmem:[%s3430_s21 + $0x788] sm:$0xff] }
  0x94   : > { %3091 = vxpose.xlu1.b32.end [16/16] (narrow) %v3090_v16, 16  ;;  %v389_v16 = vld [vmem:[%s3430_s21 + $0x540] sm:$0xff]  ;;  %v414_v12 = vld [vmem:[%s3430_s21 + $0x608] sm:$0xff] }
  0x96   : > { %3049 = vxpose.xlu0.b32.end [16/16] (narrow) %v3048_v17, 16  ;;  %v405_v17 = vld [vmem:[%s3430_s21 + $0x5c0] sm:$0xff] }
  0x97   : > { %v3160_v20 = vpack.i.bf16 %v405_v17, %v389_v16  ;;  %v447_v17 = vld [vmem:[%s3430_s21 + $0x710] sm:$0xff] }
  0x98   : > { %3145 = vxpose.xlu1.b32.start [1/16] (narrow) %v3144_v22, 16  ;;  %v3618_v29 = vpop.trf.xlu1  ;;  %v390_v22 = vld [vmem:[%s3430_s21 + $0x548] sm:$0xff] }
  0x99   : > { %v3009_v6 = vunpack.i.l.bf16 %v3618_v29  ;;  %v3012_v34 = vunpack.i.h.bf16 %v3618_v29 }
  0x9a   : > { %3103 = vxpose.xlu0.b32.start [1/16] (narrow) %v3102_v23, 16  ;;  %v2966_v33 = vpop.trf.xlu0  ;;  %v406_v23 = vld [vmem:[%s3430_s21 + $0x5c8] sm:$0xff] }
  0x9b   : > { %v2967_v37 = vunpack.i.l.bf16 %v2966_v33  ;;  %v2970_v54 = vunpack.i.h.bf16 %v2966_v33  ;;  %v3162_v26 = vpack.i.bf16 %v406_v23, %v390_v22  ;;  %v3232_v22 = vpack.i.bf16 %v463_v18, %v447_v17  ;;  %v455_v17 = vld [vmem:[%s3430_s21 + $0x750] sm:$0xff] }
  0x9c   : > { %3147 = vxpose.xlu1.b32.cont [2/16] (narrow) %v3146_v28, 16  ;;  %v3624_v38 = vpop.trf.xlu1  ;;  %v391_v28 = vld [vmem:[%s3430_s21 + $0x550] sm:$0xff] }
  0x9d   : > { %v3014_v5 = vunpack.i.l.bf16 %v3624_v38  ;;  %v3017_v33 = vunpack.i.h.bf16 %v3624_v38  ;;  %v471_v18 = vld [vmem:[%s3430_s21 + $0x7d0] sm:$0xff] }
  0x9e   : > { %3105 = vxpose.xlu0.b32.cont [2/16] (narrow) %v3104_v30, 16  ;;  %v2971_v42 = vpop.trf.xlu0  ;;  %v407_v30 = vld [vmem:[%s3430_s21 + $0x5d0] sm:$0xff] }
  0x9f   : > { %v2972_v46 = vunpack.i.l.bf16 %v2971_v42  ;;  %v2975_v55 = vunpack.i.h.bf16 %v2971_v42  ;;  %v1183_v13 = vpack.c.bf16 %v3014_v5, %v3009_v6  ;;  %v3164_v35 = vpack.i.bf16 %v407_v30, %v391_v28  ;;  %v376_v42 = vld [vmem:[%s3430_s21 + $0x4d8] sm:$0xff]  ;;  %v461_v5 = vld [vmem:[%s3430_s21 + $0x780] sm:$0xff] }
  0xa0   : > { %3149 = vxpose.xlu1.b32.cont [3/16] (narrow) %v3148_v36, 16  ;;  %v3122_v36 = vpack.i.bf16 %v375_v32, %v359_v31  ;;  %v1184_v40 = vpack.c.bf16 %v3017_v33, %v3012_v34  ;;  %v3124_v38 = vpack.i.bf16 %v376_v42, %v360_v41  ;;  %v413_v6 = vld [vmem:[%s3430_s21 + $0x600] sm:$0xff]  ;;  %v416_v30 = vld [vmem:[%s3430_s21 + $0x618] sm:$0xff] }
  0xa1   : > { %v1181_v48 = vpack.c.bf16 %v2972_v46, %v2967_v37  ;;  %v1182_v62 = vpack.c.bf16 %v2975_v55, %v2970_v54  ;;  %v392_v37 = vld [vmem:[%s3430_s21 + $0x558] sm:$0xff]  ;;  %v361_v46 = vld [vmem:[%s3430_s21 + $0x460] sm:$0xff]  ;;  %v3170_v54 = vpack.i.bf16 %v410_v51, %v394_v50  ;;  %v3128_v55 = vpack.i.bf16 %v378_v53, %v362_v52  ;;  %v451_v51 = vld [vmem:[%s3430_s21 + $0x730] sm:$0xff] }
  0xa2   : > { %3107 = vxpose.xlu0.b32.cont [3/16] (narrow) %v3106_v39, 16  ;;  %v408_v39 = vld [vmem:[%s3430_s21 + $0x5d8] sm:$0xff]  ;;  %v467_v52 = vld [vmem:[%s3430_s21 + $0x7b0] sm:$0xff] }
  0xa3   : > { %1342 = vmatmul.mubr.bf16.vlgmr.msra.gmra.mrb[0].mxu0 %v1181_v48  ;;  %v3166_v29 = vpack.i.bf16 %v408_v39, %v392_v37  ;;  %v3168_v48 = vpack.i.bf16 %v409_v45, %v393_v44  ;;  %v432_v31 = vld [vmem:[%s3430_s21 + $0x698] sm:$0xff]  ;;  %v465_v37 = vld [vmem:[%s3430_s21 + $0x7a0] sm:$0xff]  ;;  %v450_v44 = vld [vmem:[%s3430_s21 + $0x728] sm:$0xff] }
  0xa4   : > { %1351 = vmatprep.mubr.bf16.mxu0 %v3386_v43  ;;  %3151 = vxpose.xlu1.b32.cont [4/16] (narrow) %v3150_v47, 16  ;;  %v377_v47 = vld [vmem:[%s3430_s21 + $0x4e0] sm:$0xff]  ;;  %v466_v45 = vld [vmem:[%s3430_s21 + $0x7a8] sm:$0xff]  ;;  %v419_v53 = vld [vmem:[%s3430_s21 + $0x630] sm:$0xff] }
  0xa5   : > { %v417_v39 = vld [vmem:[%s3430_s21 + $0x620] sm:$0xff] }
  0xa6   : > { %3109 = vxpose.xlu0.b32.cont [4/16] (narrow) %v3108_v49, 16  ;;  %v3126_v49 = vpack.i.bf16 %v377_v47, %v361_v46  ;;  %v418_v46 = vld [vmem:[%s3430_s21 + $0x628] sm:$0xff] }
  0xa7   : > { %v434_v47 = vld [vmem:[%s3430_s21 + $0x6a8] sm:$0xff] }
  0xa8   : > { %3153 = vxpose.xlu1.b32.cont [5/16] (narrow) %v3152_v56, 16  ;;  %v395_v56 = vld [vmem:[%s3430_s21 + $0x570] sm:$0xff]  ;;  %v3196_v50 = vpack.i.bf16 %v434_v47, %v418_v46 }
  0xaa   : > { %3111 = vxpose.xlu0.b32.cont [5/16] (narrow) %v3110_v57, 16  ;;  %v411_v57 = vld [vmem:[%s3430_s21 + $0x5f0] sm:$0xff] }
  0xab   : > { %1352 = vmatmul.mubr.bf16.gmra.mrb[4].mxu0 %v1182_v62  ;;  %v3172_v60 = vpack.i.bf16 %v411_v57, %v395_v56  ;;  %v396_v62 = vld [vmem:[%s3430_s21 + $0x578] sm:$0xff]  ;;  %v3240_v57 = vpack.i.bf16 %v467_v52, %v451_v51 }
  0xac   : > { %1361 = vmatprep.mubr.bf16.mxu0 %v3386_v43  ;;  %3155 = vxpose.xlu1.b32.cont [6/16] (narrow) %v3154_v63, 16  ;;  %v412_v63 = vld [vmem:[%s3430_s21 + $0x5f8] sm:$0xff] }
  0xad   : > { %v3174_v2 = vpack.i.bf16 %v412_v63, %v396_v62  ;;  %v436_v62 = vld [vmem:[%s3430_s21 + $0x6b8] sm:$0xff] }
  0xae   : > { %3113 = vxpose.xlu0.b32.cont [6/16] (narrow) %v3112_v0, 16  ;;  %v364_v0 = vld [vmem:[%s3430_s21 + $0x478] sm:$0xff] }
  0xaf   : > { %v3132_v3 = vpack.i.bf16 %v380_v1, %v364_v0  ;;  %v444_v51 = vld [vmem:[%s3430_s21 + $0x6f8] sm:$0xff] }
  0xb0   : > { %3157 = vxpose.xlu1.b32.cont [7/16] (narrow) %v3156_v7, 16  ;;  %v429_v7 = vld [vmem:[%s3430_s21 + $0x680] sm:$0xff] }
  0xb1   : > { %v3186_v9 = vpack.i.bf16 %v429_v7, %v413_v6 }
  0xb2   : > { %3115 = vxpose.xlu0.b32.cont [7/16] (narrow) %v3114_v8, 16  ;;  %v3228_v8 = vpack.i.bf16 %v461_v5, %v445_v4  ;;  %v421_v4 = vld [vmem:[%s3430_s21 + $0x640] sm:$0xff] }
  0xb3   : > { %1362 = vmatmul.mubr.bf16.gmra.mrb[8].mxu0 %v1183_v13  ;;  %v430_v13 = vld [vmem:[%s3430_s21 + $0x688] sm:$0xff]  ;;  %v437_v5 = vld [vmem:[%s3430_s21 + $0x6c0] sm:$0xff] }
  0xb4   : > { %1371 = vmatprep.mubr.bf16.mxu0 %v3386_v43  ;;  %3159 = vxpose.xlu1.b32.cont [8/16] (narrow) %v3158_v14, 16  ;;  %v3230_v14 = vpack.i.bf16 %v462_v11, %v446_v10  ;;  %v3188_v16 = vpack.i.bf16 %v430_v13, %v414_v12  ;;  %v454_v10 = vld [vmem:[%s3430_s21 + $0x748] sm:$0xff] }
  0xb5   : > { %v470_v11 = vld [vmem:[%s3430_s21 + $0x7c8] sm:$0xff] }
  0xb6   : > { %3117 = vxpose.xlu0.b32.cont [8/16] (narrow) %v3116_v15, 16  ;;  %v422_v12 = vld [vmem:[%s3430_s21 + $0x648] sm:$0xff] }
  0xb7   : > { %v438_v13 = vld [vmem:[%s3430_s21 + $0x6c8] sm:$0xff] }
  0xb8   : > { %3161 = vxpose.xlu1.b32.cont [9/16] (narrow) %v3160_v20, 16  ;;  %v415_v20 = vld [vmem:[%s3430_s21 + $0x610] sm:$0xff] }
  0xba   : > { %3119 = vxpose.xlu0.b32.cont [9/16] (narrow) %v3118_v21, 16  ;;  %v431_v21 = vld [vmem:[%s3430_s21 + $0x690] sm:$0xff] }
  0xbb   : > { %1372 = vmatmul.mubr.bf16.gmra.mrb[12].mxu0 %v1184_v40  ;;  %v3190_v25 = vpack.i.bf16 %v431_v21, %v415_v20  ;;  %v433_v40 = vld [vmem:[%s3430_s21 + $0x6a0] sm:$0xff]  ;;  %v439_v20 = vld [vmem:[%s3430_s21 + $0x6d0] sm:$0xff]  ;;  %v3248_v21 = vpack.i.bf16 %v471_v18, %v455_v17  ;;  %v480_v17 = vld [vmem:[%s3430_s21 + $0x818] sm:$0xff] }
  0xbc   : > { %3163 = vxpose.xlu1.b32.cont [10/16] (narrow) %v3162_v26, 16  ;;  %1381 = vmatprep.mubr.bf16.mxu0 %v3386_v43  ;;  %v448_v26 = vld [vmem:[%s3430_s21 + $0x718] sm:$0xff] }
  0xbd   : > { %v496_v18 = vld [vmem:[%s3430_s21 + $0x898] sm:$0xff] }
  0xbe   : > { %3121 = vxpose.xlu0.b32.cont [10/16] (narrow) %v3120_v27, 16  ;;  %v464_v27 = vld [vmem:[%s3430_s21 + $0x798] sm:$0xff] }
  0xbf   : > { %v3234_v33 = vpack.i.bf16 %v464_v27, %v448_v26  ;;  %v440_v26 = vld [vmem:[%s3430_s21 + $0x6d8] sm:$0xff] }
  0xc0   : > { %3165 = vxpose.xlu1.b32.cont [11/16] (narrow) %v3164_v35, 16  ;;  %v3192_v35 = vpack.i.bf16 %v432_v31, %v416_v30  ;;  %v457_v30 = vld [vmem:[%s3430_s21 + $0x760] sm:$0xff] }
  0xc1   : > { %v473_v31 = vld [vmem:[%s3430_s21 + $0x7e0] sm:$0xff] }
  0xc2   : > { %3123 = vxpose.xlu0.b32.cont [11/16] (narrow) %v3122_v36, 16  ;;  %v449_v36 = vld [vmem:[%s3430_s21 + $0x720] sm:$0xff] }
  0xc4   : > { %3167 = vxpose.xlu1.b32.cont [12/16] (narrow) %v3166_v29, 16  ;;  %v3236_v29 = vpack.i.bf16 %v465_v37, %v449_v36  ;;  %v458_v36 = vld [vmem:[%s3430_s21 + $0x768] sm:$0xff] }
  0xc5   : > { %v474_v37 = vld [vmem:[%s3430_s21 + $0x7e8] sm:$0xff] }
  0xc6   : > { %3125 = vxpose.xlu0.b32.cont [12/16] (narrow) %v3124_v38, 16  ;;  %v3194_v38 = vpack.i.bf16 %v433_v40, %v417_v39  ;;  %v426_v39 = vld [vmem:[%s3430_s21 + $0x668] sm:$0xff] }
  0xc7   : > { %v442_v40 = vld [vmem:[%s3430_s21 + $0x6e8] sm:$0xff] }
  0xc8   : > { %3169 = vxpose.xlu1.b32.cont [13/16] (narrow) %v3168_v48, 16 }
  0xca   : > { %3127 = vxpose.xlu0.b32.cont [13/16] (narrow) %v3126_v49, 16  ;;  %v3238_v49 = vpack.i.bf16 %v466_v45, %v450_v44  ;;  %v427_v44 = vld [vmem:[%s3430_s21 + $0x670] sm:$0xff] }
  0xcb   : > { %v443_v45 = vld [vmem:[%s3430_s21 + $0x6f0] sm:$0xff] }
  0xcc   : > { %3171 = vxpose.xlu1.b32.cont [14/16] (narrow) %v3170_v54, 16  ;;  %v435_v54 = vld [vmem:[%s3430_s21 + $0x6b0] sm:$0xff]  ;;  %v3214_v47 = vpack.i.bf16 %v443_v45, %v427_v44  ;;  %v3794_v44 = vld [vmem:[%s5244_s2] sm:$0x3] }
  0xcd   : > { %v3198_v58 = vpack.i.bf16 %v435_v54, %v419_v53  ;;  %v509_v54 = vld [vmem:[%s3430_s21 + $0x900] sm:$0xff] }
  0xce   : > { %3129 = vxpose.xlu0.b32.cont [14/16] (narrow) %v3128_v55, 16 }
  0xd0   : > { %3173 = vxpose.xlu1.b32.cont [15/16] (narrow) %v3172_v60, 16  ;;  %v468_v60 = vld [vmem:[%s3430_s21 + $0x7b8] sm:$0xff] }
  0xd1   : > { %v3242_v0 = vpack.i.bf16 %v468_v60, %v452_v59  ;;  %v510_v60 = vld [vmem:[%s3430_s21 + $0x908] sm:$0xff] }
  0xd2   : > { %3131 = vxpose.xlu0.b32.cont [15/16] (narrow) %v3130_v61, 16  ;;  %v420_v61 = vld [vmem:[%s3430_s21 + $0x638] sm:$0xff] }
  0xd3   : > { %v3200_v1 = vpack.i.bf16 %v436_v62, %v420_v61  ;;  %v526_v61 = vld [vmem:[%s3430_s21 + $0x988] sm:$0xff] }
  0xd4   : > { %3175 = vxpose.xlu1.b32.end [16/16] (narrow) %v3174_v2, 16  ;;  %v453_v2 = vld [vmem:[%s3430_s21 + $0x740] sm:$0xff]  ;;  %v478_v62 = vld [vmem:[%s3430_s21 + $0x808] sm:$0xff] }
  0xd6   : > { %3133 = vxpose.xlu0.b32.end [16/16] (narrow) %v3132_v3, 16  ;;  %v469_v3 = vld [vmem:[%s3430_s21 + $0x7c0] sm:$0xff] }
  0xd8   : > { %3229 = vxpose.xlu1.b32.start [1/16] (narrow) %v3228_v8, 16  ;;  %v3694_v15 = vpop.trf.xlu1  ;;  %v3244_v8 = vpack.i.bf16 %v469_v3, %v453_v2  ;;  %v511_v3 = vld [vmem:[%s3430_s21 + $0x910] sm:$0xff] }
  0xd9   : > { %v3093_v55 = vunpack.i.l.bf16 %v3694_v15  ;;  %v3096_v6 = vunpack.i.h.bf16 %v3694_v15  ;;  %v3246_v15 = vpack.i.bf16 %v470_v11, %v454_v10 }
  0xda   : > { %3187 = vxpose.xlu0.b32.start [1/16] (narrow) %v3186_v9, 16  ;;  %v3050_v19 = vpop.trf.xlu0  ;;  %v3202_v9 = vpack.i.bf16 %v437_v5, %v421_v4  ;;  %v527_v4 = vld [vmem:[%s3430_s21 + $0x990] sm:$0xff] }
  0xdb   : > { %v3051_v24 = vunpack.i.l.bf16 %v3050_v19  ;;  %v3054_v41 = vunpack.i.h.bf16 %v3050_v19  ;;  %v423_v19 = vld [vmem:[%s3430_s21 + $0x650] sm:$0xff]  ;;  %v3316_v10 = vpack.i.bf16 %v527_v4, %v511_v3  ;;  %v534_v3 = vld [vmem:[%s3430_s21 + $0x9c8] sm:$0xff] }
  0xdc   : > { %3231 = vxpose.xlu1.b32.cont [2/16] (narrow) %v3230_v14, 16  ;;  %v3700_v23 = vpop.trf.xlu1  ;;  %v486_v4 = vld [vmem:[%s3430_s21 + $0x848] sm:$0xff] }
  0xdd   : > { %v3098_v56 = vunpack.i.l.bf16 %v3700_v23  ;;  %v3101_v7 = vunpack.i.h.bf16 %v3700_v23  ;;  %v456_v23 = vld [vmem:[%s3430_s21 + $0x758] sm:$0xff] }
  0xde   : > { %3189 = vxpose.xlu0.b32.cont [2/16] (narrow) %v3188_v16, 16  ;;  %v3055_v28 = vpop.trf.xlu0  ;;  %v3204_v16 = vpack.i.bf16 %v438_v13, %v422_v12 }
  0xdf   : > { %v3056_v32 = vunpack.i.l.bf16 %v3055_v28  ;;  %v3059_v42 = vunpack.i.h.bf16 %v3055_v28  ;;  %v1187_v63 = vpack.c.bf16 %v3098_v56, %v3093_v55  ;;  %v1188_v14 = vpack.c.bf16 %v3101_v7, %v3096_v6  ;;  %v525_v55 = vld [vmem:[%s3430_s21 + $0x980] sm:$0xff]  ;;  %v479_v6 = vld [vmem:[%s3430_s21 + $0x810] sm:$0xff] }
  0xe0   : > { %3233 = vxpose.xlu1.b32.cont [3/16] (narrow) %v3232_v22, 16  ;;  %v3206_v22 = vpack.i.bf16 %v439_v20, %v423_v19  ;;  %v477_v56 = vld [vmem:[%s3430_s21 + $0x800] sm:$0xff]  ;;  %v495_v7 = vld [vmem:[%s3430_s21 + $0x890] sm:$0xff] }
  0xe1   : > { %v1185_v34 = vpack.c.bf16 %v3056_v32, %v3051_v24  ;;  %v1186_v48 = vpack.c.bf16 %v3059_v42, %v3054_v41  ;;  %v472_v24 = vld [vmem:[%s3430_s21 + $0x7d8] sm:$0xff]  ;;  %v425_v32 = vld [vmem:[%s3430_s21 + $0x660] sm:$0xff]  ;;  %v3254_v41 = vpack.i.bf16 %v474_v37, %v458_v36  ;;  %v3212_v42 = vpack.i.bf16 %v442_v40, %v426_v39  ;;  %v514_v39 = vld [vmem:[%s3430_s21 + $0x928] sm:$0xff] }
  0xe2   : > { %3191 = vxpose.xlu0.b32.cont [3/16] (narrow) %v3190_v25, 16  ;;  %v424_v25 = vld [vmem:[%s3430_s21 + $0x658] sm:$0xff]  ;;  %v3250_v27 = vpack.i.bf16 %v472_v24, %v456_v23  ;;  %v3274_v13 = vpack.i.bf16 %v495_v7, %v479_v6  ;;  %v530_v40 = vld [vmem:[%s3430_s21 + $0x9a8] sm:$0xff] }
  0xe3   : > { %1382 = vmatmul.mubr.bf16.gmra.mrb[16].mxu0 %v1185_v34  ;;  %v3208_v28 = vpack.i.bf16 %v440_v26, %v424_v25  ;;  %v3252_v34 = vpack.i.bf16 %v473_v31, %v457_v30  ;;  %v3276_v25 = vpack.i.bf16 %v496_v18, %v480_v17  ;;  %v513_v26 = vld [vmem:[%s3430_s21 + $0x920] sm:$0xff]  ;;  %v3322_v45 = vpack.i.bf16 %v530_v40, %v514_v39  ;;  %v504_v17 = vld [vmem:[%s3430_s21 + $0x8d8] sm:$0xff] }
  0xe4   : > { %1391 = vmatprep.mubr.bf16.mxu0 %v3386_v43  ;;  %3235 = vxpose.xlu1.b32.cont [4/16] (narrow) %v3234_v33, 16  ;;  %v441_v33 = vld [vmem:[%s3430_s21 + $0x6e0] sm:$0xff] }
  0xe5   : > { %v497_v30 = vld [vmem:[%s3430_s21 + $0x8a0] sm:$0xff] }
  0xe6   : > { %3193 = vxpose.xlu0.b32.cont [4/16] (narrow) %v3192_v35, 16  ;;  %v3210_v35 = vpack.i.bf16 %v441_v33, %v425_v32  ;;  %v1219_v33 = vlaneseq }
  0xe8   : > { %3237 = vxpose.xlu1.b32.cont [5/16] (narrow) %v3236_v29, 16  ;;  %v459_v29 = vld [vmem:[%s3430_s21 + $0x770] sm:$0xff] }
  0xea   : > { %3195 = vxpose.xlu0.b32.cont [5/16] (narrow) %v3194_v38, 16  ;;  %v475_v38 = vld [vmem:[%s3430_s21 + $0x7f0] sm:$0xff] }
  0xeb   : > { %1392 = vmatmul.mubr.bf16.gmra.mrb[20].mxu0 %v1186_v48  ;;  %v3256_v46 = vpack.i.bf16 %v475_v38, %v459_v29  ;;  %v460_v48 = vld [vmem:[%s3430_s21 + $0x778] sm:$0xff] }
  0xec   : > { %1401 = vmatprep.mubr.bf16.mxu0 %v3386_v43  ;;  %3239 = vxpose.xlu1.b32.cont [6/16] (narrow) %v3238_v49, 16  ;;  %v476_v49 = vld [vmem:[%s3430_s21 + $0x7f8] sm:$0xff] }
  0xed   : > { %v3258_v52 = vpack.i.bf16 %v476_v49, %v460_v48  ;;  %v515_v48 = vld [vmem:[%s3430_s21 + $0x930] sm:$0xff] }
  0xee   : > { %3197 = vxpose.xlu0.b32.cont [6/16] (narrow) %v3196_v50, 16  ;;  %v428_v50 = vld [vmem:[%s3430_s21 + $0x678] sm:$0xff]  ;;  %v531_v49 = vld [vmem:[%s3430_s21 + $0x9b0] sm:$0xff] }
  0xef   : > { %v3216_v53 = vpack.i.bf16 %v444_v51, %v428_v50  ;;  %v483_v50 = vld [vmem:[%s3430_s21 + $0x830] sm:$0xff] }
  0xf0   : > { %3241 = vxpose.xlu1.b32.cont [7/16] (narrow) %v3240_v57, 16  ;;  %v493_v57 = vld [vmem:[%s3430_s21 + $0x880] sm:$0xff]  ;;  %v499_v51 = vld [vmem:[%s3430_s21 + $0x8b0] sm:$0xff] }
  0xf1   : > { %v3270_v59 = vpack.i.bf16 %v493_v57, %v477_v56  ;;  %v484_v56 = vld [vmem:[%s3430_s21 + $0x838] sm:$0xff] }
  0xf2   : > { %3199 = vxpose.xlu0.b32.cont [7/16] (narrow) %v3198_v58, 16  ;;  %v3312_v58 = vpack.i.bf16 %v525_v55, %v509_v54  ;;  %v516_v54 = vld [vmem:[%s3430_s21 + $0x938] sm:$0xff] }
  0xf3   : > { %1402 = vmatmul.mubr.bf16.gmra.mrb[24].mxu0 %v1187_v63  ;;  %v494_v63 = vld [vmem:[%s3430_s21 + $0x888] sm:$0xff]  ;;  %v532_v55 = vld [vmem:[%s3430_s21 + $0x9b8] sm:$0xff] }
  0xf4   : > { %1411 = vmatprep.mubr.bf16.mxu0 %v3386_v43  ;;  %3243 = vxpose.xlu1.b32.cont [8/16] (narrow) %v3242_v0, 16  ;;  %v3272_v2 = vpack.i.bf16 %v494_v63, %v478_v62  ;;  %v500_v57 = vld [vmem:[%s3430_s21 + $0x8b8] sm:$0xff]  ;;  %v485_v62 = vld [vmem:[%s3430_s21 + $0x840] sm:$0xff] }
  0xf5   : > { %v501_v63 = vld [vmem:[%s3430_s21 + $0x8c0] sm:$0xff] }
  0xf6   : > { %3201 = vxpose.xlu0.b32.cont [8/16] (narrow) %v3200_v1, 16  ;;  %v3314_v1 = vpack.i.bf16 %v526_v61, %v510_v60  ;;  %v517_v60 = vld [vmem:[%s3430_s21 + $0x940] sm:$0xff] }
  0xf7   : > { %v533_v61 = vld [vmem:[%s3430_s21 + $0x9c0] sm:$0xff] }
  0xf8   : > { %3245 = vxpose.xlu1.b32.cont [9/16] (narrow) %v3244_v8, 16 }
  0xfa   : > { %3203 = vxpose.xlu0.b32.cont [9/16] (narrow) %v3202_v9, 16 }
  0xfb   : > { %1412 = vmatmul.mubr.bf16.gmra.mrb[28].mxu0 %v1188_v14  ;;  %v512_v14 = vld [vmem:[%s3430_s21 + $0x918] sm:$0xff] }
  0xfc   : > { %1421 = vmatprep.mubr.bf16.mxu0 %v3386_v43  ;;  %3247 = vxpose.xlu1.b32.cont [10/16] (narrow) %v3246_v15, 16  ;;  %v528_v15 = vld [vmem:[%s3430_s21 + $0x998] sm:$0xff] }
  0xfe   : > { %3205 = vxpose.xlu0.b32.cont [10/16] (narrow) %v3204_v16, 16 }
 0x100   : > { %3249 = vxpose.xlu1.b32.cont [11/16] (narrow) %v3248_v21, 16  ;;  %v3318_v21 = vpack.i.bf16 %v528_v15, %v512_v14  ;;  %v520_v14 = vld [vmem:[%s3430_s21 + $0x958] sm:$0xff] }
 0x101   : > { %v536_v15 = vld [vmem:[%s3430_s21 + $0x9d8] sm:$0xff] }
 0x102   : > { %3207 = vxpose.xlu0.b32.cont [11/16] (narrow) %v3206_v22, 16  ;;  %v3334_v18 = vpack.i.bf16 %v536_v15, %v520_v14 }
 0x104   : > { %3251 = vxpose.xlu1.b32.cont [12/16] (narrow) %v3250_v27, 16  ;;  %v529_v27 = vld [vmem:[%s3430_s21 + $0x9a0] sm:$0xff] }
 0x106   : > { %3209 = vxpose.xlu0.b32.cont [12/16] (narrow) %v3208_v28, 16  ;;  %v481_v28 = vld [vmem:[%s3430_s21 + $0x820] sm:$0xff] }
 0x107   : > { %v3278_v36 = vpack.i.bf16 %v497_v30, %v481_v28  ;;  %v490_v28 = vld [vmem:[%s3430_s21 + $0x868] sm:$0xff] }
 0x108   : > { %3253 = vxpose.xlu1.b32.cont [13/16] (narrow) %v3252_v34, 16  ;;  %v3320_v34 = vpack.i.bf16 %v529_v27, %v513_v26  ;;  %v522_v26 = vld [vmem:[%s3430_s21 + $0x968] sm:$0xff] }
 0x109   : > { %v538_v27 = vld [vmem:[%s3430_s21 + $0x9e8] sm:$0xff] }
 0x10a   : > { %3211 = vxpose.xlu0.b32.cont [13/16] (narrow) %v3210_v35, 16  ;;  %v3784_v35 = vshrl.u32 %v1219_v33, 7  ;;  %v506_v30 = vld [vmem:[%s3430_s21 + $0x8e8] sm:$0xff]  ;;  %v523_v33 = vld [vmem:[%s3430_s21 + $0x970] sm:$0xff] }
 0x10c   : > { %3255 = vxpose.xlu1.b32.cont [14/16] (narrow) %v3254_v41, 16  ;;  %v482_v41 = vld [vmem:[%s3430_s21 + $0x828] sm:$0xff]  ;;  %v1225_v38 = vsub.s32 1, %v3784_v35 }
 0x10e   : > { %3213 = vxpose.xlu0.b32.cont [14/16] (narrow) %v3212_v42, 16  ;;  %v498_v42 = vld [vmem:[%s3430_s21 + $0x8a8] sm:$0xff] }
 0x110   : > { %3257 = vxpose.xlu1.b32.cont [15/16] (narrow) %v3256_v46, 16  ;;  %v3797_v46 = vrot.slane %v3794_v44, %v1225_v38  ;;  %v508_v38 = vld [vmem:[%s3430_s21 + $0x8f8] sm:$0xff] }
 0x112   : > { %3215 = vxpose.xlu0.b32.cont [15/16] (narrow) %v3214_v47, 16  ;;  %v3280_v47 = vpack.i.bf16 %v498_v42, %v482_v41  ;;  %v524_v41 = vld [vmem:[%s3430_s21 + $0x978] sm:$0xff] }
 0x113   : > { %v540_v42 = vld [vmem:[%s3430_s21 + $0x9f8] sm:$0xff] }
 0x114   : > { %3259 = vxpose.xlu1.b32.end [16/16] (narrow) %v3258_v52, 16  ;;  %v3324_v52 = vpack.i.bf16 %v531_v49, %v515_v48 }
 0x116   : > { %3217 = vxpose.xlu0.b32.end [16/16] (narrow) %v3216_v53, 16  ;;  %v3282_v53 = vpack.i.bf16 %v499_v51, %v483_v50 }
 0x118   : > { %v3176_v0 = vpop.trf.xlu1  ;;  %3313 = vxpose.xlu1.b32.start [1/16] (narrow) %v3312_v58, 16  ;;  %v3326_v58 = vpack.i.bf16 %v532_v55, %v516_v54 }
 0x119   : > { %v3177_v8 = vunpack.i.l.bf16 %v3176_v0  ;;  %v3180_v23 = vunpack.i.h.bf16 %v3176_v0  ;;  %v3328_v0 = vpack.i.bf16 %v533_v61, %v517_v60  ;;  %v1221_v61 = vsub.s32 0, %v3784_v35 }
 0x11a   : > { %3271 = vxpose.xlu0.b32.start [1/16] (narrow) %v3270_v59, 16  ;;  %v3134_v5 = vpop.trf.xlu0  ;;  %v3284_v59 = vpack.i.bf16 %v500_v57, %v484_v56 }
 0x11b   : > { %v3135_v11 = vunpack.i.l.bf16 %v3134_v5  ;;  %v3138_v31 = vunpack.i.h.bf16 %v3134_v5  ;;  %v502_v5 = vld [vmem:[%s3430_s21 + $0x8c8] sm:$0xff] }
 0x11c   : > { %v3181_v9 = vpop.trf.xlu1  ;;  %3315 = vxpose.xlu1.b32.cont [2/16] (narrow) %v3314_v1, 16  ;;  %v3286_v1 = vpack.i.bf16 %v501_v63, %v485_v62  ;;  %v3288_v7 = vpack.i.bf16 %v502_v5, %v486_v4 }
 0x11d   : > { %v3182_v12 = vunpack.i.l.bf16 %v3181_v9  ;;  %v3185_v24 = vunpack.i.h.bf16 %v3181_v9  ;;  %v535_v9 = vld [vmem:[%s3430_s21 + $0x9d0] sm:$0xff] }
 0x11e   : > { %3273 = vxpose.xlu0.b32.cont [2/16] (narrow) %v3272_v2, 16  ;;  %v3139_v16 = vpop.trf.xlu0  ;;  %v518_v2 = vld [vmem:[%s3430_s21 + $0x948] sm:$0xff] }
 0x11f   : > { %v3140_v19 = vunpack.i.l.bf16 %v3139_v16  ;;  %v1191_v20 = vpack.c.bf16 %v3182_v12, %v3177_v8  ;;  %v3143_v32 = vunpack.i.h.bf16 %v3139_v16  ;;  %v1192_v37 = vpack.c.bf16 %v3185_v24, %v3180_v23  ;;  %v519_v8 = vld [vmem:[%s3430_s21 + $0x950] sm:$0xff]  ;;  %v488_v16 = vld [vmem:[%s3430_s21 + $0x858] sm:$0xff]  ;;  %v505_v23 = vld [vmem:[%s3430_s21 + $0x8e0] sm:$0xff] }
 0x120   : > { %3317 = vxpose.xlu1.b32.cont [3/16] (narrow) %v3316_v10, 16  ;;  %v3330_v6 = vpack.i.bf16 %v534_v3, %v518_v2  ;;  %v487_v10 = vld [vmem:[%s3430_s21 + $0x850] sm:$0xff]  ;;  %v3332_v12 = vpack.i.bf16 %v535_v9, %v519_v8 }
 0x121   : > { %v1189_v22 = vpack.c.bf16 %v3140_v19, %v3135_v11  ;;  %1442 = vmatmul.mubr.bf16.vlgmr.msra.gmra.mrb[0].mxu1 %v1191_v20  ;;  %v1190_v29 = vpack.c.bf16 %v3143_v32, %v3138_v31  ;;  %v503_v11 = vld [vmem:[%s3430_s21 + $0x8d0] sm:$0xff]  ;;  %v3292_v19 = vpack.i.bf16 %v504_v17, %v488_v16  ;;  %v521_v20 = vld [vmem:[%s3430_s21 + $0x960] sm:$0xff]  ;;  %v3338_v31 = vpack.i.bf16 %v538_v27, %v522_v26 }
 0x122   : > { %3275 = vxpose.xlu0.b32.cont [3/16] (narrow) %v3274_v13, 16  ;;  %1451 = vmatprep.mubr.bf16.mxu1 %v3386_v43  ;;  %v3290_v13 = vpack.i.bf16 %v503_v11, %v487_v10  ;;  %v3296_v32 = vpack.i.bf16 %v506_v30, %v490_v28 }
 0x123   : > { %1422 = vmatmul.mubr.bf16.gmra.mrb[32].mxu0 %v1189_v22  ;;  %v489_v22 = vld [vmem:[%s3430_s21 + $0x860] sm:$0xff] }
 0x124   : > { %1431 = vmatprep.mubr.bf16.mxu0 %v3386_v43  ;;  %3319 = vxpose.xlu1.b32.cont [4/16] (narrow) %v3318_v21, 16  ;;  %v537_v21 = vld [vmem:[%s3430_s21 + $0x9e0] sm:$0xff] }
 0x125   : > { %v3336_v24 = vpack.i.bf16 %v537_v21, %v521_v20 }
 0x126   : > { %3277 = vxpose.xlu0.b32.cont [4/16] (narrow) %v3276_v25, 16  ;;  %v3294_v25 = vpack.i.bf16 %v505_v23, %v489_v22 }
 0x128   : > { %3321 = vxpose.xlu1.b32.cont [5/16] (narrow) %v3320_v34, 16  ;;  %v539_v34 = vld [vmem:[%s3430_s21 + $0x9f0] sm:$0xff] }
 0x129   : > { %1452 = vmatmul.mubr.bf16.gmra.mrb[4].mxu1 %v1192_v37  ;;  %v507_v37 = vld [vmem:[%s3430_s21 + $0x8f0] sm:$0xff]  ;;  %v3340_v39 = vpack.i.bf16 %v539_v34, %v523_v33 }
 0x12a   : > { %3279 = vxpose.xlu0.b32.cont [5/16] (narrow) %v3278_v36, 16  ;;  %1461 = vmatprep.mubr.bf16.mxu1 %v3386_v43  ;;  %v491_v36 = vld [vmem:[%s3430_s21 + $0x870] sm:$0xff] }
 0x12b   : > { %1432 = vmatmul.mubr.bf16.gmra.mrb[36].mxu0 %v1190_v29  ;;  %v3298_v40 = vpack.i.bf16 %v507_v37, %v491_v36  ;;  %v492_v29 = vld [vmem:[%s3430_s21 + $0x878] sm:$0xff]  ;;  %s214_s21 = smul.u32 40, %s2878_s16 }
 0x12c   : > { %3323 = vxpose.xlu1.b32.cont [6/16] (narrow) %v3322_v45, 16  ;;  %v3342_v45 = vpack.i.bf16 %v540_v42, %v524_v41 }
 0x12d   : > { %p215_p4 = scmp.lt.s32.totalorder %s214_s21, 79 }
 0x12e   : > { %3281 = vxpose.xlu0.b32.cont [6/16] (narrow) %v3280_v47, 16  ;;  %v3300_v47 = vpack.i.bf16 %v508_v38, %v492_v29 }
 0x12f   : > { %s5361_s21 = smov (!%p215_p4, %s214_s21), 79 }
 0x130   : > { %3325 = vxpose.xlu1.b32.cont [7/16] (narrow) %v3324_v52, 16  ;;  %s2887_s16 = sshll.u32 %s5361_s21, 3 }
 0x131   : > { %s4356_s11 = scalar_lea.vmem %s5246_s4, %s2887_s16 }
 0x132   : > { %3283 = vxpose.xlu0.b32.cont [7/16] (narrow) %v3282_v53, 16 }
 0x134   : > { %3327 = vxpose.xlu1.b32.cont [8/16] (narrow) %v3326_v58, 16 }
 0x136   : > { %3285 = vxpose.xlu0.b32.cont [8/16] (narrow) %v3284_v59, 16 }
 0x138   : > { %3329 = vxpose.xlu1.b32.cont [9/16] (narrow) %v3328_v0, 16  ;;  %v3845_v0 = vrot.slane %v3794_v44, %v1221_v61 }
 0x13a   : > { %3287 = vxpose.xlu0.b32.cont [9/16] (narrow) %v3286_v1, 16 }
 0x13c   : > { %3331 = vxpose.xlu1.b32.cont [10/16] (narrow) %v3330_v6, 16 }
 0x13e   : > { %3289 = vxpose.xlu0.b32.cont [10/16] (narrow) %v3288_v7, 16 }
 0x140   : > { %3333 = vxpose.xlu1.b32.cont [11/16] (narrow) %v3332_v12, 16 }
 0x142   : > { %3291 = vxpose.xlu0.b32.cont [11/16] (narrow) %v3290_v13, 16 }
 0x144   : > { %3335 = vxpose.xlu1.b32.cont [12/16] (narrow) %v3334_v18, 16 }
 0x146   : > { %3293 = vxpose.xlu0.b32.cont [12/16] (narrow) %v3292_v19, 16 }
 0x148   : > { %3337 = vxpose.xlu1.b32.cont [13/16] (narrow) %v3336_v24, 16 }
 0x14a   : > { %3295 = vxpose.xlu0.b32.cont [13/16] (narrow) %v3294_v25, 16 }
 0x14c   : > { %3339 = vxpose.xlu1.b32.cont [14/16] (narrow) %v3338_v31, 16 }
 0x14e   : > { %3297 = vxpose.xlu0.b32.cont [14/16] (narrow) %v3296_v32, 16 }
 0x150   : > { %3341 = vxpose.xlu1.b32.cont [15/16] (narrow) %v3340_v39, 16 }
 0x152   : > { %3299 = vxpose.xlu0.b32.cont [15/16] (narrow) %v3298_v40, 16 }
 0x154   : > { %3343 = vxpose.xlu1.b32.end [16/16] (narrow) %v3342_v45, 16 }
 0x156   : > { %3301 = vxpose.xlu0.b32.end [16/16] (narrow) %v3300_v47, 16 }
 0x158   : > { %v3260_v48 = vpop.trf.xlu1 }
 0x159   : > { %v3261_v58 = vunpack.i.l.bf16 %v3260_v48  ;;  %v3264_v62 = vunpack.i.h.bf16 %v3260_v48 }
 0x15a   : > { %v3218_v49 = vpop.trf.xlu0 }
 0x15b   : > { %v3219_v50 = vunpack.i.l.bf16 %v3218_v49  ;;  %v3222_v55 = vunpack.i.h.bf16 %v3218_v49 }
 0x15c   : > { %v3265_v51 = vpop.trf.xlu1 }
 0x15d   : > { %v3266_v59 = vunpack.i.l.bf16 %v3265_v51  ;;  %v3269_v63 = vunpack.i.h.bf16 %v3265_v51 }
 0x15e   : > { %v3223_v52 = vpop.trf.xlu0 }
 0x15f   : > { %v3224_v53 = vunpack.i.l.bf16 %v3223_v52  ;;  %v3227_v56 = vunpack.i.h.bf16 %v3223_v52  ;;  %v1195_v60 = vpack.c.bf16 %v3266_v59, %v3261_v58  ;;  %v1196_v2 = vpack.c.bf16 %v3269_v63, %v3264_v62 }
 0x161   : > { %v1193_v54 = vpack.c.bf16 %v3224_v53, %v3219_v50  ;;  %v1194_v57 = vpack.c.bf16 %v3227_v56, %v3222_v55 }
 0x163   : > { %1462 = vmatmul.mubr.bf16.gmra.mrb[8].mxu1 %v1193_v54 }
 0x164   : > { %1471 = vmatprep.mubr.bf16.mxu1 %v3386_v43 }
 0x16b   : > { %1472 = vmatmul.mubr.bf16.gmra.mrb[12].mxu1 %v1194_v57 }
 0x16c   : > { %1481 = vmatprep.mubr.bf16.mxu1 %v3386_v43 }
 0x173   : > { %1482 = vmatmul.mubr.bf16.gmra.mrb[16].mxu1 %v1195_v60 }
 0x174   : > { %1491 = vmatprep.mubr.bf16.mxu1 %v3386_v43 }
 0x176   : > { %v1343_v1 = vpop.f32.mrb[0].mxu0 }
 0x177   : > { %v3847_v3 = vpop.f32.mrb[1].mxu0  ;;  %v3859_v44 = vadd.f32 %v1343_v1, %v3845_v0 }
 0x178   : > { %5266 = vst [vmem:[#allocation2_spill] sm:$0xff] %v3847_v3  ;;  %v1347_v4 = vpop.f32.mrb[2].mxu0 }
 0x179   : > { %v3850_v5 = vadd.f32 %v1347_v4, %v3845_v0  ;;  %v3852_v6 = vpop.f32.mrb[3].mxu0 }
 0x17a   : > { %5267 = vst [vmem:[#allocation3_spill] sm:$0xff] %v3852_v6 }
 0x17b   : > { %1492 = vmatmul.mubr.bf16.gmra.mrb[20].mxu1 %v1196_v2  ;;  %1544 = vmax.xlane.f32.xlu1 %v3850_v5 }
 0x17c   : > { %1501 = vmatprep.mubr.bf16.mxu1 %v3386_v43 }
 0x17e   : > { %v3856_v35 = vpop.f32.mrb[4].mxu0 }
 0x17f   : > { %v3861_v7 = vpop.f32.mrb[5].mxu0  ;;  %v3941_v63 = vadd.f32 %v3856_v35, %v3845_v0 }
 0x180   : > { %v3863_v8 = vpop.f32.mrb[6].mxu0 }
 0x181   : > { %v3865_v9 = vpop.f32.mrb[7].mxu0  ;;  %v3949_v4 = vadd.f32 %v3863_v8, %v3845_v0 }
 0x183   : > { %1542 = vmax.xlane.f32.xlu0 %v3859_v44 }
 0x186   : > { %v3868_v10 = vpop.f32.mrb[8].mxu0 }
 0x187   : > { %v3870_v11 = vpop.f32.mrb[9].mxu0  ;;  %v3960_v35 = vadd.f32 %v3868_v10, %v3845_v0 }
 0x188   : > { %v3872_v12 = vpop.f32.mrb[10].mxu0 }
 0x189   : > { %v3874_v13 = vpop.f32.mrb[11].mxu0 }
 0x18e   : > { %v3876_v14 = vpop.f32.mrb[12].mxu0 }
 0x18f   : > { %v3878_v15 = vpop.f32.mrb[13].mxu0 }
 0x190   : > { %v3880_v16 = vpop.f32.mrb[14].mxu0 }
 0x191   : > { %v3882_v17 = vpop.f32.mrb[15].mxu0 }
 0x198   : > { %v3344_v18 = vpop.trf.xlu1 }
 0x199   : > { %v3345_v28 = vunpack.i.l.bf16 %v3344_v18  ;;  %v3348_v32 = vunpack.i.h.bf16 %v3344_v18 }
 0x19a   : > { %v3302_v19 = vpop.trf.xlu0 }
 0x19b   : > { %v3303_v22 = vunpack.i.l.bf16 %v3302_v19  ;;  %v3306_v26 = vunpack.i.h.bf16 %v3302_v19 }
 0x19c   : > { %v3349_v20 = vpop.trf.xlu1 }
 0x19d   : > { %v3350_v30 = vunpack.i.l.bf16 %v3349_v20  ;;  %v3353_v33 = vunpack.i.h.bf16 %v3349_v20 }
 0x19e   : > { %v3307_v21 = vpop.trf.xlu0 }
 0x19f   : > { %v3308_v23 = vunpack.i.l.bf16 %v3307_v21  ;;  %v3311_v25 = vunpack.i.h.bf16 %v3307_v21  ;;  %v1199_v31 = vpack.c.bf16 %v3350_v30, %v3345_v28  ;;  %v1200_v39 = vpack.c.bf16 %v3353_v33, %v3348_v32 }
 0x1a0   : > { %v3997_v32 = vadd.f32 %v3880_v16, %v3845_v0 }
 0x1a1   : > { %v1197_v24 = vpack.c.bf16 %v3308_v23, %v3303_v22  ;;  %v1198_v27 = vpack.c.bf16 %v3311_v25, %v3306_v26  ;;  %v3976_v25 = vadd.f32 %v3872_v12, %v3845_v0  ;;  %v3992_v12 = vadd.f32 %v3876_v14, %v3845_v0 }
 0x1a3   : > { %1502 = vmatmul.mubr.bf16.gmra.mrb[24].mxu1 %v1197_v24 }
 0x1a4   : > { %1511 = vmatprep.mubr.bf16.mxu1 %v3386_v43 }
 0x1ab   : > { %1512 = vmatmul.mubr.bf16.gmra.mrb[28].mxu1 %v1198_v27 }
 0x1ac   : > { %1521 = vmatprep.mubr.bf16.mxu1 %v3386_v43 }
 0x1b3   : > { %1522 = vmatmul.mubr.bf16.gmra.mrb[32].mxu1 %v1199_v31 }
 0x1b4   : > { %1531 = vmatprep.mubr.bf16.mxu1 %v3386_v43 }
 0x1b6   : > { %v3887_v34 = vpop.f32.mrb[16].mxu0 }
 0x1b7   : > { %v3889_v36 = vpop.f32.mrb[17].mxu0  ;;  %v4008_v14 = vadd.f32 %v3887_v34, %v3845_v0 }
 0x1b8   : > { %5268 = vst [vmem:[#allocation4_spill] sm:$0xff] %v3889_v36  ;;  %v3891_v37 = vpop.f32.mrb[18].mxu0 }
 0x1b9   : > { %v3893_v40 = vpop.f32.mrb[19].mxu0 }
 0x1ba   : > { %5269 = vst [vmem:[#allocation5_spill] sm:$0xff] %v3893_v40 }
 0x1bb   : > { %1532 = vmatmul.mubr.bf16.gmra.mrb[36].mxu1 %v1200_v39 }
 0x1be   : > { %v3895_v41 = vpop.f32.mrb[20].mxu0 }
 0x1bf   : > { %v3897_v42 = vpop.f32.mrb[21].mxu0 }
 0x1c0   : > { %5270 = vst [vmem:[#allocation6_spill] sm:$0xff] %v3897_v42  ;;  %v3899_v29 = vpop.f32.mrb[22].mxu0 }
 0x1c1   : > { %v3901_v38 = vpop.f32.mrb[23].mxu0 }
 0x1c2   : > { %5271 = vst [vmem:[#allocation7_spill] sm:$0xff] %v3901_v38 }
 0x1c6   : > { %v3903_v43 = vpop.f32.mrb[24].mxu0 }
 0x1c7   : > { %v3905_v45 = vpop.f32.mrb[25].mxu0 }
 0x1c8   : > { %5272 = vst [vmem:[#allocation8_spill] sm:$0xff] %v3905_v45  ;;  %v3907_v47 = vpop.f32.mrb[26].mxu0 }
 0x1c9   : > { %v3909_v48 = vpop.f32.mrb[27].mxu0 }
 0x1ca   : > { %5273 = vst [vmem:[#allocation9_spill] sm:$0xff] %v3909_v48 }
 0x1ce   : > { %v3911_v49 = vpop.f32.mrb[28].mxu0 }
 0x1cf   : > { %v3913_v50 = vpop.f32.mrb[29].mxu0 }
 0x1d0   : > { %5274 = vst [vmem:[#allocation10_spill] sm:$0xff] %v3913_v50  ;;  %v3915_v51 = vpop.f32.mrb[30].mxu0 }
 0x1d1   : > { %v3917_v52 = vpop.f32.mrb[31].mxu0 }
 0x1d2   : > { %5275 = vst [vmem:[#allocation11_spill] sm:$0xff] %v3917_v52 }
 0x1f4   : > { %v1443_v53 = vpop.f32.mrb[0].mxu1 }
 0x1f5   : > { %v3920_v54 = vadd.f32 %v1443_v53, %v3845_v0  ;;  %v3922_v55 = vpop.f32.mrb[1].mxu1 }
 0x1f6   : > { %v3924_v56 = vpop.f32.mrb[32].mxu0  ;;  %v1447_v57 = vpop.f32.mrb[2].mxu1 }
 0x1f7   : > { %v3926_v58 = vpop.f32.mrb[33].mxu0  ;;  %v3929_v59 = vadd.f32 %v1447_v57, %v3845_v0  ;;  %1582 = vmax.xlane.f32.xlu0 %v3920_v54  ;;  %v3932_v60 = vpop.f32.mrb[3].mxu1 }
 0x1f8   : > { %5276 = vst [vmem:[#allocation12_spill] sm:$0xff] %v3926_v58  ;;  %v3934_v61 = vpop.f32.mrb[34].mxu0 }
 0x1f9   : > { %5277 = vst [vmem:[#allocation13_spill] sm:$0xff] %v3929_v59  ;;  %v3936_v62 = vpop.f32.mrb[35].mxu0  ;;  %1584 = vmax.xlane.f32.xlu1 %v3929_v59 }
 0x1fa   : > { %5278 = vst [vmem:[#allocation14_spill] sm:$0xff] %v3936_v62 }
 0x1fc   : > { %v1453_v1 = vpop.f32.mrb[4].mxu1 }
 0x1fd   : > { %v3944_v2 = vadd.f32 %v1453_v1, %v3845_v0  ;;  %1546 = vmax.xlane.f32.xlu1 %v3941_v63  ;;  %v3951_v18 = vpop.f32.mrb[5].mxu1 }
 0x1fe   : > { %v3953_v19 = vpop.f32.mrb[36].mxu0  ;;  %v1457_v20 = vpop.f32.mrb[6].mxu1 }
 0x1ff   : > { %5279 = vst [vmem:[#allocation15_spill] sm:$0xff] %v3944_v2  ;;  %v3955_v21 = vpop.f32.mrb[37].mxu0  ;;  %1586 = vmax.xlane.f32.xlu0 %v3944_v2  ;;  %v3962_v22 = vpop.f32.mrb[7].mxu1  ;;  %v3970_v8 = vadd.f32 %v1457_v20, %v3845_v0  ;;  %v4019_v20 = vadd.f32 %v3891_v37, %v3845_v0  ;;  %v4036_v37 = vadd.f32 %v3895_v41, %v3845_v0 }
 0x200   : > { %5280 = vst [vmem:[#allocation16_spill] sm:$0xff] %v3955_v21  ;;  %v3964_v23 = vpop.f32.mrb[38].mxu0 }
 0x201   : > { %v3966_v24 = vpop.f32.mrb[39].mxu0  ;;  %1548 = vmax.xlane.f32.xlu1 %v3949_v4  ;;  %5282 = vst [vmem:[#allocation18_spill] sm:$0xff] %v3970_v8 }
 0x202   : > { %5281 = vst [vmem:[#allocation17_spill] sm:$0xff] %v3966_v24 }
 0x203   : > { %1550 = vmax.xlane.f32.xlu0 %v3960_v35 }
 0x205   : > { %1588 = vmax.xlane.f32.xlu1 %v3970_v8 }
 0x209   : > { %1552 = vmax.xlane.f32.xlu1 %v3976_v25 }
 0x210   : > { %v4094_v6 = vpop.xlane.xlu0 %1542 }
 0x211   : > { %5299 = vst [vmem:[#allocation35_spill] sm:$0xff] %v4094_v6 }
 0x236   : > { %v1463_v10 = vpop.f32.mrb[8].mxu1 }
 0x237   : > { %v3980_v26 = vadd.f32 %v1463_v10, %v3845_v0  ;;  %v3982_v27 = vpop.f32.mrb[9].mxu1 }
 0x238   : > { %v1467_v28 = vpop.f32.mrb[10].mxu1 }
 0x239   : > { %5283 = vst [vmem:[#allocation19_spill] sm:$0xff] %v3980_v26  ;;  %v3985_v30 = vadd.f32 %v1467_v28, %v3845_v0  ;;  %1590 = vmax.xlane.f32.xlu0 %v3980_v26  ;;  %v3988_v31 = vpop.f32.mrb[11].mxu1 }
 0x23b   : > { %5284 = vst [vmem:[#allocation20_spill] sm:$0xff] %v3985_v30  ;;  %1592 = vmax.xlane.f32.xlu1 %v3985_v30 }
 0x23d   : > { %1554 = vmax.xlane.f32.xlu0 %v3992_v12 }
 0x23e   : > { %v1473_v33 = vpop.f32.mrb[12].mxu1 }
 0x23f   : > { %v4001_v39 = vadd.f32 %v1473_v33, %v3845_v0  ;;  %v4003_v53 = vpop.f32.mrb[13].mxu1  ;;  %1556 = vmax.xlane.f32.xlu1 %v3997_v32 }
 0x240   : > { %v1477_v57 = vpop.f32.mrb[14].mxu1 }
 0x241   : > { %5285 = vst [vmem:[#allocation21_spill] sm:$0xff] %v4001_v39  ;;  %v4011_v1 = vadd.f32 %v1477_v57, %v3845_v0  ;;  %1594 = vmax.xlane.f32.xlu0 %v4001_v39  ;;  %v4014_v16 = vpop.f32.mrb[15].mxu1 }
 0x243   : > { %5286 = vst [vmem:[#allocation22_spill] sm:$0xff] %v4011_v1  ;;  %1596 = vmax.xlane.f32.xlu1 %v4011_v1 }
 0x245   : > { %1558 = vmax.xlane.f32.xlu0 %v4008_v14 }
 0x246   : > { %v1483_v10 = vpop.f32.mrb[16].mxu1 }
 0x247   : > { %v4023_v28 = vadd.f32 %v1483_v10, %v3845_v0  ;;  %v4025_v34 = vpop.f32.mrb[17].mxu1  ;;  %1560 = vmax.xlane.f32.xlu1 %v4019_v20  ;;  %v4041_v10 = vadd.f32 %v3899_v29, %v3845_v0  ;;  %v4058_v29 = vadd.f32 %v3903_v43, %v3845_v0 }
 0x248   : > { %v1487_v33 = vpop.f32.mrb[18].mxu1 }
 0x249   : > { %5287 = vst [vmem:[#allocation23_spill] sm:$0xff] %v4023_v28  ;;  %v4029_v57 = vadd.f32 %v1487_v33, %v3845_v0  ;;  %1598 = vmax.xlane.f32.xlu0 %v4023_v28  ;;  %v4032_v24 = vpop.f32.mrb[19].mxu1 }
 0x24b   : > { %5288 = vst [vmem:[#allocation24_spill] sm:$0xff] %v4029_v57  ;;  %1600 = vmax.xlane.f32.xlu1 %v4029_v57 }
 0x24d   : > { %1562 = vmax.xlane.f32.xlu0 %v4036_v37 }
 0x24e   : > { %v1493_v21 = vpop.f32.mrb[20].mxu1 }
 0x24f   : > { %v4045_v33 = vadd.f32 %v1493_v21, %v3845_v0  ;;  %v4047_v62 = vpop.f32.mrb[21].mxu1  ;;  %1564 = vmax.xlane.f32.xlu1 %v4041_v10  ;;  %v4063_v21 = vadd.f32 %v3907_v47, %v3845_v0  ;;  %v4080_v47 = vadd.f32 %v3911_v49, %v3845_v0 }
 0x250   : > { %5290 = vst [vmem:[#allocation26_spill] sm:$0xff] %v4047_v62  ;;  %v1497_v58 = vpop.f32.mrb[22].mxu1 }
 0x251   : > { %5289 = vst [vmem:[#allocation25_spill] sm:$0xff] %v4045_v33  ;;  %v4051_v41 = vadd.f32 %v1497_v58, %v3845_v0  ;;  %1602 = vmax.xlane.f32.xlu0 %v4045_v33  ;;  %v4054_v52 = vpop.f32.mrb[23].mxu1 }
 0x252   : > { %5292 = vst [vmem:[#allocation28_spill] sm:$0xff] %v4054_v52 }
 0x253   : > { %5291 = vst [vmem:[#allocation27_spill] sm:$0xff] %v4051_v41  ;;  %1604 = vmax.xlane.f32.xlu1 %v4051_v41 }
 0x255   : > { %1566 = vmax.xlane.f32.xlu0 %v4058_v29 }
 0x257   : > { %1568 = vmax.xlane.f32.xlu1 %v4063_v21 }
 0x276   : > { %v1503_v58 = vpop.f32.mrb[24].mxu1 }
 0x277   : > { %v4068_v50 = vadd.f32 %v1503_v58, %v3845_v0  ;;  %v4070_v48 = vpop.f32.mrb[25].mxu1  ;;  %v4085_v58 = vadd.f32 %v3915_v51, %v3845_v0  ;;  %v4102_v51 = vpop.xlane.xlu1 %1544 }
 0x278   : > { %5294 = vst [vmem:[#allocation30_spill] sm:$0xff] %v4070_v48  ;;  %v1507_v45 = vpop.f32.mrb[26].mxu1  ;;  %5302 = vst [vmem:[#allocation38_spill] sm:$0xff] %v4102_v51  ;;  %v1450_v51 = vadd.f32 %v3932_v60, %v3797_v46 }
 0x279   : > { %5293 = vst [vmem:[#allocation29_spill] sm:$0xff] %v4068_v50  ;;  %v4073_v43 = vadd.f32 %v1507_v45, %v3845_v0  ;;  %v4075_v38 = vpop.f32.mrb[27].mxu1  ;;  %1606 = vmax.xlane.f32.xlu0 %v4068_v50 }
 0x27a   : > { %5296 = vst [vmem:[#allocation32_spill] sm:$0xff] %v4075_v38 }
 0x27b   : > { %5295 = vst [vmem:[#allocation31_spill] sm:$0xff] %v4073_v43  ;;  %1608 = vmax.xlane.f32.xlu1 %v4073_v43 }
 0x27d   : > { %1570 = vmax.xlane.f32.xlu0 %v4080_v47 }
 0x27e   : > { %v1513_v42 = vpop.f32.mrb[28].mxu1 }
 0x27f   : > { %v4089_v45 = vadd.f32 %v1513_v42, %v3845_v0  ;;  %v4091_v40 = vpop.f32.mrb[29].mxu1  ;;  %1572 = vmax.xlane.f32.xlu1 %v4085_v58  ;;  %v4106_v42 = vadd.f32 %v3924_v56, %v3845_v0 }
 0x280   : > { %5298 = vst [vmem:[#allocation34_spill] sm:$0xff] %v4091_v40  ;;  %v1517_v36 = vpop.f32.mrb[30].mxu1  ;;  %v1446_v40 = vadd.f32 %v3922_v55, %v3797_v46 }
 0x281   : > { %5297 = vst [vmem:[#allocation33_spill] sm:$0xff] %v4089_v45  ;;  %v4097_v49 = vadd.f32 %v1517_v36, %v3845_v0  ;;  %v4099_v3 = vpop.f32.mrb[31].mxu1  ;;  %1610 = vmax.xlane.f32.xlu0 %v4089_v45  ;;  %v4113_v36 = vadd.f32 %v3934_v61, %v3845_v0 }
 0x282   : > { %5301 = vst [vmem:[#allocation37_spill] sm:$0xff] %v4099_v3 }
 0x283   : > { %5300 = vst [vmem:[#allocation36_spill] sm:$0xff] %v4097_v49  ;;  %1612 = vmax.xlane.f32.xlu1 %v4097_v49 }
 0x284   : > { %v1583_v6 = vpop.xlane.xlu0 %1582 }
 0x285   : > { %1574 = vmax.xlane.f32.xlu0 %v4106_v42  ;;  %v4119_v56 = vsel %vm1702_vm0, %v1446_v40, %v1583_v6  ;;  %v4140_v6 = vadd.f32 %v3953_v19, %v3845_v0  ;;  %v1360_v19 = vadd.f32 %v3865_v9, %v3797_v46 }
 0x286   : > { %v1523_v3 = vpop.f32.mrb[32].mxu1  ;;  %5303 = vst [vmem:[#allocation39_spill] sm:$0xff] %v4119_v56  ;;  %v1585_v55 = vpop.xlane.xlu1 %1584 }
 0x287   : > { %v4122_v38 = vadd.f32 %v1523_v3, %v3845_v0  ;;  %v4124_v48 = vpop.f32.mrb[33].mxu1  ;;  %1576 = vmax.xlane.f32.xlu1 %v4113_v36  ;;  %v4128_v52 = vsel %vm1702_vm0, %v1450_v51, %v1585_v55  ;;  %v1356_v3 = vadd.f32 %v3861_v7, %v3797_v46  ;;  %v1456_v51 = vadd.f32 %v3951_v18, %v3797_v46 }
 0x288   : > { %v1527_v61 = vpop.f32.mrb[34].mxu1  ;;  %5305 = vst [vmem:[#allocation41_spill] sm:$0xff] %v4128_v52 }
 0x289   : > { %5304 = vst [vmem:[#allocation40_spill] sm:$0xff] %v4122_v38  ;;  %v4131_v62 = vadd.f32 %v1527_v61, %v3845_v0  ;;  %v4133_v60 = vpop.f32.mrb[35].mxu1  ;;  %1614 = vmax.xlane.f32.xlu0 %v4122_v38  ;;  %v4150_v61 = vadd.f32 %v3964_v23, %v3845_v0  ;;  %v1366_v23 = vadd.f32 %v3870_v11, %v3797_v46 }
 0x28a   : > { %5307 = vst [vmem:[#allocation43_spill] sm:$0xff] %v4133_v60  ;;  %v1547_v40 = vpop.xlane.xlu1 %1546 }
 0x28b   : > { %5306 = vst [vmem:[#allocation42_spill] sm:$0xff] %v4131_v62  ;;  %1616 = vmax.xlane.f32.xlu1 %v4131_v62  ;;  %v4146_v55 = vsel %vm1702_vm0, %v1356_v3, %v1547_v40 }
 0x28c   : > { %5308 = vst [vmem:[#allocation44_spill] sm:$0xff] %v4146_v55  ;;  %v1587_v7 = vpop.xlane.xlu0 %1586 }
 0x28d   : > { %1578 = vmax.xlane.f32.xlu0 %v4140_v6  ;;  %v4156_v56 = vsel %vm1702_vm0, %v1456_v51, %v1587_v7  ;;  %v1460_v7 = vadd.f32 %v3962_v22, %v3797_v46 }
 0x28e   : > { %v1533_v52 = vpop.f32.mrb[36].mxu1  ;;  %5309 = vst [vmem:[#allocation45_spill] sm:$0xff] %v4156_v56  ;;  %v1549_v3 = vpop.xlane.xlu1 %1548 }
 0x28f   : > { %v4159_v60 = vadd.f32 %v1533_v52, %v3845_v0  ;;  %v4161_v18 = vpop.f32.mrb[37].mxu1  ;;  %1580 = vmax.xlane.f32.xlu1 %v4150_v61  ;;  %v4167_v55 = vsel %vm1702_vm0, %v1360_v19, %v1549_v3 }
 0x290   : > { %v1537_v40 = vpop.f32.mrb[38].mxu1  ;;  %v1551_v52 = vpop.xlane.xlu0 %1550 }
 0x291   : > { %5310 = vst [vmem:[#allocation46_spill] sm:$0xff] %v4159_v60  ;;  %v4170_v9 = vadd.f32 %v1537_v40, %v3845_v0  ;;  %v4172_v51 = vpop.f32.mrb[39].mxu1  ;;  %1618 = vmax.xlane.f32.xlu0 %v4159_v60  ;;  %v4178_v56 = vsel %vm1702_vm0, %v1366_v23, %v1551_v52  ;;  %v1370_v0 = vadd.f32 %v3874_v13, %v3797_v46 }
 0x292   : > { %v1589_v11 = vpop.xlane.xlu1 %1588  ;;  %v1466_v13 = vadd.f32 %v3982_v27, %v3797_v46  ;;  %v1470_v23 = vadd.f32 %v3988_v31, %v3797_v46 }
 0x293   : > { %5311 = vst [vmem:[#allocation47_spill] sm:$0xff] %v4170_v9  ;;  %1620 = vmax.xlane.f32.xlu1 %v4170_v9  ;;  %v4182_v19 = vsel %vm1702_vm0, %v1460_v7, %v1589_v11  ;;  %v1376_v11 = vadd.f32 %v3878_v15, %v3797_v46 }
 0x295   : > { %1622 = vmin.xlane.f32.xlu0 %v3859_v44 }
 0x296   : > { %v1553_v3 = vpop.xlane.xlu1 %1552 }
 0x297   : > { %1624 = vmin.xlane.f32.xlu1 %v3850_v5  ;;  %v4189_v40 = vsel %vm1702_vm0, %v1370_v0, %v1553_v3  ;;  %v1380_v3 = vadd.f32 %v3882_v17, %v3797_v46 }
 0x299   : > { %1626 = vmin.xlane.f32.xlu0 %v3941_v63 }
 0x29b   : > { %1628 = vmin.xlane.f32.xlu1 %v3949_v4 }
 0x29d   : > { %1630 = vmin.xlane.f32.xlu0 %v3960_v35 }
 0x29f   : > { %1632 = vmin.xlane.f32.xlu1 %v3976_v25 }
 0x2a1   : > { %1634 = vmin.xlane.f32.xlu0 %v3992_v12 }
 0x2a3   : > { %1636 = vmin.xlane.f32.xlu1 %v3997_v32 }
 0x2a5   : > { %1638 = vmin.xlane.f32.xlu0 %v4008_v14 }
 0x2a7   : > { %1640 = vmin.xlane.f32.xlu1 %v4019_v20 }
 0x2a9   : > { %1642 = vmin.xlane.f32.xlu0 %v4036_v37 }
 0x2ab   : > { %1644 = vmin.xlane.f32.xlu1 %v4041_v10 }
 0x2ad   : > { %1646 = vmin.xlane.f32.xlu0 %v4058_v29 }
 0x2af   : > { %1648 = vmin.xlane.f32.xlu1 %v4063_v21 }
 0x2b1   : > { %1650 = vmin.xlane.f32.xlu0 %v4080_v47 }
 0x2b3   : > { %1652 = vmin.xlane.f32.xlu1 %v4085_v58 }
 0x2b5   : > { %1654 = vmin.xlane.f32.xlu0 %v4106_v42 }
 0x2b7   : > { %1656 = vmin.xlane.f32.xlu1 %v4113_v36 }
 0x2b9   : > { %1658 = vmin.xlane.f32.xlu0 %v4140_v6 }
 0x2bb   : > { %1660 = vmin.xlane.f32.xlu1 %v4150_v61 }
 0x2bd   : > { %1662 = vmin.xlane.f32.xlu0 %v3920_v54 }
 0x2bf   : > { %1664 = vmin.xlane.f32.xlu1 %v3929_v59  ;;  %v5323_v59 = vld [vmem:[#allocation44_spill] sm:$0xff] }
 0x2c1   : > { %1666 = vmin.xlane.f32.xlu0 %v3944_v2 }
 0x2c3   : > { %1668 = vmin.xlane.f32.xlu1 %v3970_v8 }
 0x2c5   : > { %1670 = vmin.xlane.f32.xlu0 %v3980_v26 }
 0x2c6   : > { %v1591_v22 = vpop.xlane.xlu0 %1590 }
 0x2c7   : > { %v4219_v52 = vsel %vm1702_vm0, %v1466_v13, %v1591_v22  ;;  %1672 = vmin.xlane.f32.xlu1 %v3985_v30  ;;  %v1476_v22 = vadd.f32 %v4003_v53, %v3797_v46  ;;  %v5319_v30 = vld [vmem:[#allocation2_spill] sm:$0xff] }
 0x2c8   : > { %v1593_v7 = vpop.xlane.xlu1 %1592 }
 0x2c9   : > { %v4225_v0 = vsel %vm1702_vm0, %v1470_v23, %v1593_v7  ;;  %1674 = vmin.xlane.f32.xlu0 %v4001_v39  ;;  %v1480_v7 = vadd.f32 %v4014_v16, %v3797_v46  ;;  %v1486_v16 = vadd.f32 %v4025_v34, %v3797_v46 }
 0x2ca   : > { %v1555_v27 = vpop.xlane.xlu0 %1554 }
 0x2cb   : > { %v4231_v31 = vsel %vm1702_vm0, %v1376_v11, %v1555_v27  ;;  %1676 = vmin.xlane.f32.xlu1 %v4011_v1  ;;  %v5317_v1 = vld [vmem:[#allocation37_spill] sm:$0xff] }
 0x2cc   : > { %v1557_v13 = vpop.xlane.xlu1 %1556 }
 0x2cd   : > { %v4237_v15 = vsel %vm1702_vm0, %v1380_v3, %v1557_v13  ;;  %1678 = vmin.xlane.f32.xlu0 %v4023_v28 }
 0x2ce   : > { %v1595_v23 = vpop.xlane.xlu0 %1594 }
 0x2cf   : > { %v4243_v17 = vsel %vm1702_vm0, %v1476_v22, %v1595_v23  ;;  %1680 = vmin.xlane.f32.xlu1 %v4029_v57  ;;  %v1490_v22 = vadd.f32 %v4032_v24, %v3797_v46  ;;  %v5316_v57 = vld [vmem:[#allocation34_spill] sm:$0xff] }
 0x2d0   : > { %v1597_v11 = vpop.xlane.xlu1 %1596  ;;  %v1516_v28 = vadd.f32 %v5316_v57, %v3797_v46 }
 0x2d1   : > { %v4247_v27 = vsel %vm1702_vm0, %v1480_v7, %v1597_v11  ;;  %1682 = vmin.xlane.f32.xlu0 %v4045_v33 }
 0x2d2   : > { %v4250_v53 = vpop.xlane.xlu0 %1558 }
 0x2d3   : > { %1684 = vmin.xlane.f32.xlu1 %v4051_v41 }
 0x2d4   : > { %v4253_v3 = vpop.xlane.xlu1 %1560 }
 0x2d5   : > { %1686 = vmin.xlane.f32.xlu0 %v4068_v50  ;;  %v5312_v50 = vld [vmem:[#allocation26_spill] sm:$0xff] }
 0x2d6   : > { %v1599_v13 = vpop.xlane.xlu0 %1598  ;;  %v1496_v24 = vadd.f32 %v5312_v50, %v3797_v46 }
 0x2d7   : > { %v4261_v23 = vsel %vm1702_vm0, %v1486_v16, %v1599_v13  ;;  %1688 = vmin.xlane.f32.xlu1 %v4073_v43  ;;  %v5313_v13 = vld [vmem:[#allocation28_spill] sm:$0xff] }
 0x2d8   : > { %v1601_v7 = vpop.xlane.xlu1 %1600  ;;  %v1500_v43 = vadd.f32 %v5313_v13, %v3797_v46 }
 0x2d9   : > { %v4265_v11 = vsel %vm1702_vm0, %v1490_v22, %v1601_v7  ;;  %1690 = vmin.xlane.f32.xlu0 %v4089_v45 }
 0x2da   : > { %v4268_v41 = vpop.xlane.xlu0 %1562 }
 0x2db   : > { %1692 = vmin.xlane.f32.xlu1 %v4097_v49  ;;  %v5314_v49 = vld [vmem:[#allocation30_spill] sm:$0xff] }
 0x2dc   : > { %v4271_v34 = vpop.xlane.xlu1 %1564  ;;  %v1506_v13 = vadd.f32 %v5314_v49, %v3797_v46 }
 0x2dd   : > { %1694 = vmin.xlane.f32.xlu0 %v4122_v38 }
 0x2de   : > { %v1603_v16 = vpop.xlane.xlu0 %1602 }
 0x2df   : > { %v4279_v22 = vsel %vm1702_vm0, %v1496_v24, %v1603_v16  ;;  %1696 = vmin.xlane.f32.xlu1 %v4131_v62  ;;  %v5315_v24 = vld [vmem:[#allocation32_spill] sm:$0xff] }
 0x2e0   : > { %v1605_v7 = vpop.xlane.xlu1 %1604  ;;  %v1510_v16 = vadd.f32 %v5315_v24, %v3797_v46  ;;  %v1520_v24 = vadd.f32 %v5317_v1, %v3797_v46 }
 0x2e1   : > { %v4283_v45 = vsel %vm1702_vm0, %v1500_v43, %v1605_v7  ;;  %1698 = vmin.xlane.f32.xlu0 %v4159_v60 }
 0x2e2   : > { %v4287_v50 = vpop.xlane.xlu0 %1566 }
 0x2e3   : > { %1700 = vmin.xlane.f32.xlu1 %v4170_v9 }
 0x2e4   : > { %v4289_v38 = vpop.xlane.xlu1 %1568 }
 0x306   : > { %v1607_v33 = vpop.xlane.xlu0 %1606 }
 0x307   : > { %v4296_v62 = vsel %vm1702_vm0, %v1506_v13, %v1607_v33 }
 0x308   : > { %v1609_v43 = vpop.xlane.xlu1 %1608 }
 0x309   : > { %v4299_v7 = vsel %vm1702_vm0, %v1510_v16, %v1609_v43 }
 0x30a   : > { %v4301_v9 = vpop.xlane.xlu0 %1570 }
 0x30c   : > { %v4303_v60 = vpop.xlane.xlu1 %1572 }
 0x30e   : > { %1825 = vxpose.xlu0.b32.start [1/2] (short) %v3859_v44, 128  ;;  %v1611_v49 = vpop.xlane.xlu0 %1610  ;;  %v1526_v44 = vadd.f32 %v4124_v48, %v3797_v46 }
 0x30f   : > { %v4311_v33 = vsel %vm1702_vm0, %v1516_v28, %v1611_v49  ;;  %v5318_v28 = vld [vmem:[#allocation43_spill] sm:$0xff] }
 0x310   : > { %v1613_v13 = vpop.xlane.xlu1 %1612  ;;  %v1530_v49 = vadd.f32 %v5318_v28, %v3797_v46  ;;  %v1346_v28 = vadd.f32 %v5319_v30, %v3797_v46 }
 0x311   : > { %v4314_v16 = vsel %vm1702_vm0, %v1520_v24, %v1613_v13 }
 0x312   : > { %1826 = vxpose.xlu0.b32.end [2/2] (short) %v3850_v5, 128  ;;  %v4317_v43 = vpop.xlane.xlu0 %1574 }
 0x314   : > { %v4321_v57 = vpop.xlane.xlu1 %1576 }
 0x316   : > { %1857 = vxpose.xlu1.b32.start [1/2] (short) %v3941_v63, 128  ;;  %v1615_v1 = vpop.xlane.xlu0 %1614  ;;  %v1536_v63 = vadd.f32 %v4161_v18, %v3797_v46 }
 0x317   : > { %v4329_v24 = vsel %vm1702_vm0, %v1526_v44, %v1615_v1  ;;  %v1540_v44 = vadd.f32 %v4172_v51, %v3797_v46 }
 0x318   : > { %v1617_v5 = vpop.xlane.xlu1 %1616 }
 0x319   : > { %v4332_v13 = vsel %vm1702_vm0, %v1530_v49, %v1617_v5 }
 0x31a   : > { %1858 = vxpose.xlu1.b32.end [2/2] (short) %v3949_v4, 128  ;;  %v4335_v39 = vpop.xlane.xlu0 %1578  ;;  %v5320_v4 = vld [vmem:[#allocation3_spill] sm:$0xff] }
 0x31b   : > { %v1350_v49 = vadd.f32 %v5320_v4, %v3797_v46 }
 0x31c   : > { %v4337_v48 = vpop.xlane.xlu1 %1580 }
 0x31e   : > { %v1619_v26 = vpop.xlane.xlu0 %1618 }
 0x31f   : > { %v4346_v1 = vsel %vm1702_vm0, %v1536_v63, %v1619_v26  ;;  %v5321_v26 = vld [vmem:[#allocation35_spill] sm:$0xff]  ;;  %v5322_v63 = vld [vmem:[#allocation38_spill] sm:$0xff] }
 0x320   : > { %v1621_v5 = vpop.xlane.xlu1 %1620  ;;  %v1703_v30 = vsel %vm1702_vm0, %v1346_v28, %v5321_v26 }
 0x321   : > { %v4351_v8 = vsel %vm1702_vm0, %v1540_v44, %v1621_v5  ;;  %v1704_v44 = vsel %vm1702_vm0, %v1350_v49, %v5322_v63  ;;  %v5324_v63 = vld [vmem:[#allocation4_spill] sm:$0xff] }
 0x322   : > { %v1623_v18 = vpop.xlane.xlu0 %1622 }
 0x323   : > { %v1744_v51 = vsel %vm1743_vm1, %v1703_v30, %v1623_v18 }
 0x324   : > { %1785 = vst.msk [vmem:[%s4356_s11] sm:$0xff] %vm1784_vm2, %v1744_v51  ;;  %v1625_v4 = vpop.xlane.xlu1 %1624 }
 0x325   : > { %v1745_v5 = vsel %vm1743_vm1, %v1704_v44, %v1625_v4  ;;  %v1386_v44 = vadd.f32 %v5324_v63, %v3797_v46 }
 0x326   : > { %1786 = vst.msk [vmem:[%s4356_s11 + $0x8] sm:$0xff] %vm1784_vm2, %v1745_v5  ;;  %v1627_v2 = vpop.xlane.xlu0 %1626  ;;  %v5325_v5 = vld [vmem:[#allocation5_spill] sm:$0xff] }
 0x327   : > { %v1746_v28 = vsel %vm1743_vm1, %v5323_v59, %v1627_v2 }
 0x328   : > { %1787 = vst.msk [vmem:[%s4356_s11 + $0x10] sm:$0xff] %vm1784_vm2, %v1746_v28  ;;  %v1629_v26 = vpop.xlane.xlu1 %1628  ;;  %v1390_v28 = vadd.f32 %v5325_v5, %v3797_v46 }
 0x329   : > { %v1747_v30 = vsel %vm1743_vm1, %v4167_v55, %v1629_v26 }
 0x32a   : > { %1788 = vst.msk [vmem:[%s4356_s11 + $0x18] sm:$0xff] %vm1784_vm2, %v1747_v30  ;;  %v1631_v49 = vpop.xlane.xlu0 %1630  ;;  %v5326_v30 = vld [vmem:[#allocation6_spill] sm:$0xff] }
 0x32b   : > { %v1748_v18 = vsel %vm1743_vm1, %v4178_v56, %v1631_v49  ;;  %v1396_v49 = vadd.f32 %v5326_v30, %v3797_v46 }
 0x32c   : > { %1789 = vst.msk [vmem:[%s4356_s11 + $0x20] sm:$0xff] %vm1784_vm2, %v1748_v18  ;;  %v1633_v51 = vpop.xlane.xlu1 %1632  ;;  %v1712_v18 = vsel %vm1702_vm0, %v1390_v28, %v4253_v3  ;;  %v5328_v3 = vld [vmem:[#allocation8_spill] sm:$0xff] }
 0x32d   : > { %v1749_v59 = vsel %vm1743_vm1, %v4189_v40, %v1633_v51  ;;  %v1711_v40 = vsel %vm1702_vm0, %v1386_v44, %v4250_v53  ;;  %v5327_v53 = vld [vmem:[#allocation7_spill] sm:$0xff]  ;;  %v1406_v44 = vadd.f32 %v5328_v3, %v3797_v46 }
 0x32e   : > { %1790 = vst.msk [vmem:[%s4356_s11 + $0x28] sm:$0xff] %vm1784_vm2, %v1749_v59  ;;  %v1635_v2 = vpop.xlane.xlu0 %1634  ;;  %v1400_v59 = vadd.f32 %v5327_v53, %v3797_v46 }
 0x32f   : > { %v1750_v55 = vsel %vm1743_vm1, %v4231_v31, %v1635_v2  ;;  %v1713_v2 = vsel %vm1702_vm0, %v1396_v49, %v4268_v41  ;;  %v5329_v41 = vld [vmem:[#allocation9_spill] sm:$0xff] }
 0x330   : > { %1791 = vst.msk [vmem:[%s4356_s11 + $0x30] sm:$0xff] %vm1784_vm2, %v1750_v55  ;;  %v1637_v56 = vpop.xlane.xlu1 %1636  ;;  %v1410_v28 = vadd.f32 %v5329_v41, %v3797_v46 }
 0x331   : > { %v1751_v4 = vsel %vm1743_vm1, %v4237_v15, %v1637_v56  ;;  %v1714_v56 = vsel %vm1702_vm0, %v1400_v59, %v4271_v34  ;;  %v5330_v34 = vld [vmem:[#allocation10_spill] sm:$0xff] }
 0x332   : > { %1792 = vst.msk [vmem:[%s4356_s11 + $0x38] sm:$0xff] %vm1784_vm2, %v1751_v4  ;;  %v1639_v31 = vpop.xlane.xlu0 %1638  ;;  %v1416_v30 = vadd.f32 %v5330_v34, %v3797_v46  ;;  %v1716_v49 = vsel %vm1702_vm0, %v1410_v28, %v4289_v38  ;;  %v5332_v38 = vld [vmem:[#allocation12_spill] sm:$0xff] }
 0x333   : > { %v1752_v26 = vsel %vm1743_vm1, %v1711_v40, %v1639_v31  ;;  %v1715_v40 = vsel %vm1702_vm0, %v1406_v44, %v4287_v50  ;;  %v5331_v50 = vld [vmem:[#allocation11_spill] sm:$0xff] }
 0x334   : > { %1793 = vst.msk [vmem:[%s4356_s11 + $0x40] sm:$0xff] %vm1784_vm2, %v1752_v26  ;;  %v1641_v15 = vpop.xlane.xlu1 %1640  ;;  %v1717_v53 = vsel %vm1702_vm0, %v1416_v30, %v4301_v9  ;;  %v5333_v9 = vld [vmem:[#allocation14_spill] sm:$0xff] }
 0x335   : > { %v1753_v51 = vsel %vm1743_vm1, %v1712_v18, %v1641_v15 }
 0x336   : > { %1794 = vst.msk [vmem:[%s4356_s11 + $0x48] sm:$0xff] %vm1784_vm2, %v1753_v51  ;;  %v1643_v55 = vpop.xlane.xlu0 %1642  ;;  %v1420_v51 = vadd.f32 %v5331_v50, %v3797_v46 }
 0x337   : > { %v1754_v63 = vsel %vm1743_vm1, %v1713_v2, %v1643_v55  ;;  %v1426_v55 = vadd.f32 %v5332_v38, %v3797_v46  ;;  %v5338_v38 = vld [vmem:[#allocation45_spill] sm:$0xff] }
 0x338   : > { %1795 = vst.msk [vmem:[%s4356_s11 + $0x50] sm:$0xff] %vm1784_vm2, %v1754_v63  ;;  %v1645_v4 = vpop.xlane.xlu1 %1644  ;;  %v1718_v63 = vsel %vm1702_vm0, %v1420_v51, %v4303_v60  ;;  %v5334_v60 = vld [vmem:[#allocation16_spill] sm:$0xff]  ;;  %v5336_v51 = vld [vmem:[#allocation39_spill] sm:$0xff] }
 0x339   : > { %v1755_v5 = vsel %vm1743_vm1, %v1714_v56, %v1645_v4  ;;  %v1430_v56 = vadd.f32 %v5333_v9, %v3797_v46  ;;  %v1719_v4 = vsel %vm1702_vm0, %v1426_v55, %v4317_v43  ;;  %v1436_v28 = vadd.f32 %v5334_v60, %v3797_v46  ;;  %v5335_v43 = vld [vmem:[#allocation17_spill] sm:$0xff] }
 0x33a   : > { %1796 = vst.msk [vmem:[%s4356_s11 + $0x58] sm:$0xff] %vm1784_vm2, %v1755_v5  ;;  %v1647_v31 = vpop.xlane.xlu0 %1646  ;;  %v1440_v34 = vadd.f32 %v5335_v43, %v3797_v46 }
 0x33b   : > { %v1756_v26 = vsel %vm1743_vm1, %v1715_v40, %v1647_v31  ;;  %v1720_v40 = vsel %vm1702_vm0, %v1430_v56, %v4321_v57  ;;  %v1721_v30 = vsel %vm1702_vm0, %v1436_v28, %v4335_v39 }
 0x33c   : > { %1797 = vst.msk [vmem:[%s4356_s11 + $0x60] sm:$0xff] %vm1784_vm2, %v1756_v26  ;;  %v1649_v18 = vpop.xlane.xlu1 %1648  ;;  %v1722_v57 = vsel %vm1702_vm0, %v1440_v34, %v4337_v48 }
 0x33d   : > { %v1757_v15 = vsel %vm1743_vm1, %v1716_v49, %v1649_v18 }
 0x33e   : > { %1798 = vst.msk [vmem:[%s4356_s11 + $0x68] sm:$0xff] %vm1784_vm2, %v1757_v15  ;;  %v1651_v59 = vpop.xlane.xlu0 %1650 }
 0x33f   : > { %v1758_v2 = vsel %vm1743_vm1, %v1717_v53, %v1651_v59  ;;  %v5337_v59 = vld [vmem:[#allocation41_spill] sm:$0xff] }
 0x340   : > { %1799 = vst.msk [vmem:[%s4356_s11 + $0x70] sm:$0xff] %vm1784_vm2, %v1758_v2  ;;  %v1653_v3 = vpop.xlane.xlu1 %1652 }
 0x341   : > { %v1759_v44 = vsel %vm1743_vm1, %v1718_v63, %v1653_v3 }
 0x342   : > { %1800 = vst.msk [vmem:[%s4356_s11 + $0x78] sm:$0xff] %vm1784_vm2, %v1759_v44  ;;  %v1655_v5 = vpop.xlane.xlu0 %1654 }
 0x343   : > { %v1760_v41 = vsel %vm1743_vm1, %v1719_v4, %v1655_v5 }
 0x344   : > { %1801 = vst.msk [vmem:[%s4356_s11 + $0x80] sm:$0xff] %vm1784_vm2, %v1760_v41  ;;  %v1657_v31 = vpop.xlane.xlu1 %1656 }
 0x345   : > { %v1761_v26 = vsel %vm1743_vm1, %v1720_v40, %v1657_v31 }
 0x346   : > { %1802 = vst.msk [vmem:[%s4356_s11 + $0x88] sm:$0xff] %vm1784_vm2, %v1761_v26  ;;  %v1659_v49 = vpop.xlane.xlu0 %1658 }
 0x347   : > { %v1762_v18 = vsel %vm1743_vm1, %v1721_v30, %v1659_v49 }
 0x348   : > { %1803 = vst.msk [vmem:[%s4356_s11 + $0x90] sm:$0xff] %vm1784_vm2, %v1762_v18  ;;  %v1661_v15 = vpop.xlane.xlu1 %1660 }
 0x349   : > { %v1763_v50 = vsel %vm1743_vm1, %v1722_v57, %v1661_v15 }
 0x34a   : > { %1804 = vst.msk [vmem:[%s4356_s11 + $0x98] sm:$0xff] %vm1784_vm2, %v1763_v50  ;;  %v1663_v46 = vpop.xlane.xlu0 %1662 }
 0x34b   : > { %v1764_v39 = vsel %vm1743_vm1, %v5336_v51, %v1663_v46  ;;  %1889 = vxpose.xlu0.b32.start [1/2] (short) %v3960_v35, 128 }
 0x34c   : > { %1805 = vst.msk [vmem:[%s4356_s11 + $0xa0] sm:$0xff] %vm1784_vm2, %v1764_v39  ;;  %v1665_v53 = vpop.xlane.xlu1 %1664 }
 0x34d   : > { %v1765_v48 = vsel %vm1743_vm1, %v5337_v59, %v1665_v53 }
 0x34e   : > { %1806 = vst.msk [vmem:[%s4356_s11 + $0xa8] sm:$0xff] %vm1784_vm2, %v1765_v48  ;;  %v1667_v2 = vpop.xlane.xlu0 %1666 }
 0x34f   : > { %v1766_v55 = vsel %vm1743_vm1, %v5338_v38, %v1667_v2  ;;  %1890 = vxpose.xlu0.b32.end [2/2] (short) %v3976_v25, 128 }
 0x350   : > { %1807 = vst.msk [vmem:[%s4356_s11 + $0xb0] sm:$0xff] %vm1784_vm2, %v1766_v55  ;;  %v1669_v63 = vpop.xlane.xlu1 %1668 }
 0x351   : > { %v1767_v35 = vsel %vm1743_vm1, %v4182_v19, %v1669_v63 }
 0x352   : > { %1808 = vst.msk [vmem:[%s4356_s11 + $0xb8] sm:$0xff] %vm1784_vm2, %v1767_v35  ;;  %v1671_v3 = vpop.xlane.xlu0 %1670 }
 0x353   : > { %v1768_v44 = vsel %vm1743_vm1, %v4219_v52, %v1671_v3  ;;  %1921 = vxpose.xlu1.b32.start [1/2] (short) %v3992_v12, 128 }
 0x354   : > { %1809 = vst.msk [vmem:[%s4356_s11 + $0xc0] sm:$0xff] %vm1784_vm2, %v1768_v44  ;;  %v1673_v25 = vpop.xlane.xlu1 %1672 }
 0x355   : > { %v1769_v9 = vsel %vm1743_vm1, %v4225_v0, %v1673_v25 }
 0x356   : > { %1810 = vst.msk [vmem:[%s4356_s11 + $0xc8] sm:$0xff] %vm1784_vm2, %v1769_v9  ;;  %v1675_v19 = vpop.xlane.xlu0 %1674 }
 0x357   : > { %v1770_v56 = vsel %vm1743_vm1, %v4243_v17, %v1675_v19  ;;  %1922 = vxpose.xlu1.b32.end [2/2] (short) %v3997_v32, 128 }
 0x358   : > { %1811 = vst.msk [vmem:[%s4356_s11 + $0xd0] sm:$0xff] %vm1784_vm2, %v1770_v56  ;;  %v1677_v12 = vpop.xlane.xlu1 %1676 }
 0x359   : > { %v1771_v52 = vsel %vm1743_vm1, %v4247_v27, %v1677_v12 }
 0x35a   : > { %1812 = vst.msk [vmem:[%s4356_s11 + $0xd8] sm:$0xff] %vm1784_vm2, %v1771_v52  ;;  %v1679_v0 = vpop.xlane.xlu0 %1678 }
 0x35b   : > { %v1772_v4 = vsel %vm1743_vm1, %v4261_v23, %v1679_v0 }
 0x35c   : > { %1813 = vst.msk [vmem:[%s4356_s11 + $0xe0] sm:$0xff] %vm1784_vm2, %v1772_v4  ;;  %v1681_v17 = vpop.xlane.xlu1 %1680 }
 0x35d   : > { %v1773_v32 = vsel %vm1743_vm1, %v4265_v11, %v1681_v17 }
 0x35e   : > { %1814 = vst.msk [vmem:[%s4356_s11 + $0xe8] sm:$0xff] %vm1784_vm2, %v1773_v32  ;;  %v1683_v5 = vpop.xlane.xlu0 %1682 }
 0x35f   : > { %v1774_v27 = vsel %vm1743_vm1, %v4279_v22, %v1683_v5 }
 0x360   : > { %1815 = vst.msk [vmem:[%s4356_s11 + $0xf0] sm:$0xff] %vm1784_vm2, %v1774_v27  ;;  %v1685_v41 = vpop.xlane.xlu1 %1684 }
 0x361   : > { %v1775_v23 = vsel %vm1743_vm1, %v4283_v45, %v1685_v41 }
 0x362   : > { %1816 = vst.msk [vmem:[%s4356_s11 + $0xf8] sm:$0xff] %vm1784_vm2, %v1775_v23  ;;  %v1687_v60 = vpop.xlane.xlu0 %1686 }
 0x363   : > { %v1776_v11 = vsel %vm1743_vm1, %v4296_v62, %v1687_v60 }
 0x364   : > { %1817 = vst.msk [vmem:[%s4356_s11 + $0x100] sm:$0xff] %vm1784_vm2, %v1776_v11  ;;  %v1689_v28 = vpop.xlane.xlu1 %1688 }
 0x365   : > { %v1777_v22 = vsel %vm1743_vm1, %v4299_v7, %v1689_v28 }
 0x366   : > { %1818 = vst.msk [vmem:[%s4356_s11 + $0x108] sm:$0xff] %vm1784_vm2, %v1777_v22  ;;  %v1691_v40 = vpop.xlane.xlu0 %1690 }
 0x367   : > { %v1778_v45 = vsel %vm1743_vm1, %v4311_v33, %v1691_v40 }
 0x368   : > { %1819 = vst.msk [vmem:[%s4356_s11 + $0x110] sm:$0xff] %vm1784_vm2, %v1778_v45  ;;  %v1693_v31 = vpop.xlane.xlu1 %1692 }
 0x369   : > { %v1779_v62 = vsel %vm1743_vm1, %v4314_v16, %v1693_v31 }
 0x36a   : > { %1820 = vst.msk [vmem:[%s4356_s11 + $0x118] sm:$0xff] %vm1784_vm2, %v1779_v62  ;;  %v1695_v26 = vpop.xlane.xlu0 %1694 }
 0x36b   : > { %v1780_v7 = vsel %vm1743_vm1, %v4329_v24, %v1695_v26 }
 0x36c   : > { %1821 = vst.msk [vmem:[%s4356_s11 + $0x120] sm:$0xff] %vm1784_vm2, %v1780_v7  ;;  %v1697_v43 = vpop.xlane.xlu1 %1696 }
 0x36d   : > { %v1781_v33 = vsel %vm1743_vm1, %v4332_v13, %v1697_v43 }
 0x36e   : > { %1822 = vst.msk [vmem:[%s4356_s11 + $0x128] sm:$0xff] %vm1784_vm2, %v1781_v33  ;;  %v1699_v34 = vpop.xlane.xlu0 %1698 }
 0x36f   : > { %v1782_v30 = vsel %vm1743_vm1, %v4346_v1, %v1699_v34 }
 0x370   : > { %1823 = vst.msk [vmem:[%s4356_s11 + $0x130] sm:$0xff] %vm1784_vm2, %v1782_v30  ;;  %v1701_v16 = vpop.xlane.xlu1 %1700 }
 0x371   : > { %v1783_v49 = vsel %vm1743_vm1, %v4351_v8, %v1701_v16 }
 0x372   : > { %1824 = vst.msk [vmem:[%s4356_s11 + $0x138] sm:$0xff] %vm1784_vm2, %v1783_v49 }
 0x388   : > { %1953 = vxpose.xlu0.b32.start [1/2] (short) %v4008_v14, 128 }
 0x38c   : > { %1954 = vxpose.xlu0.b32.end [2/2] (short) %v4019_v20, 128 }
 0x38e   : > { %v1841_v8 = vpop.trf.xlu0 }
 0x38f   : > { %2466 = vst.msk [vmem:[%s4567_s14] sm:$0xff] %vm2465_vm3, %v1841_v8 }
 0x390   : > { %1985 = vxpose.xlu1.b32.start [1/2] (short) %v4036_v37, 128 }
 0x392   : > { %v1842_v14 = vpop.trf.xlu0 }
 0x393   : > { %2467 = vst.msk [vmem:[%s4567_s14 + $0x8] sm:$0xff] %vm2465_vm3, %v1842_v14 }
 0x394   : > { %1986 = vxpose.xlu1.b32.end [2/2] (short) %v4041_v10, 128 }
 0x396   : > { %v1873_v20 = vpop.trf.xlu1  ;;  %v1843_v24 = vpop.trf.xlu0 }
 0x397   : > { %2482 = vst.msk [vmem:[%s4567_s14 + $0x80] sm:$0xff] %vm2465_vm3, %v1873_v20  ;;  %2468 = vst.msk [vmem:[%s4567_s14 + $0x10] sm:$0xff] %vm2465_vm3, %v1843_v24 }
 0x39a   : > { %v1874_v13 = vpop.trf.xlu1  ;;  %v1844_v1 = vpop.trf.xlu0 }
 0x39b   : > { %2483 = vst.msk [vmem:[%s4567_s14 + $0x88] sm:$0xff] %vm2465_vm3, %v1874_v13  ;;  %2469 = vst.msk [vmem:[%s4567_s14 + $0x18] sm:$0xff] %vm2465_vm3, %v1844_v1 }
 0x39e   : > { %v1875_v37 = vpop.trf.xlu1  ;;  %v1845_v18 = vpop.trf.xlu0 }
 0x39f   : > { %2484 = vst.msk [vmem:[%s4567_s14 + $0x90] sm:$0xff] %vm2465_vm3, %v1875_v37  ;;  %2470 = vst.msk [vmem:[%s4567_s14 + $0x20] sm:$0xff] %vm2465_vm3, %v1845_v18 }
 0x3a2   : > { %v1876_v10 = vpop.trf.xlu1  ;;  %v1846_v57 = vpop.trf.xlu0 }
 0x3a3   : > { %2485 = vst.msk [vmem:[%s4567_s14 + $0x98] sm:$0xff] %vm2465_vm3, %v1876_v10  ;;  %2471 = vst.msk [vmem:[%s4567_s14 + $0x28] sm:$0xff] %vm2465_vm3, %v1846_v57 }
 0x3a6   : > { %v1877_v15 = vpop.trf.xlu1  ;;  %v1847_v50 = vpop.trf.xlu0 }
 0x3a7   : > { %2486 = vst.msk [vmem:[%s4567_s14 + $0xa0] sm:$0xff] %vm2465_vm3, %v1877_v15  ;;  %2472 = vst.msk [vmem:[%s4567_s14 + $0x30] sm:$0xff] %vm2465_vm3, %v1847_v50 }
 0x3aa   : > { %v1878_v46 = vpop.trf.xlu1  ;;  %v1848_v51 = vpop.trf.xlu0 }
 0x3ab   : > { %2487 = vst.msk [vmem:[%s4567_s14 + $0xa8] sm:$0xff] %vm2465_vm3, %v1878_v46  ;;  %2473 = vst.msk [vmem:[%s4567_s14 + $0x38] sm:$0xff] %vm2465_vm3, %v1848_v51 }
 0x3ae   : > { %v1879_v39 = vpop.trf.xlu1  ;;  %v1849_v53 = vpop.trf.xlu0 }
 0x3af   : > { %2488 = vst.msk [vmem:[%s4567_s14 + $0xb0] sm:$0xff] %vm2465_vm3, %v1879_v39  ;;  %2474 = vst.msk [vmem:[%s4567_s14 + $0x40] sm:$0xff] %vm2465_vm3, %v1849_v53 }
 0x3b2   : > { %v1880_v59 = vpop.trf.xlu1  ;;  %v1850_v48 = vpop.trf.xlu0 }
 0x3b3   : > { %2489 = vst.msk [vmem:[%s4567_s14 + $0xb8] sm:$0xff] %vm2465_vm3, %v1880_v59  ;;  %2475 = vst.msk [vmem:[%s4567_s14 + $0x48] sm:$0xff] %vm2465_vm3, %v1850_v48 }
 0x3b6   : > { %v1881_v2 = vpop.trf.xlu1  ;;  %v1851_v38 = vpop.trf.xlu0 }
 0x3b7   : > { %2490 = vst.msk [vmem:[%s4567_s14 + $0xc0] sm:$0xff] %vm2465_vm3, %v1881_v2  ;;  %2476 = vst.msk [vmem:[%s4567_s14 + $0x50] sm:$0xff] %vm2465_vm3, %v1851_v38 }
 0x3ba   : > { %v1882_v55 = vpop.trf.xlu1  ;;  %v1852_v63 = vpop.trf.xlu0 }
 0x3bb   : > { %2491 = vst.msk [vmem:[%s4567_s14 + $0xc8] sm:$0xff] %vm2465_vm3, %v1882_v55  ;;  %2477 = vst.msk [vmem:[%s4567_s14 + $0x58] sm:$0xff] %vm2465_vm3, %v1852_v63 }
 0x3be   : > { %v1883_v35 = vpop.trf.xlu1  ;;  %v1853_v3 = vpop.trf.xlu0 }
 0x3bf   : > { %2492 = vst.msk [vmem:[%s4567_s14 + $0xd0] sm:$0xff] %vm2465_vm3, %v1883_v35  ;;  %2478 = vst.msk [vmem:[%s4567_s14 + $0x60] sm:$0xff] %vm2465_vm3, %v1853_v3 }
 0x3c2   : > { %v1884_v44 = vpop.trf.xlu1  ;;  %v1854_v25 = vpop.trf.xlu0 }
 0x3c3   : > { %2493 = vst.msk [vmem:[%s4567_s14 + $0xd8] sm:$0xff] %vm2465_vm3, %v1884_v44  ;;  %2479 = vst.msk [vmem:[%s4567_s14 + $0x68] sm:$0xff] %vm2465_vm3, %v1854_v25 }
 0x3c6   : > { %v1885_v9 = vpop.trf.xlu1  ;;  %v1855_v19 = vpop.trf.xlu0  ;;  %2017 = vxpose.xlu0.b32.start [1/2] (short) %v4058_v29, 128 }
 0x3c7   : > { %2494 = vst.msk [vmem:[%s4567_s14 + $0xe0] sm:$0xff] %vm2465_vm3, %v1885_v9  ;;  %2480 = vst.msk [vmem:[%s4567_s14 + $0x70] sm:$0xff] %vm2465_vm3, %v1855_v19 }
 0x3ca   : > { %v1886_v56 = vpop.trf.xlu1  ;;  %2018 = vxpose.xlu0.b32.end [2/2] (short) %v4063_v21, 128  ;;  %v1856_v12 = vpop.trf.xlu0 }
 0x3cb   : > { %2495 = vst.msk [vmem:[%s4567_s14 + $0xe8] sm:$0xff] %vm2465_vm3, %v1886_v56  ;;  %2481 = vst.msk [vmem:[%s4567_s14 + $0x78] sm:$0xff] %vm2465_vm3, %v1856_v12 }
 0x3ce   : > { %v1887_v52 = vpop.trf.xlu1  ;;  %2049 = vxpose.xlu1.b32.start [1/2] (short) %v4080_v47, 128  ;;  %v1905_v29 = vpop.trf.xlu0 }
 0x3cf   : > { %2496 = vst.msk [vmem:[%s4567_s14 + $0xf0] sm:$0xff] %vm2465_vm3, %v1887_v52  ;;  %2498 = vst.msk [vmem:[%s4567_s14 + $0x100] sm:$0xff] %vm2465_vm3, %v1905_v29  ;;  %v5339_v52 = vld [vmem:[#allocation13_spill] sm:$0xff] }
 0x3d2   : > { %2050 = vxpose.xlu1.b32.end [2/2] (short) %v4085_v58, 128  ;;  %v1888_v21 = vpop.trf.xlu1  ;;  %v1906_v0 = vpop.trf.xlu0 }
 0x3d3   : > { %2497 = vst.msk [vmem:[%s4567_s14 + $0xf8] sm:$0xff] %vm2465_vm3, %v1888_v21  ;;  %2499 = vst.msk [vmem:[%s4567_s14 + $0x108] sm:$0xff] %vm2465_vm3, %v1906_v0  ;;  %v5340_v0 = vld [vmem:[#allocation15_spill] sm:$0xff] }
 0x3d6   : > { %v1937_v4 = vpop.trf.xlu1  ;;  %v1907_v47 = vpop.trf.xlu0 }
 0x3d7   : > { %2514 = vst.msk [vmem:[%s4567_s14 + $0x180] sm:$0xff] %vm2465_vm3, %v1937_v4  ;;  %2500 = vst.msk [vmem:[%s4567_s14 + $0x110] sm:$0xff] %vm2465_vm3, %v1907_v47  ;;  %v5341_v4 = vld [vmem:[#allocation18_spill] sm:$0xff] }
 0x3da   : > { %v1938_v17 = vpop.trf.xlu1  ;;  %v1908_v32 = vpop.trf.xlu0 }
 0x3db   : > { %2515 = vst.msk [vmem:[%s4567_s14 + $0x188] sm:$0xff] %vm2465_vm3, %v1938_v17  ;;  %2501 = vst.msk [vmem:[%s4567_s14 + $0x118] sm:$0xff] %vm2465_vm3, %v1908_v32 }
 0x3de   : > { %v1939_v58 = vpop.trf.xlu1  ;;  %v1909_v5 = vpop.trf.xlu0 }
 0x3df   : > { %2516 = vst.msk [vmem:[%s4567_s14 + $0x190] sm:$0xff] %vm2465_vm3, %v1939_v58  ;;  %2502 = vst.msk [vmem:[%s4567_s14 + $0x120] sm:$0xff] %vm2465_vm3, %v1909_v5 }
 0x3e2   : > { %v1940_v27 = vpop.trf.xlu1  ;;  %v1910_v41 = vpop.trf.xlu0 }
 0x3e3   : > { %2517 = vst.msk [vmem:[%s4567_s14 + $0x198] sm:$0xff] %vm2465_vm3, %v1940_v27  ;;  %2503 = vst.msk [vmem:[%s4567_s14 + $0x128] sm:$0xff] %vm2465_vm3, %v1910_v41 }
 0x3e6   : > { %v1941_v23 = vpop.trf.xlu1  ;;  %v1911_v60 = vpop.trf.xlu0 }
 0x3e7   : > { %2518 = vst.msk [vmem:[%s4567_s14 + $0x1a0] sm:$0xff] %vm2465_vm3, %v1941_v23  ;;  %2504 = vst.msk [vmem:[%s4567_s14 + $0x130] sm:$0xff] %vm2465_vm3, %v1911_v60 }
 0x3ea   : > { %v1942_v11 = vpop.trf.xlu1  ;;  %v1912_v28 = vpop.trf.xlu0 }
 0x3eb   : > { %2519 = vst.msk [vmem:[%s4567_s14 + $0x1a8] sm:$0xff] %vm2465_vm3, %v1942_v11  ;;  %2505 = vst.msk [vmem:[%s4567_s14 + $0x138] sm:$0xff] %vm2465_vm3, %v1912_v28 }
 0x3ee   : > { %v1943_v22 = vpop.trf.xlu1  ;;  %v1913_v40 = vpop.trf.xlu0 }
 0x3ef   : > { %2520 = vst.msk [vmem:[%s4567_s14 + $0x1b0] sm:$0xff] %vm2465_vm3, %v1943_v22  ;;  %2506 = vst.msk [vmem:[%s4567_s14 + $0x140] sm:$0xff] %vm2465_vm3, %v1913_v40 }
 0x3f2   : > { %v1944_v45 = vpop.trf.xlu1  ;;  %v1914_v31 = vpop.trf.xlu0 }
 0x3f3   : > { %2521 = vst.msk [vmem:[%s4567_s14 + $0x1b8] sm:$0xff] %vm2465_vm3, %v1944_v45  ;;  %2507 = vst.msk [vmem:[%s4567_s14 + $0x148] sm:$0xff] %vm2465_vm3, %v1914_v31 }
 0x3f6   : > { %v1945_v62 = vpop.trf.xlu1  ;;  %v1915_v26 = vpop.trf.xlu0 }
 0x3f7   : > { %2522 = vst.msk [vmem:[%s4567_s14 + $0x1c0] sm:$0xff] %vm2465_vm3, %v1945_v62  ;;  %2508 = vst.msk [vmem:[%s4567_s14 + $0x150] sm:$0xff] %vm2465_vm3, %v1915_v26 }
 0x3fa   : > { %v1946_v7 = vpop.trf.xlu1  ;;  %v1916_v43 = vpop.trf.xlu0 }
 0x3fb   : > { %2523 = vst.msk [vmem:[%s4567_s14 + $0x1c8] sm:$0xff] %vm2465_vm3, %v1946_v7  ;;  %2509 = vst.msk [vmem:[%s4567_s14 + $0x158] sm:$0xff] %vm2465_vm3, %v1916_v43 }
 0x3fe   : > { %v1947_v33 = vpop.trf.xlu1  ;;  %v1917_v34 = vpop.trf.xlu0 }
 0x3ff   : > { %2524 = vst.msk [vmem:[%s4567_s14 + $0x1d0] sm:$0xff] %vm2465_vm3, %v1947_v33  ;;  %2510 = vst.msk [vmem:[%s4567_s14 + $0x160] sm:$0xff] %vm2465_vm3, %v1917_v34 }
 0x402   : > { %v1948_v30 = vpop.trf.xlu1  ;;  %v1918_v16 = vpop.trf.xlu0 }
 0x403   : > { %2525 = vst.msk [vmem:[%s4567_s14 + $0x1d8] sm:$0xff] %vm2465_vm3, %v1948_v30  ;;  %2511 = vst.msk [vmem:[%s4567_s14 + $0x168] sm:$0xff] %vm2465_vm3, %v1918_v16 }
 0x406   : > { %v1949_v49 = vpop.trf.xlu1  ;;  %v1919_v8 = vpop.trf.xlu0  ;;  %2081 = vxpose.xlu0.b32.start [1/2] (short) %v4106_v42, 128 }
 0x407   : > { %2526 = vst.msk [vmem:[%s4567_s14 + $0x1e0] sm:$0xff] %vm2465_vm3, %v1949_v49  ;;  %2512 = vst.msk [vmem:[%s4567_s14 + $0x170] sm:$0xff] %vm2465_vm3, %v1919_v8 }
 0x40a   : > { %v1950_v14 = vpop.trf.xlu1  ;;  %2082 = vxpose.xlu0.b32.end [2/2] (short) %v4113_v36, 128  ;;  %v1920_v20 = vpop.trf.xlu0 }
 0x40b   : > { %2527 = vst.msk [vmem:[%s4567_s14 + $0x1e8] sm:$0xff] %vm2465_vm3, %v1950_v14  ;;  %2513 = vst.msk [vmem:[%s4567_s14 + $0x178] sm:$0xff] %vm2465_vm3, %v1920_v20 }
 0x40e   : > { %v1951_v24 = vpop.trf.xlu1  ;;  %2113 = vxpose.xlu1.b32.start [1/2] (short) %v4140_v6, 128  ;;  %v1969_v42 = vpop.trf.xlu0 }
 0x40f   : > { %2528 = vst.msk [vmem:[%s4567_s14 + $0x1f0] sm:$0xff] %vm2465_vm3, %v1951_v24  ;;  %2530 = vst.msk [vmem:[%s4567_s14 + $0x200] sm:$0xff] %vm2465_vm3, %v1969_v42  ;;  %v5342_v42 = vld [vmem:[#allocation19_spill] sm:$0xff] }
 0x412   : > { %2114 = vxpose.xlu1.b32.end [2/2] (short) %v4150_v61, 128  ;;  %v1952_v36 = vpop.trf.xlu1  ;;  %v1970_v13 = vpop.trf.xlu0 }
 0x413   : > { %2529 = vst.msk [vmem:[%s4567_s14 + $0x1f8] sm:$0xff] %vm2465_vm3, %v1952_v36  ;;  %2531 = vst.msk [vmem:[%s4567_s14 + $0x208] sm:$0xff] %vm2465_vm3, %v1970_v13  ;;  %v5343_v13 = vld [vmem:[#allocation20_spill] sm:$0xff] }
 0x416   : > { %v2001_v1 = vpop.trf.xlu1  ;;  %v1971_v6 = vpop.trf.xlu0 }
 0x417   : > { %2546 = vst.msk [vmem:[%s4567_s14 + $0x280] sm:$0xff] %vm2465_vm3, %v2001_v1  ;;  %2532 = vst.msk [vmem:[%s4567_s14 + $0x210] sm:$0xff] %vm2465_vm3, %v1971_v6 }
 0x41a   : > { %v2002_v37 = vpop.trf.xlu1  ;;  %v1972_v18 = vpop.trf.xlu0 }
 0x41b   : > { %2547 = vst.msk [vmem:[%s4567_s14 + $0x288] sm:$0xff] %vm2465_vm3, %v2002_v37  ;;  %2533 = vst.msk [vmem:[%s4567_s14 + $0x218] sm:$0xff] %vm2465_vm3, %v1972_v18  ;;  %v5344_v37 = vld [vmem:[#allocation21_spill] sm:$0xff] }
 0x41e   : > { %v2003_v61 = vpop.trf.xlu1  ;;  %v1973_v10 = vpop.trf.xlu0 }
 0x41f   : > { %2548 = vst.msk [vmem:[%s4567_s14 + $0x290] sm:$0xff] %vm2465_vm3, %v2003_v61  ;;  %2534 = vst.msk [vmem:[%s4567_s14 + $0x220] sm:$0xff] %vm2465_vm3, %v1973_v10  ;;  %v5345_v61 = vld [vmem:[#allocation22_spill] sm:$0xff] }
 0x422   : > { %v2004_v57 = vpop.trf.xlu1  ;;  %v1974_v15 = vpop.trf.xlu0 }
 0x423   : > { %2549 = vst.msk [vmem:[%s4567_s14 + $0x298] sm:$0xff] %vm2465_vm3, %v2004_v57  ;;  %2535 = vst.msk [vmem:[%s4567_s14 + $0x228] sm:$0xff] %vm2465_vm3, %v1974_v15 }
 0x426   : > { %v2005_v50 = vpop.trf.xlu1  ;;  %v1975_v46 = vpop.trf.xlu0 }
 0x427   : > { %2550 = vst.msk [vmem:[%s4567_s14 + $0x2a0] sm:$0xff] %vm2465_vm3, %v2005_v50  ;;  %2536 = vst.msk [vmem:[%s4567_s14 + $0x230] sm:$0xff] %vm2465_vm3, %v1975_v46 }
 0x42a   : > { %v2006_v51 = vpop.trf.xlu1  ;;  %v1976_v39 = vpop.trf.xlu0 }
 0x42b   : > { %2551 = vst.msk [vmem:[%s4567_s14 + $0x2a8] sm:$0xff] %vm2465_vm3, %v2006_v51  ;;  %2537 = vst.msk [vmem:[%s4567_s14 + $0x238] sm:$0xff] %vm2465_vm3, %v1976_v39 }
 0x42e   : > { %v2007_v53 = vpop.trf.xlu1  ;;  %v1977_v59 = vpop.trf.xlu0 }
 0x42f   : > { %2552 = vst.msk [vmem:[%s4567_s14 + $0x2b0] sm:$0xff] %vm2465_vm3, %v2007_v53  ;;  %2538 = vst.msk [vmem:[%s4567_s14 + $0x240] sm:$0xff] %vm2465_vm3, %v1977_v59 }
 0x432   : > { %v2008_v48 = vpop.trf.xlu1  ;;  %v1978_v2 = vpop.trf.xlu0 }
 0x433   : > { %2553 = vst.msk [vmem:[%s4567_s14 + $0x2b8] sm:$0xff] %vm2465_vm3, %v2008_v48  ;;  %2539 = vst.msk [vmem:[%s4567_s14 + $0x248] sm:$0xff] %vm2465_vm3, %v1978_v2 }
 0x436   : > { %v2009_v38 = vpop.trf.xlu1  ;;  %v1979_v55 = vpop.trf.xlu0 }
 0x437   : > { %2554 = vst.msk [vmem:[%s4567_s14 + $0x2c0] sm:$0xff] %vm2465_vm3, %v2009_v38  ;;  %2540 = vst.msk [vmem:[%s4567_s14 + $0x250] sm:$0xff] %vm2465_vm3, %v1979_v55 }
 0x43a   : > { %v2010_v63 = vpop.trf.xlu1  ;;  %v1980_v35 = vpop.trf.xlu0 }
 0x43b   : > { %2555 = vst.msk [vmem:[%s4567_s14 + $0x2c8] sm:$0xff] %vm2465_vm3, %v2010_v63  ;;  %2541 = vst.msk [vmem:[%s4567_s14 + $0x258] sm:$0xff] %vm2465_vm3, %v1980_v35 }
 0x43e   : > { %v2011_v3 = vpop.trf.xlu1  ;;  %v1981_v44 = vpop.trf.xlu0 }
 0x43f   : > { %2556 = vst.msk [vmem:[%s4567_s14 + $0x2d0] sm:$0xff] %vm2465_vm3, %v2011_v3  ;;  %2542 = vst.msk [vmem:[%s4567_s14 + $0x260] sm:$0xff] %vm2465_vm3, %v1981_v44 }
 0x442   : > { %v2012_v25 = vpop.trf.xlu1  ;;  %v1982_v9 = vpop.trf.xlu0 }
 0x443   : > { %2557 = vst.msk [vmem:[%s4567_s14 + $0x2d8] sm:$0xff] %vm2465_vm3, %v2012_v25  ;;  %2543 = vst.msk [vmem:[%s4567_s14 + $0x268] sm:$0xff] %vm2465_vm3, %v1982_v9 }
 0x446   : > { %v2013_v19 = vpop.trf.xlu1  ;;  %v1983_v56 = vpop.trf.xlu0  ;;  %2145 = vxpose.xlu0.b32.start [1/2] (short) %v3920_v54, 128 }
 0x447   : > { %2558 = vst.msk [vmem:[%s4567_s14 + $0x2e0] sm:$0xff] %vm2465_vm3, %v2013_v19  ;;  %2544 = vst.msk [vmem:[%s4567_s14 + $0x270] sm:$0xff] %vm2465_vm3, %v1983_v56 }
 0x44a   : > { %v2014_v12 = vpop.trf.xlu1  ;;  %2146 = vxpose.xlu0.b32.end [2/2] (short) %v5339_v52, 128  ;;  %v1984_v29 = vpop.trf.xlu0 }
 0x44b   : > { %2559 = vst.msk [vmem:[%s4567_s14 + $0x2e8] sm:$0xff] %vm2465_vm3, %v2014_v12  ;;  %2545 = vst.msk [vmem:[%s4567_s14 + $0x278] sm:$0xff] %vm2465_vm3, %v1984_v29 }
 0x44e   : > { %v2015_v21 = vpop.trf.xlu1  ;;  %2177 = vxpose.xlu1.b32.start [1/2] (short) %v5340_v0, 128  ;;  %v2033_v54 = vpop.trf.xlu0 }
 0x44f   : > { %2560 = vst.msk [vmem:[%s4567_s14 + $0x2f0] sm:$0xff] %vm2465_vm3, %v2015_v21  ;;  %2562 = vst.msk [vmem:[%s4567_s14 + $0x300] sm:$0xff] %vm2465_vm3, %v2033_v54 }
 0x452   : > { %2178 = vxpose.xlu1.b32.end [2/2] (short) %v5341_v4, 128  ;;  %v2016_v47 = vpop.trf.xlu1  ;;  %v2034_v17 = vpop.trf.xlu0 }
 0x453   : > { %2561 = vst.msk [vmem:[%s4567_s14 + $0x2f8] sm:$0xff] %vm2465_vm3, %v2016_v47  ;;  %2563 = vst.msk [vmem:[%s4567_s14 + $0x308] sm:$0xff] %vm2465_vm3, %v2034_v17  ;;  %v5346_v47 = vld [vmem:[#allocation23_spill] sm:$0xff] }
 0x456   : > { %v2065_v32 = vpop.trf.xlu1  ;;  %v2035_v58 = vpop.trf.xlu0 }
 0x457   : > { %2578 = vst.msk [vmem:[%s4567_s14 + $0x380] sm:$0xff] %vm2465_vm3, %v2065_v32  ;;  %2564 = vst.msk [vmem:[%s4567_s14 + $0x310] sm:$0xff] %vm2465_vm3, %v2035_v58  ;;  %v5347_v32 = vld [vmem:[#allocation24_spill] sm:$0xff] }
 0x45a   : > { %v2066_v5 = vpop.trf.xlu1  ;;  %v2036_v27 = vpop.trf.xlu0 }
 0x45b   : > { %2579 = vst.msk [vmem:[%s4567_s14 + $0x388] sm:$0xff] %vm2465_vm3, %v2066_v5  ;;  %2565 = vst.msk [vmem:[%s4567_s14 + $0x318] sm:$0xff] %vm2465_vm3, %v2036_v27  ;;  %v5348_v27 = vld [vmem:[#allocation25_spill] sm:$0xff] }
 0x45e   : > { %v2067_v41 = vpop.trf.xlu1  ;;  %v2037_v23 = vpop.trf.xlu0 }
 0x45f   : > { %2580 = vst.msk [vmem:[%s4567_s14 + $0x390] sm:$0xff] %vm2465_vm3, %v2067_v41  ;;  %2566 = vst.msk [vmem:[%s4567_s14 + $0x320] sm:$0xff] %vm2465_vm3, %v2037_v23  ;;  %v5349_v23 = vld [vmem:[#allocation27_spill] sm:$0xff] }
 0x462   : > { %v2068_v60 = vpop.trf.xlu1  ;;  %v2038_v11 = vpop.trf.xlu0 }
 0x463   : > { %2581 = vst.msk [vmem:[%s4567_s14 + $0x398] sm:$0xff] %vm2465_vm3, %v2068_v60  ;;  %2567 = vst.msk [vmem:[%s4567_s14 + $0x328] sm:$0xff] %vm2465_vm3, %v2038_v11 }
 0x466   : > { %v2069_v28 = vpop.trf.xlu1  ;;  %v2039_v22 = vpop.trf.xlu0 }
 0x467   : > { %2582 = vst.msk [vmem:[%s4567_s14 + $0x3a0] sm:$0xff] %vm2465_vm3, %v2069_v28  ;;  %2568 = vst.msk [vmem:[%s4567_s14 + $0x330] sm:$0xff] %vm2465_vm3, %v2039_v22 }
 0x46a   : > { %v2070_v40 = vpop.trf.xlu1  ;;  %v2040_v45 = vpop.trf.xlu0 }
 0x46b   : > { %2583 = vst.msk [vmem:[%s4567_s14 + $0x3a8] sm:$0xff] %vm2465_vm3, %v2070_v40  ;;  %2569 = vst.msk [vmem:[%s4567_s14 + $0x338] sm:$0xff] %vm2465_vm3, %v2040_v45 }
 0x46e   : > { %v2071_v31 = vpop.trf.xlu1  ;;  %v2041_v62 = vpop.trf.xlu0 }
 0x46f   : > { %2584 = vst.msk [vmem:[%s4567_s14 + $0x3b0] sm:$0xff] %vm2465_vm3, %v2071_v31  ;;  %2570 = vst.msk [vmem:[%s4567_s14 + $0x340] sm:$0xff] %vm2465_vm3, %v2041_v62 }
 0x472   : > { %v2072_v26 = vpop.trf.xlu1  ;;  %v2042_v7 = vpop.trf.xlu0 }
 0x473   : > { %2585 = vst.msk [vmem:[%s4567_s14 + $0x3b8] sm:$0xff] %vm2465_vm3, %v2072_v26  ;;  %2571 = vst.msk [vmem:[%s4567_s14 + $0x348] sm:$0xff] %vm2465_vm3, %v2042_v7 }
 0x476   : > { %v2073_v43 = vpop.trf.xlu1  ;;  %v2043_v33 = vpop.trf.xlu0 }
 0x477   : > { %2586 = vst.msk [vmem:[%s4567_s14 + $0x3c0] sm:$0xff] %vm2465_vm3, %v2073_v43  ;;  %2572 = vst.msk [vmem:[%s4567_s14 + $0x350] sm:$0xff] %vm2465_vm3, %v2043_v33 }
 0x47a   : > { %v2074_v34 = vpop.trf.xlu1  ;;  %v2044_v30 = vpop.trf.xlu0 }
 0x47b   : > { %2587 = vst.msk [vmem:[%s4567_s14 + $0x3c8] sm:$0xff] %vm2465_vm3, %v2074_v34  ;;  %2573 = vst.msk [vmem:[%s4567_s14 + $0x358] sm:$0xff] %vm2465_vm3, %v2044_v30 }
 0x47e   : > { %v2075_v16 = vpop.trf.xlu1  ;;  %v2045_v49 = vpop.trf.xlu0 }
 0x47f   : > { %2588 = vst.msk [vmem:[%s4567_s14 + $0x3d0] sm:$0xff] %vm2465_vm3, %v2075_v16  ;;  %2574 = vst.msk [vmem:[%s4567_s14 + $0x360] sm:$0xff] %vm2465_vm3, %v2045_v49 }
 0x482   : > { %v2076_v8 = vpop.trf.xlu1  ;;  %v2046_v14 = vpop.trf.xlu0 }
 0x483   : > { %2589 = vst.msk [vmem:[%s4567_s14 + $0x3d8] sm:$0xff] %vm2465_vm3, %v2076_v8  ;;  %2575 = vst.msk [vmem:[%s4567_s14 + $0x368] sm:$0xff] %vm2465_vm3, %v2046_v14 }
 0x486   : > { %v2077_v20 = vpop.trf.xlu1  ;;  %v2047_v24 = vpop.trf.xlu0  ;;  %2209 = vxpose.xlu0.b32.start [1/2] (short) %v5342_v42, 128 }
 0x487   : > { %2590 = vst.msk [vmem:[%s4567_s14 + $0x3e0] sm:$0xff] %vm2465_vm3, %v2077_v20  ;;  %2576 = vst.msk [vmem:[%s4567_s14 + $0x370] sm:$0xff] %vm2465_vm3, %v2047_v24 }
 0x48a   : > { %v2078_v36 = vpop.trf.xlu1  ;;  %2210 = vxpose.xlu0.b32.end [2/2] (short) %v5343_v13, 128  ;;  %v2048_v1 = vpop.trf.xlu0 }
 0x48b   : > { %2591 = vst.msk [vmem:[%s4567_s14 + $0x3e8] sm:$0xff] %vm2465_vm3, %v2078_v36  ;;  %2577 = vst.msk [vmem:[%s4567_s14 + $0x378] sm:$0xff] %vm2465_vm3, %v2048_v1 }
 0x48e   : > { %v2079_v6 = vpop.trf.xlu1  ;;  %2241 = vxpose.xlu1.b32.start [1/2] (short) %v5344_v37, 128  ;;  %v2097_v18 = vpop.trf.xlu0 }
 0x48f   : > { %2592 = vst.msk [vmem:[%s4567_s14 + $0x3f0] sm:$0xff] %vm2465_vm3, %v2079_v6  ;;  %2594 = vst.msk [vmem:[%s4567_s14 + $0x400] sm:$0xff] %vm2465_vm3, %v2097_v18 }
 0x492   : > { %2242 = vxpose.xlu1.b32.end [2/2] (short) %v5345_v61, 128  ;;  %v2080_v10 = vpop.trf.xlu1  ;;  %v2098_v57 = vpop.trf.xlu0 }
 0x493   : > { %2593 = vst.msk [vmem:[%s4567_s14 + $0x3f8] sm:$0xff] %vm2465_vm3, %v2080_v10  ;;  %2595 = vst.msk [vmem:[%s4567_s14 + $0x408] sm:$0xff] %vm2465_vm3, %v2098_v57  ;;  %v5350_v10 = vld [vmem:[#allocation29_spill] sm:$0xff] }
 0x496   : > { %v2129_v15 = vpop.trf.xlu1  ;;  %v2099_v50 = vpop.trf.xlu0 }
 0x497   : > { %2610 = vst.msk [vmem:[%s4567_s14 + $0x480] sm:$0xff] %vm2465_vm3, %v2129_v15  ;;  %2596 = vst.msk [vmem:[%s4567_s14 + $0x410] sm:$0xff] %vm2465_vm3, %v2099_v50  ;;  %v5351_v15 = vld [vmem:[#allocation31_spill] sm:$0xff] }
 0x49a   : > { %v2130_v46 = vpop.trf.xlu1  ;;  %v2100_v51 = vpop.trf.xlu0 }
 0x49b   : > { %2611 = vst.msk [vmem:[%s4567_s14 + $0x488] sm:$0xff] %vm2465_vm3, %v2130_v46  ;;  %2597 = vst.msk [vmem:[%s4567_s14 + $0x418] sm:$0xff] %vm2465_vm3, %v2100_v51  ;;  %v5352_v51 = vld [vmem:[#allocation33_spill] sm:$0xff] }
 0x49e   : > { %v2131_v39 = vpop.trf.xlu1  ;;  %v2101_v53 = vpop.trf.xlu0 }
 0x49f   : > { %2612 = vst.msk [vmem:[%s4567_s14 + $0x490] sm:$0xff] %vm2465_vm3, %v2131_v39  ;;  %2598 = vst.msk [vmem:[%s4567_s14 + $0x420] sm:$0xff] %vm2465_vm3, %v2101_v53  ;;  %v5353_v53 = vld [vmem:[#allocation36_spill] sm:$0xff] }
 0x4a2   : > { %v2132_v59 = vpop.trf.xlu1  ;;  %v2102_v48 = vpop.trf.xlu0 }
 0x4a3   : > { %2613 = vst.msk [vmem:[%s4567_s14 + $0x498] sm:$0xff] %vm2465_vm3, %v2132_v59  ;;  %2599 = vst.msk [vmem:[%s4567_s14 + $0x428] sm:$0xff] %vm2465_vm3, %v2102_v48 }
 0x4a6   : > { %v2133_v2 = vpop.trf.xlu1  ;;  %v2103_v38 = vpop.trf.xlu0 }
 0x4a7   : > { %2614 = vst.msk [vmem:[%s4567_s14 + $0x4a0] sm:$0xff] %vm2465_vm3, %v2133_v2  ;;  %2600 = vst.msk [vmem:[%s4567_s14 + $0x430] sm:$0xff] %vm2465_vm3, %v2103_v38 }
 0x4aa   : > { %v2134_v55 = vpop.trf.xlu1  ;;  %v2104_v63 = vpop.trf.xlu0 }
 0x4ab   : > { %2615 = vst.msk [vmem:[%s4567_s14 + $0x4a8] sm:$0xff] %vm2465_vm3, %v2134_v55  ;;  %2601 = vst.msk [vmem:[%s4567_s14 + $0x438] sm:$0xff] %vm2465_vm3, %v2104_v63 }
 0x4ae   : > { %v2135_v35 = vpop.trf.xlu1  ;;  %v2105_v3 = vpop.trf.xlu0 }
 0x4af   : > { %2616 = vst.msk [vmem:[%s4567_s14 + $0x4b0] sm:$0xff] %vm2465_vm3, %v2135_v35  ;;  %2602 = vst.msk [vmem:[%s4567_s14 + $0x440] sm:$0xff] %vm2465_vm3, %v2105_v3 }
 0x4b2   : > { %v2136_v44 = vpop.trf.xlu1  ;;  %v2106_v25 = vpop.trf.xlu0 }
 0x4b3   : > { %2617 = vst.msk [vmem:[%s4567_s14 + $0x4b8] sm:$0xff] %vm2465_vm3, %v2136_v44  ;;  %2603 = vst.msk [vmem:[%s4567_s14 + $0x448] sm:$0xff] %vm2465_vm3, %v2106_v25 }
 0x4b6   : > { %v2137_v9 = vpop.trf.xlu1  ;;  %v2107_v19 = vpop.trf.xlu0 }
 0x4b7   : > { %2618 = vst.msk [vmem:[%s4567_s14 + $0x4c0] sm:$0xff] %vm2465_vm3, %v2137_v9  ;;  %2604 = vst.msk [vmem:[%s4567_s14 + $0x450] sm:$0xff] %vm2465_vm3, %v2107_v19 }
 0x4ba   : > { %v2138_v56 = vpop.trf.xlu1  ;;  %v2108_v12 = vpop.trf.xlu0 }
 0x4bb   : > { %2619 = vst.msk [vmem:[%s4567_s14 + $0x4c8] sm:$0xff] %vm2465_vm3, %v2138_v56  ;;  %2605 = vst.msk [vmem:[%s4567_s14 + $0x458] sm:$0xff] %vm2465_vm3, %v2108_v12 }
 0x4be   : > { %v2139_v52 = vpop.trf.xlu1  ;;  %v2109_v29 = vpop.trf.xlu0 }
 0x4bf   : > { %2620 = vst.msk [vmem:[%s4567_s14 + $0x4d0] sm:$0xff] %vm2465_vm3, %v2139_v52  ;;  %2606 = vst.msk [vmem:[%s4567_s14 + $0x460] sm:$0xff] %vm2465_vm3, %v2109_v29 }
 0x4c2   : > { %v2140_v21 = vpop.trf.xlu1  ;;  %v2110_v0 = vpop.trf.xlu0 }
 0x4c3   : > { %2621 = vst.msk [vmem:[%s4567_s14 + $0x4d8] sm:$0xff] %vm2465_vm3, %v2140_v21  ;;  %2607 = vst.msk [vmem:[%s4567_s14 + $0x468] sm:$0xff] %vm2465_vm3, %v2110_v0 }
 0x4c6   : > { %v2141_v54 = vpop.trf.xlu1  ;;  %v2111_v4 = vpop.trf.xlu0  ;;  %2273 = vxpose.xlu0.b32.start [1/2] (short) %v5346_v47, 128 }
 0x4c7   : > { %2622 = vst.msk [vmem:[%s4567_s14 + $0x4e0] sm:$0xff] %vm2465_vm3, %v2141_v54  ;;  %2608 = vst.msk [vmem:[%s4567_s14 + $0x470] sm:$0xff] %vm2465_vm3, %v2111_v4 }
 0x4ca   : > { %v2142_v17 = vpop.trf.xlu1  ;;  %2274 = vxpose.xlu0.b32.end [2/2] (short) %v5347_v32, 128  ;;  %v2112_v58 = vpop.trf.xlu0 }
 0x4cb   : > { %2623 = vst.msk [vmem:[%s4567_s14 + $0x4e8] sm:$0xff] %vm2465_vm3, %v2142_v17  ;;  %2609 = vst.msk [vmem:[%s4567_s14 + $0x478] sm:$0xff] %vm2465_vm3, %v2112_v58 }
 0x4ce   : > { %v2143_v5 = vpop.trf.xlu1  ;;  %2305 = vxpose.xlu1.b32.start [1/2] (short) %v5348_v27, 128  ;;  %v2161_v41 = vpop.trf.xlu0 }
 0x4cf   : > { %2624 = vst.msk [vmem:[%s4567_s14 + $0x4f0] sm:$0xff] %vm2465_vm3, %v2143_v5  ;;  %2626 = vst.msk [vmem:[%s4567_s14 + $0x500] sm:$0xff] %vm2465_vm3, %v2161_v41 }
 0x4d2   : > { %2306 = vxpose.xlu1.b32.end [2/2] (short) %v5349_v23, 128  ;;  %v2144_v60 = vpop.trf.xlu1  ;;  %v2162_v11 = vpop.trf.xlu0 }
 0x4d3   : > { %2625 = vst.msk [vmem:[%s4567_s14 + $0x4f8] sm:$0xff] %vm2465_vm3, %v2144_v60  ;;  %2627 = vst.msk [vmem:[%s4567_s14 + $0x508] sm:$0xff] %vm2465_vm3, %v2162_v11  ;;  %v5354_v60 = vld [vmem:[#allocation40_spill] sm:$0xff] }
 0x4d6   : > { %v2193_v28 = vpop.trf.xlu1  ;;  %v2163_v22 = vpop.trf.xlu0 }
 0x4d7   : > { %2642 = vst.msk [vmem:[%s4567_s14 + $0x580] sm:$0xff] %vm2465_vm3, %v2193_v28  ;;  %2628 = vst.msk [vmem:[%s4567_s14 + $0x510] sm:$0xff] %vm2465_vm3, %v2163_v22  ;;  %v5355_v28 = vld [vmem:[#allocation42_spill] sm:$0xff] }
 0x4da   : > { %v2194_v40 = vpop.trf.xlu1  ;;  %v2164_v45 = vpop.trf.xlu0 }
 0x4db   : > { %2643 = vst.msk [vmem:[%s4567_s14 + $0x588] sm:$0xff] %vm2465_vm3, %v2194_v40  ;;  %2629 = vst.msk [vmem:[%s4567_s14 + $0x518] sm:$0xff] %vm2465_vm3, %v2164_v45  ;;  %v5356_v45 = vld [vmem:[#allocation46_spill] sm:$0xff] }
 0x4de   : > { %v2195_v31 = vpop.trf.xlu1  ;;  %v2165_v62 = vpop.trf.xlu0 }
 0x4df   : > { %2644 = vst.msk [vmem:[%s4567_s14 + $0x590] sm:$0xff] %vm2465_vm3, %v2195_v31  ;;  %2630 = vst.msk [vmem:[%s4567_s14 + $0x520] sm:$0xff] %vm2465_vm3, %v2165_v62  ;;  %v5357_v62 = vld [vmem:[#allocation47_spill] sm:$0xff] }
 0x4e2   : > { %v2196_v26 = vpop.trf.xlu1  ;;  %v2166_v7 = vpop.trf.xlu0 }
 0x4e3   : > { %2645 = vst.msk [vmem:[%s4567_s14 + $0x598] sm:$0xff] %vm2465_vm3, %v2196_v26  ;;  %2631 = vst.msk [vmem:[%s4567_s14 + $0x528] sm:$0xff] %vm2465_vm3, %v2166_v7 }
 0x4e6   : > { %v2197_v43 = vpop.trf.xlu1  ;;  %v2167_v33 = vpop.trf.xlu0 }
 0x4e7   : > { %2646 = vst.msk [vmem:[%s4567_s14 + $0x5a0] sm:$0xff] %vm2465_vm3, %v2197_v43  ;;  %2632 = vst.msk [vmem:[%s4567_s14 + $0x530] sm:$0xff] %vm2465_vm3, %v2167_v33 }
 0x4ea   : > { %v2198_v34 = vpop.trf.xlu1  ;;  %v2168_v30 = vpop.trf.xlu0 }
 0x4eb   : > { %2647 = vst.msk [vmem:[%s4567_s14 + $0x5a8] sm:$0xff] %vm2465_vm3, %v2198_v34  ;;  %2633 = vst.msk [vmem:[%s4567_s14 + $0x538] sm:$0xff] %vm2465_vm3, %v2168_v30 }
 0x4ee   : > { %v2199_v16 = vpop.trf.xlu1  ;;  %v2169_v49 = vpop.trf.xlu0 }
 0x4ef   : > { %2648 = vst.msk [vmem:[%s4567_s14 + $0x5b0] sm:$0xff] %vm2465_vm3, %v2199_v16  ;;  %2634 = vst.msk [vmem:[%s4567_s14 + $0x540] sm:$0xff] %vm2465_vm3, %v2169_v49 }
 0x4f2   : > { %v2200_v8 = vpop.trf.xlu1  ;;  %v2170_v14 = vpop.trf.xlu0 }
 0x4f3   : > { %2649 = vst.msk [vmem:[%s4567_s14 + $0x5b8] sm:$0xff] %vm2465_vm3, %v2200_v8  ;;  %2635 = vst.msk [vmem:[%s4567_s14 + $0x548] sm:$0xff] %vm2465_vm3, %v2170_v14 }
 0x4f6   : > { %v2201_v20 = vpop.trf.xlu1  ;;  %v2171_v24 = vpop.trf.xlu0 }
 0x4f7   : > { %2650 = vst.msk [vmem:[%s4567_s14 + $0x5c0] sm:$0xff] %vm2465_vm3, %v2201_v20  ;;  %2636 = vst.msk [vmem:[%s4567_s14 + $0x550] sm:$0xff] %vm2465_vm3, %v2171_v24 }
 0x4fa   : > { %v2202_v42 = vpop.trf.xlu1  ;;  %v2172_v36 = vpop.trf.xlu0 }
 0x4fb   : > { %2651 = vst.msk [vmem:[%s4567_s14 + $0x5c8] sm:$0xff] %vm2465_vm3, %v2202_v42  ;;  %2637 = vst.msk [vmem:[%s4567_s14 + $0x558] sm:$0xff] %vm2465_vm3, %v2172_v36 }
 0x4fe   : > { %v2203_v13 = vpop.trf.xlu1  ;;  %v2173_v1 = vpop.trf.xlu0 }
 0x4ff   : > { %2652 = vst.msk [vmem:[%s4567_s14 + $0x5d0] sm:$0xff] %vm2465_vm3, %v2203_v13  ;;  %2638 = vst.msk [vmem:[%s4567_s14 + $0x560] sm:$0xff] %vm2465_vm3, %v2173_v1 }
 0x502   : > { %v2204_v6 = vpop.trf.xlu1  ;;  %v2174_v37 = vpop.trf.xlu0 }
 0x503   : > { %2653 = vst.msk [vmem:[%s4567_s14 + $0x5d8] sm:$0xff] %vm2465_vm3, %v2204_v6  ;;  %2639 = vst.msk [vmem:[%s4567_s14 + $0x568] sm:$0xff] %vm2465_vm3, %v2174_v37 }
 0x506   : > { %v2205_v18 = vpop.trf.xlu1  ;;  %v2175_v61 = vpop.trf.xlu0  ;;  %2337 = vxpose.xlu0.b32.start [1/2] (short) %v5350_v10, 128 }
 0x507   : > { %2654 = vst.msk [vmem:[%s4567_s14 + $0x5e0] sm:$0xff] %vm2465_vm3, %v2205_v18  ;;  %2640 = vst.msk [vmem:[%s4567_s14 + $0x570] sm:$0xff] %vm2465_vm3, %v2175_v61 }
 0x50a   : > { %v2206_v57 = vpop.trf.xlu1  ;;  %2338 = vxpose.xlu0.b32.end [2/2] (short) %v5351_v15, 128  ;;  %v2176_v50 = vpop.trf.xlu0 }
 0x50b   : > { %2655 = vst.msk [vmem:[%s4567_s14 + $0x5e8] sm:$0xff] %vm2465_vm3, %v2206_v57  ;;  %2641 = vst.msk [vmem:[%s4567_s14 + $0x578] sm:$0xff] %vm2465_vm3, %v2176_v50 }
 0x50e   : > { %v2207_v46 = vpop.trf.xlu1  ;;  %2369 = vxpose.xlu1.b32.start [1/2] (short) %v5352_v51, 128  ;;  %v2225_v39 = vpop.trf.xlu0 }
 0x50f   : > { %2656 = vst.msk [vmem:[%s4567_s14 + $0x5f0] sm:$0xff] %vm2465_vm3, %v2207_v46  ;;  %2658 = vst.msk [vmem:[%s4567_s14 + $0x600] sm:$0xff] %vm2465_vm3, %v2225_v39 }
 0x512   : > { %2370 = vxpose.xlu1.b32.end [2/2] (short) %v5353_v53, 128  ;;  %v2208_v59 = vpop.trf.xlu1  ;;  %v2226_v48 = vpop.trf.xlu0 }
 0x513   : > { %2657 = vst.msk [vmem:[%s4567_s14 + $0x5f8] sm:$0xff] %vm2465_vm3, %v2208_v59  ;;  %2659 = vst.msk [vmem:[%s4567_s14 + $0x608] sm:$0xff] %vm2465_vm3, %v2226_v48 }
 0x516   : > { %v2257_v2 = vpop.trf.xlu1  ;;  %v2227_v38 = vpop.trf.xlu0 }
 0x517   : > { %2674 = vst.msk [vmem:[%s4567_s14 + $0x680] sm:$0xff] %vm2465_vm3, %v2257_v2  ;;  %2660 = vst.msk [vmem:[%s4567_s14 + $0x610] sm:$0xff] %vm2465_vm3, %v2227_v38 }
 0x51a   : > { %v2258_v55 = vpop.trf.xlu1  ;;  %v2228_v63 = vpop.trf.xlu0 }
 0x51b   : > { %2675 = vst.msk [vmem:[%s4567_s14 + $0x688] sm:$0xff] %vm2465_vm3, %v2258_v55  ;;  %2661 = vst.msk [vmem:[%s4567_s14 + $0x618] sm:$0xff] %vm2465_vm3, %v2228_v63 }
 0x51e   : > { %v2259_v35 = vpop.trf.xlu1  ;;  %v2229_v3 = vpop.trf.xlu0 }
 0x51f   : > { %2676 = vst.msk [vmem:[%s4567_s14 + $0x690] sm:$0xff] %vm2465_vm3, %v2259_v35  ;;  %2662 = vst.msk [vmem:[%s4567_s14 + $0x620] sm:$0xff] %vm2465_vm3, %v2229_v3 }
 0x522   : > { %v2260_v44 = vpop.trf.xlu1  ;;  %v2230_v25 = vpop.trf.xlu0 }
 0x523   : > { %2677 = vst.msk [vmem:[%s4567_s14 + $0x698] sm:$0xff] %vm2465_vm3, %v2260_v44  ;;  %2663 = vst.msk [vmem:[%s4567_s14 + $0x628] sm:$0xff] %vm2465_vm3, %v2230_v25 }
 0x526   : > { %v2261_v9 = vpop.trf.xlu1  ;;  %v2231_v19 = vpop.trf.xlu0 }
 0x527   : > { %2678 = vst.msk [vmem:[%s4567_s14 + $0x6a0] sm:$0xff] %vm2465_vm3, %v2261_v9  ;;  %2664 = vst.msk [vmem:[%s4567_s14 + $0x630] sm:$0xff] %vm2465_vm3, %v2231_v19 }
 0x52a   : > { %v2262_v56 = vpop.trf.xlu1  ;;  %v2232_v12 = vpop.trf.xlu0 }
 0x52b   : > { %2679 = vst.msk [vmem:[%s4567_s14 + $0x6a8] sm:$0xff] %vm2465_vm3, %v2262_v56  ;;  %2665 = vst.msk [vmem:[%s4567_s14 + $0x638] sm:$0xff] %vm2465_vm3, %v2232_v12 }
 0x52e   : > { %v2263_v52 = vpop.trf.xlu1  ;;  %v2233_v29 = vpop.trf.xlu0 }
 0x52f   : > { %2680 = vst.msk [vmem:[%s4567_s14 + $0x6b0] sm:$0xff] %vm2465_vm3, %v2263_v52  ;;  %2666 = vst.msk [vmem:[%s4567_s14 + $0x640] sm:$0xff] %vm2465_vm3, %v2233_v29 }
 0x532   : > { %v2264_v21 = vpop.trf.xlu1  ;;  %v2234_v0 = vpop.trf.xlu0 }
 0x533   : > { %2681 = vst.msk [vmem:[%s4567_s14 + $0x6b8] sm:$0xff] %vm2465_vm3, %v2264_v21  ;;  %2667 = vst.msk [vmem:[%s4567_s14 + $0x648] sm:$0xff] %vm2465_vm3, %v2234_v0 }
 0x536   : > { %v2265_v54 = vpop.trf.xlu1  ;;  %v2235_v4 = vpop.trf.xlu0 }
 0x537   : > { %2682 = vst.msk [vmem:[%s4567_s14 + $0x6c0] sm:$0xff] %vm2465_vm3, %v2265_v54  ;;  %2668 = vst.msk [vmem:[%s4567_s14 + $0x650] sm:$0xff] %vm2465_vm3, %v2235_v4 }
 0x53a   : > { %v2266_v47 = vpop.trf.xlu1  ;;  %v2236_v17 = vpop.trf.xlu0 }
 0x53b   : > { %2683 = vst.msk [vmem:[%s4567_s14 + $0x6c8] sm:$0xff] %vm2465_vm3, %v2266_v47  ;;  %2669 = vst.msk [vmem:[%s4567_s14 + $0x658] sm:$0xff] %vm2465_vm3, %v2236_v17 }
 0x53e   : > { %v2267_v32 = vpop.trf.xlu1  ;;  %v2237_v58 = vpop.trf.xlu0 }
 0x53f   : > { %2684 = vst.msk [vmem:[%s4567_s14 + $0x6d0] sm:$0xff] %vm2465_vm3, %v2267_v32  ;;  %2670 = vst.msk [vmem:[%s4567_s14 + $0x660] sm:$0xff] %vm2465_vm3, %v2237_v58 }
 0x542   : > { %v2268_v5 = vpop.trf.xlu1  ;;  %v2238_v27 = vpop.trf.xlu0 }
 0x543   : > { %2685 = vst.msk [vmem:[%s4567_s14 + $0x6d8] sm:$0xff] %vm2465_vm3, %v2268_v5  ;;  %2671 = vst.msk [vmem:[%s4567_s14 + $0x668] sm:$0xff] %vm2465_vm3, %v2238_v27 }
 0x546   : > { %v2269_v41 = vpop.trf.xlu1  ;;  %v2239_v23 = vpop.trf.xlu0  ;;  %2401 = vxpose.xlu0.b32.start [1/2] (short) %v5354_v60, 128 }
 0x547   : > { %2686 = vst.msk [vmem:[%s4567_s14 + $0x6e0] sm:$0xff] %vm2465_vm3, %v2269_v41  ;;  %2672 = vst.msk [vmem:[%s4567_s14 + $0x670] sm:$0xff] %vm2465_vm3, %v2239_v23 }
 0x54a   : > { %v2270_v11 = vpop.trf.xlu1  ;;  %2402 = vxpose.xlu0.b32.end [2/2] (short) %v5355_v28, 128  ;;  %v2240_v22 = vpop.trf.xlu0 }
 0x54b   : > { %2687 = vst.msk [vmem:[%s4567_s14 + $0x6e8] sm:$0xff] %vm2465_vm3, %v2270_v11  ;;  %2673 = vst.msk [vmem:[%s4567_s14 + $0x678] sm:$0xff] %vm2465_vm3, %v2240_v22 }
 0x54e   : > { %v2271_v40 = vpop.trf.xlu1  ;;  %2433 = vxpose.xlu1.b32.start [1/2] (short) %v5356_v45, 128  ;;  %v2289_v31 = vpop.trf.xlu0 }
 0x54f   : > { %2688 = vst.msk [vmem:[%s4567_s14 + $0x6f0] sm:$0xff] %vm2465_vm3, %v2271_v40  ;;  %2690 = vst.msk [vmem:[%s4567_s14 + $0x700] sm:$0xff] %vm2465_vm3, %v2289_v31 }
 0x552   : > { %2434 = vxpose.xlu1.b32.end [2/2] (short) %v5357_v62, 128  ;;  %v2272_v26 = vpop.trf.xlu1  ;;  %v2290_v7 = vpop.trf.xlu0 }
 0x553   : > { %2689 = vst.msk [vmem:[%s4567_s14 + $0x6f8] sm:$0xff] %vm2465_vm3, %v2272_v26  ;;  %2691 = vst.msk [vmem:[%s4567_s14 + $0x708] sm:$0xff] %vm2465_vm3, %v2290_v7 }
 0x556   : > { %v2321_v43 = vpop.trf.xlu1  ;;  %v2291_v33 = vpop.trf.xlu0 }
 0x557   : > { %2706 = vst.msk [vmem:[%s4567_s14 + $0x780] sm:$0xff] %vm2465_vm3, %v2321_v43  ;;  %2692 = vst.msk [vmem:[%s4567_s14 + $0x710] sm:$0xff] %vm2465_vm3, %v2291_v33 }
 0x55a   : > { %v2322_v34 = vpop.trf.xlu1  ;;  %v2292_v30 = vpop.trf.xlu0 }
 0x55b   : > { %2707 = vst.msk [vmem:[%s4567_s14 + $0x788] sm:$0xff] %vm2465_vm3, %v2322_v34  ;;  %2693 = vst.msk [vmem:[%s4567_s14 + $0x718] sm:$0xff] %vm2465_vm3, %v2292_v30 }
 0x55e   : > { %v2323_v16 = vpop.trf.xlu1  ;;  %v2293_v49 = vpop.trf.xlu0 }
 0x55f   : > { %2708 = vst.msk [vmem:[%s4567_s14 + $0x790] sm:$0xff] %vm2465_vm3, %v2323_v16  ;;  %2694 = vst.msk [vmem:[%s4567_s14 + $0x720] sm:$0xff] %vm2465_vm3, %v2293_v49 }
 0x562   : > { %v2324_v8 = vpop.trf.xlu1  ;;  %v2294_v14 = vpop.trf.xlu0 }
 0x563   : > { %2709 = vst.msk [vmem:[%s4567_s14 + $0x798] sm:$0xff] %vm2465_vm3, %v2324_v8  ;;  %2695 = vst.msk [vmem:[%s4567_s14 + $0x728] sm:$0xff] %vm2465_vm3, %v2294_v14 }
 0x566   : > { %v2325_v20 = vpop.trf.xlu1  ;;  %v2295_v24 = vpop.trf.xlu0 }
 0x567   : > { %2710 = vst.msk [vmem:[%s4567_s14 + $0x7a0] sm:$0xff] %vm2465_vm3, %v2325_v20  ;;  %2696 = vst.msk [vmem:[%s4567_s14 + $0x730] sm:$0xff] %vm2465_vm3, %v2295_v24 }
 0x56a   : > { %v2326_v42 = vpop.trf.xlu1  ;;  %v2296_v36 = vpop.trf.xlu0 }
 0x56b   : > { %2711 = vst.msk [vmem:[%s4567_s14 + $0x7a8] sm:$0xff] %vm2465_vm3, %v2326_v42  ;;  %2697 = vst.msk [vmem:[%s4567_s14 + $0x738] sm:$0xff] %vm2465_vm3, %v2296_v36 }
 0x56e   : > { %v2327_v13 = vpop.trf.xlu1  ;;  %v2297_v1 = vpop.trf.xlu0 }
 0x56f   : > { %2712 = vst.msk [vmem:[%s4567_s14 + $0x7b0] sm:$0xff] %vm2465_vm3, %v2327_v13  ;;  %2698 = vst.msk [vmem:[%s4567_s14 + $0x740] sm:$0xff] %vm2465_vm3, %v2297_v1 }
 0x572   : > { %v2328_v6 = vpop.trf.xlu1  ;;  %v2298_v37 = vpop.trf.xlu0 }
 0x573   : > { %2713 = vst.msk [vmem:[%s4567_s14 + $0x7b8] sm:$0xff] %vm2465_vm3, %v2328_v6  ;;  %2699 = vst.msk [vmem:[%s4567_s14 + $0x748] sm:$0xff] %vm2465_vm3, %v2298_v37 }
 0x576   : > { %v2329_v18 = vpop.trf.xlu1  ;;  %v2299_v61 = vpop.trf.xlu0 }
 0x577   : > { %2714 = vst.msk [vmem:[%s4567_s14 + $0x7c0] sm:$0xff] %vm2465_vm3, %v2329_v18  ;;  %2700 = vst.msk [vmem:[%s4567_s14 + $0x750] sm:$0xff] %vm2465_vm3, %v2299_v61 }
 0x57a   : > { %v2330_v10 = vpop.trf.xlu1  ;;  %v2300_v57 = vpop.trf.xlu0 }
 0x57b   : > { %2715 = vst.msk [vmem:[%s4567_s14 + $0x7c8] sm:$0xff] %vm2465_vm3, %v2330_v10  ;;  %2701 = vst.msk [vmem:[%s4567_s14 + $0x758] sm:$0xff] %vm2465_vm3, %v2300_v57 }
 0x57e   : > { %v2331_v15 = vpop.trf.xlu1  ;;  %v2301_v50 = vpop.trf.xlu0 }
 0x57f   : > { %2716 = vst.msk [vmem:[%s4567_s14 + $0x7d0] sm:$0xff] %vm2465_vm3, %v2331_v15  ;;  %2702 = vst.msk [vmem:[%s4567_s14 + $0x760] sm:$0xff] %vm2465_vm3, %v2301_v50 }
 0x582   : > { %v2332_v46 = vpop.trf.xlu1  ;;  %v2302_v51 = vpop.trf.xlu0 }
 0x583   : > { %2717 = vst.msk [vmem:[%s4567_s14 + $0x7d8] sm:$0xff] %vm2465_vm3, %v2332_v46  ;;  %2703 = vst.msk [vmem:[%s4567_s14 + $0x768] sm:$0xff] %vm2465_vm3, %v2302_v51 }
 0x586   : > { %v2333_v39 = vpop.trf.xlu1  ;;  %v2303_v53 = vpop.trf.xlu0 }
 0x587   : > { %2718 = vst.msk [vmem:[%s4567_s14 + $0x7e0] sm:$0xff] %vm2465_vm3, %v2333_v39  ;;  %2704 = vst.msk [vmem:[%s4567_s14 + $0x770] sm:$0xff] %vm2465_vm3, %v2303_v53 }
 0x58a   : > { %v2334_v59 = vpop.trf.xlu1  ;;  %v2304_v48 = vpop.trf.xlu0 }
 0x58b   : > { %2719 = vst.msk [vmem:[%s4567_s14 + $0x7e8] sm:$0xff] %vm2465_vm3, %v2334_v59  ;;  %2705 = vst.msk [vmem:[%s4567_s14 + $0x778] sm:$0xff] %vm2465_vm3, %v2304_v48 }
 0x58e   : > { %v2335_v2 = vpop.trf.xlu1  ;;  %v2353_v38 = vpop.trf.xlu0 }
 0x58f   : > { %2720 = vst.msk [vmem:[%s4567_s14 + $0x7f0] sm:$0xff] %vm2465_vm3, %v2335_v2  ;;  %2722 = vst.msk [vmem:[%s4567_s14 + $0x800] sm:$0xff] %vm2465_vm3, %v2353_v38 }
 0x592   : > { %v2336_v55 = vpop.trf.xlu1  ;;  %v2354_v63 = vpop.trf.xlu0 }
 0x593   : > { %2721 = vst.msk [vmem:[%s4567_s14 + $0x7f8] sm:$0xff] %vm2465_vm3, %v2336_v55  ;;  %2723 = vst.msk [vmem:[%s4567_s14 + $0x808] sm:$0xff] %vm2465_vm3, %v2354_v63 }
 0x596   : > { %v2385_v35 = vpop.trf.xlu1  ;;  %v2355_v3 = vpop.trf.xlu0 }
 0x597   : > { %2738 = vst.msk [vmem:[%s4567_s14 + $0x880] sm:$0xff] %vm2465_vm3, %v2385_v35  ;;  %2724 = vst.msk [vmem:[%s4567_s14 + $0x810] sm:$0xff] %vm2465_vm3, %v2355_v3 }
 0x59a   : > { %v2386_v44 = vpop.trf.xlu1  ;;  %v2356_v25 = vpop.trf.xlu0 }
 0x59b   : > { %2739 = vst.msk [vmem:[%s4567_s14 + $0x888] sm:$0xff] %vm2465_vm3, %v2386_v44  ;;  %2725 = vst.msk [vmem:[%s4567_s14 + $0x818] sm:$0xff] %vm2465_vm3, %v2356_v25 }
 0x59e   : > { %v2387_v9 = vpop.trf.xlu1  ;;  %v2357_v19 = vpop.trf.xlu0 }
 0x59f   : > { %2740 = vst.msk [vmem:[%s4567_s14 + $0x890] sm:$0xff] %vm2465_vm3, %v2387_v9  ;;  %2726 = vst.msk [vmem:[%s4567_s14 + $0x820] sm:$0xff] %vm2465_vm3, %v2357_v19 }
 0x5a2   : > { %v2388_v56 = vpop.trf.xlu1  ;;  %v2358_v12 = vpop.trf.xlu0 }
 0x5a3   : > { %2741 = vst.msk [vmem:[%s4567_s14 + $0x898] sm:$0xff] %vm2465_vm3, %v2388_v56  ;;  %2727 = vst.msk [vmem:[%s4567_s14 + $0x828] sm:$0xff] %vm2465_vm3, %v2358_v12 }
 0x5a6   : > { %v2389_v52 = vpop.trf.xlu1  ;;  %v2359_v29 = vpop.trf.xlu0 }
 0x5a7   : > { %2742 = vst.msk [vmem:[%s4567_s14 + $0x8a0] sm:$0xff] %vm2465_vm3, %v2389_v52  ;;  %2728 = vst.msk [vmem:[%s4567_s14 + $0x830] sm:$0xff] %vm2465_vm3, %v2359_v29 }
 0x5aa   : > { %v2390_v21 = vpop.trf.xlu1  ;;  %v2360_v0 = vpop.trf.xlu0 }
 0x5ab   : > { %2743 = vst.msk [vmem:[%s4567_s14 + $0x8a8] sm:$0xff] %vm2465_vm3, %v2390_v21  ;;  %2729 = vst.msk [vmem:[%s4567_s14 + $0x838] sm:$0xff] %vm2465_vm3, %v2360_v0 }
 0x5ae   : > { %v2391_v54 = vpop.trf.xlu1  ;;  %v2361_v4 = vpop.trf.xlu0 }
 0x5af   : > { %2744 = vst.msk [vmem:[%s4567_s14 + $0x8b0] sm:$0xff] %vm2465_vm3, %v2391_v54  ;;  %2730 = vst.msk [vmem:[%s4567_s14 + $0x840] sm:$0xff] %vm2465_vm3, %v2361_v4 }
 0x5b2   : > { %v2392_v47 = vpop.trf.xlu1  ;;  %v2362_v17 = vpop.trf.xlu0 }
 0x5b3   : > { %2745 = vst.msk [vmem:[%s4567_s14 + $0x8b8] sm:$0xff] %vm2465_vm3, %v2392_v47  ;;  %2731 = vst.msk [vmem:[%s4567_s14 + $0x848] sm:$0xff] %vm2465_vm3, %v2362_v17 }
 0x5b6   : > { %v2393_v32 = vpop.trf.xlu1  ;;  %v2363_v58 = vpop.trf.xlu0 }
 0x5b7   : > { %2746 = vst.msk [vmem:[%s4567_s14 + $0x8c0] sm:$0xff] %vm2465_vm3, %v2393_v32  ;;  %2732 = vst.msk [vmem:[%s4567_s14 + $0x850] sm:$0xff] %vm2465_vm3, %v2363_v58 }
 0x5ba   : > { %v2394_v5 = vpop.trf.xlu1  ;;  %v2364_v27 = vpop.trf.xlu0 }
 0x5bb   : > { %2747 = vst.msk [vmem:[%s4567_s14 + $0x8c8] sm:$0xff] %vm2465_vm3, %v2394_v5  ;;  %2733 = vst.msk [vmem:[%s4567_s14 + $0x858] sm:$0xff] %vm2465_vm3, %v2364_v27 }
 0x5be   : > { %v2395_v41 = vpop.trf.xlu1  ;;  %v2365_v23 = vpop.trf.xlu0 }
 0x5bf   : > { %2748 = vst.msk [vmem:[%s4567_s14 + $0x8d0] sm:$0xff] %vm2465_vm3, %v2395_v41  ;;  %2734 = vst.msk [vmem:[%s4567_s14 + $0x860] sm:$0xff] %vm2465_vm3, %v2365_v23 }
 0x5c2   : > { %v2396_v60 = vpop.trf.xlu1  ;;  %v2366_v11 = vpop.trf.xlu0 }
 0x5c3   : > { %2749 = vst.msk [vmem:[%s4567_s14 + $0x8d8] sm:$0xff] %vm2465_vm3, %v2396_v60  ;;  %2735 = vst.msk [vmem:[%s4567_s14 + $0x868] sm:$0xff] %vm2465_vm3, %v2366_v11 }
 0x5c6   : > { %v2397_v28 = vpop.trf.xlu1  ;;  %v2367_v22 = vpop.trf.xlu0 }
 0x5c7   : > { %2750 = vst.msk [vmem:[%s4567_s14 + $0x8e0] sm:$0xff] %vm2465_vm3, %v2397_v28  ;;  %2736 = vst.msk [vmem:[%s4567_s14 + $0x870] sm:$0xff] %vm2465_vm3, %v2367_v22 }
 0x5ca   : > { %v2398_v40 = vpop.trf.xlu1  ;;  %v2368_v45 = vpop.trf.xlu0 }
 0x5cb   : > { %2751 = vst.msk [vmem:[%s4567_s14 + $0x8e8] sm:$0xff] %vm2465_vm3, %v2398_v40  ;;  %2737 = vst.msk [vmem:[%s4567_s14 + $0x878] sm:$0xff] %vm2465_vm3, %v2368_v45 }
 0x5ce   : > { %v2399_v31 = vpop.trf.xlu1  ;;  %v2417_v62 = vpop.trf.xlu0 }
 0x5cf   : > { %2752 = vst.msk [vmem:[%s4567_s14 + $0x8f0] sm:$0xff] %vm2465_vm3, %v2399_v31  ;;  %2754 = vst.msk [vmem:[%s4567_s14 + $0x900] sm:$0xff] %vm2465_vm3, %v2417_v62 }
 0x5d2   : > { %v2400_v26 = vpop.trf.xlu1  ;;  %v2418_v7 = vpop.trf.xlu0 }
 0x5d3   : > { %2753 = vst.msk [vmem:[%s4567_s14 + $0x8f8] sm:$0xff] %vm2465_vm3, %v2400_v26  ;;  %2755 = vst.msk [vmem:[%s4567_s14 + $0x908] sm:$0xff] %vm2465_vm3, %v2418_v7 }
 0x5d6   : > { %v2449_v43 = vpop.trf.xlu1  ;;  %v2419_v33 = vpop.trf.xlu0 }
 0x5d7   : > { %2770 = vst.msk [vmem:[%s4567_s14 + $0x980] sm:$0xff] %vm2465_vm3, %v2449_v43  ;;  %2756 = vst.msk [vmem:[%s4567_s14 + $0x910] sm:$0xff] %vm2465_vm3, %v2419_v33 }
 0x5da   : > { %v2450_v34 = vpop.trf.xlu1  ;;  %v2420_v30 = vpop.trf.xlu0 }
 0x5db   : > { %2771 = vst.msk [vmem:[%s4567_s14 + $0x988] sm:$0xff] %vm2465_vm3, %v2450_v34  ;;  %2757 = vst.msk [vmem:[%s4567_s14 + $0x918] sm:$0xff] %vm2465_vm3, %v2420_v30 }
 0x5de   : > { %v2451_v16 = vpop.trf.xlu1  ;;  %v2421_v49 = vpop.trf.xlu0 }
 0x5df   : > { %2772 = vst.msk [vmem:[%s4567_s14 + $0x990] sm:$0xff] %vm2465_vm3, %v2451_v16  ;;  %2758 = vst.msk [vmem:[%s4567_s14 + $0x920] sm:$0xff] %vm2465_vm3, %v2421_v49 }
 0x5e2   : > { %v2452_v8 = vpop.trf.xlu1  ;;  %v2422_v14 = vpop.trf.xlu0 }
 0x5e3   : > { %2773 = vst.msk [vmem:[%s4567_s14 + $0x998] sm:$0xff] %vm2465_vm3, %v2452_v8  ;;  %2759 = vst.msk [vmem:[%s4567_s14 + $0x928] sm:$0xff] %vm2465_vm3, %v2422_v14 }
 0x5e6   : > { %v2453_v20 = vpop.trf.xlu1  ;;  %v2423_v24 = vpop.trf.xlu0 }
 0x5e7   : > { %2774 = vst.msk [vmem:[%s4567_s14 + $0x9a0] sm:$0xff] %vm2465_vm3, %v2453_v20  ;;  %2760 = vst.msk [vmem:[%s4567_s14 + $0x930] sm:$0xff] %vm2465_vm3, %v2423_v24 }
 0x5ea   : > { %v2454_v42 = vpop.trf.xlu1  ;;  %v2424_v36 = vpop.trf.xlu0 }
 0x5eb   : > { %2775 = vst.msk [vmem:[%s4567_s14 + $0x9a8] sm:$0xff] %vm2465_vm3, %v2454_v42  ;;  %2761 = vst.msk [vmem:[%s4567_s14 + $0x938] sm:$0xff] %vm2465_vm3, %v2424_v36 }
 0x5ee   : > { %v2455_v13 = vpop.trf.xlu1  ;;  %v2425_v1 = vpop.trf.xlu0 }
 0x5ef   : > { %2776 = vst.msk [vmem:[%s4567_s14 + $0x9b0] sm:$0xff] %vm2465_vm3, %v2455_v13  ;;  %2762 = vst.msk [vmem:[%s4567_s14 + $0x940] sm:$0xff] %vm2465_vm3, %v2425_v1 }
 0x5f2   : > { %v2456_v6 = vpop.trf.xlu1  ;;  %v2426_v37 = vpop.trf.xlu0 }
 0x5f3   : > { %2777 = vst.msk [vmem:[%s4567_s14 + $0x9b8] sm:$0xff] %vm2465_vm3, %v2456_v6  ;;  %2763 = vst.msk [vmem:[%s4567_s14 + $0x948] sm:$0xff] %vm2465_vm3, %v2426_v37 }
 0x5f6   : > { %v2457_v18 = vpop.trf.xlu1  ;;  %v2427_v61 = vpop.trf.xlu0 }
 0x5f7   : > { %2778 = vst.msk [vmem:[%s4567_s14 + $0x9c0] sm:$0xff] %vm2465_vm3, %v2457_v18  ;;  %2764 = vst.msk [vmem:[%s4567_s14 + $0x950] sm:$0xff] %vm2465_vm3, %v2427_v61 }
 0x5fa   : > { %v2458_v10 = vpop.trf.xlu1  ;;  %v2428_v57 = vpop.trf.xlu0 }
 0x5fb   : > { %2779 = vst.msk [vmem:[%s4567_s14 + $0x9c8] sm:$0xff] %vm2465_vm3, %v2458_v10  ;;  %2765 = vst.msk [vmem:[%s4567_s14 + $0x958] sm:$0xff] %vm2465_vm3, %v2428_v57 }
 0x5fe   : > { %v2459_v15 = vpop.trf.xlu1  ;;  %v2429_v50 = vpop.trf.xlu0 }
 0x5ff   : > { %2780 = vst.msk [vmem:[%s4567_s14 + $0x9d0] sm:$0xff] %vm2465_vm3, %v2459_v15  ;;  %2766 = vst.msk [vmem:[%s4567_s14 + $0x960] sm:$0xff] %vm2465_vm3, %v2429_v50 }
 0x602   : > { %v2460_v46 = vpop.trf.xlu1  ;;  %v2430_v51 = vpop.trf.xlu0 }
 0x603   : > { %2781 = vst.msk [vmem:[%s4567_s14 + $0x9d8] sm:$0xff] %vm2465_vm3, %v2460_v46  ;;  %2767 = vst.msk [vmem:[%s4567_s14 + $0x968] sm:$0xff] %vm2465_vm3, %v2430_v51 }
 0x606   : > { %v2461_v39 = vpop.trf.xlu1  ;;  %v2431_v53 = vpop.trf.xlu0 }
 0x607   : > { %2782 = vst.msk [vmem:[%s4567_s14 + $0x9e0] sm:$0xff] %vm2465_vm3, %v2461_v39  ;;  %2768 = vst.msk [vmem:[%s4567_s14 + $0x970] sm:$0xff] %vm2465_vm3, %v2431_v53 }
 0x60a   : > { %v2462_v59 = vpop.trf.xlu1  ;;  %v2432_v48 = vpop.trf.xlu0 }
 0x60b   : > { %2783 = vst.msk [vmem:[%s4567_s14 + $0x9e8] sm:$0xff] %vm2465_vm3, %v2462_v59  ;;  %2769 = vst.msk [vmem:[%s4567_s14 + $0x978] sm:$0xff] %vm2465_vm3, %v2432_v48 }
 0x60e   : > { %v2463_v2 = vpop.trf.xlu1 }
 0x60f   : > { %2784 = vst.msk [vmem:[%s4567_s14 + $0x9f0] sm:$0xff] %vm2465_vm3, %v2463_v2 }
 0x612   : > { %v2464_v38 = vpop.trf.xlu1 }
 0x613   : > { %2785 = vst.msk [vmem:[%s4567_s14 + $0x9f8] sm:$0xff] %vm2465_vm3, %v2464_v38 }
 0x614 PF: > { %s15_s15 = sadd.s32 1, %s3384_s15  }
 0x615   : > { %p12_p5 = scmp.ge.s32.totalorder %s15_s15, 4  }
 0x617   :  { %14 = sbr.rel (!%p12_p5) target bundleno = 1 (0x1), region = 74 }

</bundles_post_ra>
